<compile_context>
chip_gen: v6e
topology: v6e:2x2x1
jax: 0.10.0
libtpu: 0.0.40
codegen_flags: <defaults>
</compile_context>

<pallas_src>
import jax
import jax.numpy as jnp
from jax.experimental import pallas as pl
from jax.experimental.pallas import tpu as pltpu

VMEM_LIMIT = 48 * 1024 * 1024         # safe on v7x (64 MiB physical) and v5e/v6e
FUSED_VMEM_BUDGET = 36 * 1024 * 1024  # threshold for the fully fused per-type kernel
ROW_TILE_CAP = 1024                   # row tile cap for row-parallel kernels


# ----------------------------------------------------------------------------
# small helpers
# ----------------------------------------------------------------------------

def _round_up(n, m):
    return ((n + m - 1) // m) * m


def _row_pad(n):
    """Row padding used for every per-type array: 128-aligned, and a multiple of
    ROW_TILE_CAP when n exceeds it (so the row tile always divides it)."""
    return _round_up(n, 128) if n <= ROW_TILE_CAP else _round_up(n, ROW_TILE_CAP)


def _row_tile(rp):
    return min(rp, ROW_TILE_CAP)


def _tile(n, cap, align):
    """Pick (tile, padded_n): tile = cap when n >= cap, else aligned full dim."""
    if n >= cap:
        return cap, _round_up(n, cap)
    p = _round_up(n, align)
    return p, p


def _pad2(x, rows, cols):
    r, c = x.shape
    if (r, c) == (rows, cols):
        return x
    return jnp.pad(x, ((0, rows - r), (0, cols - c)))


def _elu(v):
    # exp argument clamped so the unselected branch never produces inf
    return jnp.where(v > 0.0, v, jnp.exp(jnp.minimum(v, 0.0)) - 1.0)


# ----------------------------------------------------------------------------
# attention epilogue (shared by the fused kernel and the fallback kernel)
# ----------------------------------------------------------------------------

def _attention_epilogue(feats, kvec_ref, qvec_ref, bias_ref, out_ref, att_ref,
                        apply_elu):
    tm, F = feats[0].shape
    # hoisted broadcasts (JAX does not CSE broadcast_in_dim)
    kvec = jnp.broadcast_to(kvec_ref[...], (tm, F))
    qvec = jnp.broadcast_to(qvec_ref[...], (tm, F))

    q_score = jnp.sum(feats[0] * qvec, axis=-1, keepdims=True)          # (tm, 1)
    scores = [_elu(jnp.sum(f * kvec, axis=-1, keepdims=True) + q_score)
              for f in feats]

    # running softmax over the T score columns — no lane concat
    m = scores[0]
    for s in scores[1:]:
        m = jnp.maximum(m, s)
    exps = [jnp.exp(s - m) for s in scores]
    denom = exps[0]
    for e in exps[1:]:
        denom = denom + e
    inv = 1.0 / denom
    weights = [e * inv for e in exps]

    agg = weights[0] * feats[0]
    for w, f in zip(weights[1:], feats[1:]):
        agg = agg + w * f
    out = agg + bias_ref[...]
    if apply_elu:
        out = _elu(out)
    out_ref[...] = out.astype(out_ref.dtype)

    # lane-dense attention slab: weight of type t lives in lane t
    lane = jax.lax.broadcasted_iota(jnp.int32, att_ref.shape, 1)
    att = jnp.zeros(att_ref.shape, jnp.float32)
    for t, w in enumerate(weights):
        att = jnp.where(lane == t, w, att)
    att_ref[...] = att


# ----------------------------------------------------------------------------
# fused per-type kernel:  self matmul + A@(X@W) per relation + attention (+ELU)
# ----------------------------------------------------------------------------

def _make_fused_kernel(n_nb, apply_elu):
    def kernel(*refs):
        x_self_ref, w_self_ref = refs[0], refs[1]
        adj_refs = [refs[2 + 3 * t] for t in range(n_nb)]
        xnb_refs = [refs[3 + 3 * t] for t in range(n_nb)]
        wrel_refs = [refs[4 + 3 * t] for t in range(n_nb)]
        base = 2 + 3 * n_nb
        kvec_ref, qvec_ref, bias_ref = refs[base], refs[base + 1], refs[base + 2]
        out_ref, att_ref = refs[base + 3], refs[base + 4]
        xw_refs = list(refs[base + 5: base + 5 + n_nb])

        # X_nb @ W_rel computed once (grid step 0) into a persistent bf16 VMEM
        # cache — no per-M-tile recompute of the projection.
        @pl.when(pl.program_id(0) == 0)
        def _():
            for t in range(n_nb):
                xw_refs[t][...] = jnp.dot(
                    xnb_refs[t][...], wrel_refs[t][...],
                    preferred_element_type=jnp.float32).astype(jnp.bfloat16)

        self_ft = jnp.dot(x_self_ref[...], w_self_ref[...],
                          preferred_element_type=jnp.float32)
        feats = [self_ft]
        for t in range(n_nb):
            feats.append(jnp.dot(adj_refs[t][...], xw_refs[t][...],
                                 preferred_element_type=jnp.float32))
        _attention_epilogue(feats, kvec_ref, qvec_ref, bias_ref,
                            out_ref, att_ref, apply_elu)
    return kernel


def _fused_fits(x_self, w_self, adj_list, xnb_list, out_dtype):
    Rk, Dk = x_self.shape
    F = w_self.shape[1]
    tm = _row_tile(Rk)
    total = 2 * (tm * Dk + Dk * F) * 2                     # x tile + w_self (bf16, dbl-buf)
    for adj, xnb in zip(adj_list, xnb_list):
        Rn = adj.shape[1]
        Dn = xnb.shape[1]
        total += 2 * (tm * Rn + Rn * Dn + Dn * F) * 2      # adj tile, x_nb, w_rel (bf16)
        total += Rn * F * 2                                # persistent X@W cache (bf16)
    total += 2 * tm * F * jnp.dtype(out_dtype).itemsize    # out (dbl-buf)
    total += 2 * tm * 128 * 4                              # attention slab (f32)
    return total <= FUSED_VMEM_BUDGET


def pallas_hete_agg_fused(x_self, w_self, adj_list, xnb_list, wrel_list,
                          q_vec, k_vec, bias, apply_elu, out_dtype):
    Rk, Dk = x_self.shape
    F = w_self.shape[1]
    n_nb = len(adj_list)
    tm = _row_tile(Rk)
    assert Rk % tm == 0

    in_specs = [pl.BlockSpec((tm, Dk), lambda i: (i, 0)),     # x_self row tile
                pl.BlockSpec((Dk, F), lambda i: (0, 0))]      # w_self (resident)
    operands = [x_self, w_self]
    scratch = []
    for adj, xnb, wrel in zip(adj_list, xnb_list, wrel_list):
        Rn = adj.shape[1]
        Dn = xnb.shape[1]
        assert xnb.shape[0] == Rn and wrel.shape == (Dn, F)
        in_specs += [pl.BlockSpec((tm, Rn), lambda i: (i, 0)),   # adjacency row tile
                     pl.BlockSpec((Rn, Dn), lambda i: (0, 0)),   # neighbor feats (resident)
                     pl.BlockSpec((Dn, F), lambda i: (0, 0))]    # relation weight (resident)
        operands += [adj, xnb, wrel]
        scratch.append(pltpu.VMEM((Rn, F), jnp.bfloat16))        # cached X_nb @ W_rel
    vec_spec = pl.BlockSpec((1, F), lambda i: (0, 0))
    in_specs += [vec_spec, vec_spec, vec_spec]
    operands += [k_vec, q_vec, bias]

    out, att = pl.pallas_call(
        _make_fused_kernel(n_nb, apply_elu),
        out_shape=(jax.ShapeDtypeStruct((Rk, F), out_dtype),
                   jax.ShapeDtypeStruct((Rk, 128), jnp.float32)),
        grid_spec=pltpu.PrefetchScalarGridSpec(
            num_scalar_prefetch=0, grid=(Rk // tm,),
            in_specs=in_specs,
            out_specs=(pl.BlockSpec((tm, F), lambda i: (i, 0)),
                       pl.BlockSpec((tm, 128), lambda i: (i, 0))),
            scratch_shapes=scratch),
        compiler_params=pltpu.CompilerParams(
            # row axis must be 'arbitrary': the X@W VMEM cache written at grid
            # step 0 has to stay visible to all later steps (no megacore split).
            dimension_semantics=("arbitrary",),
            vmem_limit_bytes=VMEM_LIMIT),
    )(*operands)
    return out, att


# ----------------------------------------------------------------------------
# fallback kernels (large graphs): tiled matmul + attention epilogue
# ----------------------------------------------------------------------------

def _matmul_kernel(a_ref, b_ref, o_ref, acc_ref):
    @pl.when(pl.program_id(2) == 0)
    def _():
        acc_ref[...] = jnp.zeros_like(acc_ref)

    acc_ref[...] += jnp.dot(a_ref[...], b_ref[...],
                            preferred_element_type=jnp.float32)

    @pl.when(pl.program_id(2) == pl.num_programs(2) - 1)
    def _():
        o_ref[...] = acc_ref[...].astype(o_ref.dtype)


def pallas_matmul(a, b, out_dtype=jnp.float32):
    """Tiled (M,K)@(K,N).  Operands are expected in the MXU dtype already
    (bf16 cast is done once in the wrapper); f32 accumulation, out_dtype store."""
    M, K = a.shape
    K2, N = b.shape
    assert K == K2
    tm, Mp = _tile(M, 512, 16)
    tn, Np = _tile(N, 512, 128)
    tk, Kp = _tile(K, 1024, 128)
    a_p = _pad2(a, Mp, Kp)
    b_p = _pad2(b, Kp, Np)
    grid = (Mp // tm, Np // tn, Kp // tk)
    out = pl.pallas_call(
        _matmul_kernel,
        out_shape=jax.ShapeDtypeStruct((Mp, Np), out_dtype),
        grid_spec=pltpu.PrefetchScalarGridSpec(
            num_scalar_prefetch=0, grid=grid,
            in_specs=[pl.BlockSpec((tm, tk), lambda i, j, k: (i, k)),
                      pl.BlockSpec((tk, tn), lambda i, j, k: (k, j))],
            out_specs=pl.BlockSpec((tm, tn), lambda i, j, k: (i, j)),
            scratch_shapes=[pltpu.VMEM((tm, tn), jnp.float32)]),
        compiler_params=pltpu.CompilerParams(
            dimension_semantics=("parallel", "parallel", "arbitrary"),
            vmem_limit_bytes=VMEM_LIMIT),
    )(a_p, b_p)
    if (Mp, Np) != (M, N):
        out = out[:M, :N]
    return out


def _make_att_kernel(n_nb, apply_elu):
    def kernel(*refs):
        feats = [refs[t][...].astype(jnp.float32) for t in range(n_nb + 1)]
        kvec_ref, qvec_ref, bias_ref = refs[n_nb + 1: n_nb + 4]
        out_ref, att_ref = refs[n_nb + 4], refs[n_nb + 5]
        _attention_epilogue(feats, kvec_ref, qvec_ref, bias_ref,
                            out_ref, att_ref, apply_elu)
    return kernel


def pallas_att_fuse(self_ft, nb_fts, q_vec, k_vec, bias, apply_elu, out_dtype):
    N, F = self_ft.shape
    n_nb = len(nb_fts)
    tm, Np = _tile(N, ROW_TILE_CAP, 16)
    self_p = _pad2(self_ft, Np, F)
    nb_p = [_pad2(v, Np, F) for v in nb_fts]
    row_spec = pl.BlockSpec((tm, F), lambda i: (i, 0))
    vec_spec = pl.BlockSpec((1, F), lambda i: (0, 0))
    out, att = pl.pallas_call(
        _make_att_kernel(n_nb, apply_elu),
        out_shape=(jax.ShapeDtypeStruct((Np, F), out_dtype),
                   jax.ShapeDtypeStruct((Np, 128), jnp.float32)),
        grid_spec=pltpu.PrefetchScalarGridSpec(
            num_scalar_prefetch=0, grid=(Np // tm,),
            in_specs=[row_spec] * (n_nb + 1) + [vec_spec, vec_spec, vec_spec],
            out_specs=(row_spec, pl.BlockSpec((tm, 128), lambda i: (i, 0)))),
        compiler_params=pltpu.CompilerParams(
            dimension_semantics=("parallel",),
            vmem_limit_bytes=VMEM_LIMIT),
    )(self_p, *nb_p, k_vec, q_vec, bias)
    return out[:N], att[:N]


# ----------------------------------------------------------------------------
# LayerNorm + classifier kernel
# ----------------------------------------------------------------------------

def _ln_cls_kernel(x_ref, g_ref, b_ref, w_ref, cb_ref, ln_ref, logit_ref):
    x = x_ref[...].astype(jnp.float32)
    mu = jnp.mean(x, axis=-1, keepdims=True)
    xc = x - mu
    var = jnp.mean(xc * xc, axis=-1, keepdims=True)        # biased var (torch LayerNorm)
    y = xc * jax.lax.rsqrt(var + 1e-5) * g_ref[...] + b_ref[...]
    ln_ref[...] = y
    logit_ref[...] = jnp.dot(y.astype(jnp.bfloat16), w_ref[...],
                             preferred_element_type=jnp.float32) + cb_ref[...]


def pallas_ln_classify(x, gamma, beta, w, b):
    N, F = x.shape
    C = w.shape[1]
    Cp = _round_up(max(C, 128), 128)                        # lane-dense logits slab
    w_pad = _pad2(w, F, Cp).astype(jnp.bfloat16)
    b_pad = _pad2(b, 1, Cp)
    tm, Np = _tile(N, ROW_TILE_CAP, 16)
    x_p = _pad2(x, Np, F)
    ln, logit = pl.pallas_call(
        _ln_cls_kernel,
        out_shape=(jax.ShapeDtypeStruct((Np, F), jnp.float32),
                   jax.ShapeDtypeStruct((Np, Cp), jnp.float32)),
        grid_spec=pltpu.PrefetchScalarGridSpec(
            num_scalar_prefetch=0, grid=(Np // tm,),
            in_specs=[pl.BlockSpec((tm, F), lambda i: (i, 0)),
                      pl.BlockSpec((1, F), lambda i: (0, 0)),
                      pl.BlockSpec((1, F), lambda i: (0, 0)),
                      pl.BlockSpec((F, Cp), lambda i: (0, 0)),
                      pl.BlockSpec((1, Cp), lambda i: (0, 0))],
            out_specs=(pl.BlockSpec((tm, F), lambda i: (i, 0)),
                       pl.BlockSpec((tm, Cp), lambda i: (i, 0)))),
        compiler_params=pltpu.CompilerParams(
            dimension_semantics=("parallel",),
            vmem_limit_bytes=VMEM_LIMIT),
    )(x_p, gamma, beta, w_pad, b_pad)
    return ln[:N], logit[:N, :C]


# ----------------------------------------------------------------------------
# model glue (parameter init + forward orchestration)
# ----------------------------------------------------------------------------

def xavier_uniform(key, shape, gain=1.414):
    fan_in, fan_out = shape[0], shape[1]
    limit = gain * (6.0 / (fan_in + fan_out)) ** 0.5
    return jax.random.uniform(key, shape, jnp.float32, -limit, limit)


def init_hete_gcn_layer(key, net_schema, in_shape, out_shape, att_size):
    params = {}
    for curr_k, nb_list in net_schema.items():
        key, *ks = jax.random.split(key, 8 + len(nb_list))
        p = {
            'w_self': xavier_uniform(ks[0], (in_shape[curr_k], out_shape[curr_k])),
            'bias': xavier_uniform(ks[1], (1, out_shape[curr_k])),
            'w_query': xavier_uniform(ks[2], (out_shape[curr_k], att_size)),
            'w_keys': xavier_uniform(ks[3], (out_shape[curr_k], att_size)),
            'w_att': xavier_uniform(ks[4], (2 * att_size, 1)),
            'w_rel': {},
        }
        for i, nb in enumerate(nb_list):
            p['w_rel'][nb] = xavier_uniform(ks[5 + i],
                                            (in_shape[nb], out_shape[curr_k]))
        params[curr_k] = p
    return key, params


def prepare_layer_params(layer_params, net_schema, dims_pad):
    """Per-layer, one-time prep: bf16 weight cast + row padding, and folding of
    w_att into the Q/K projections (associativity; not bit-identical to the
    f32 reference reduction order)."""
    prep = {}
    for k, nb_list in net_schema.items():
        p = layer_params[k]
        F = p['w_self'].shape[1]
        assert F % 128 == 0, "output feature dim must be a multiple of 128"
        A = p['w_query'].shape[1]
        q_vec = jnp.dot(p['w_query'], p['w_att'][A:]).reshape(1, F)
        k_vec = jnp.dot(p['w_keys'], p['w_att'][:A]).reshape(1, F)
        prep[k] = {
            'w_self': _pad2(p['w_self'], dims_pad[k], F).astype(jnp.bfloat16),
            'w_rel': {nb: _pad2(p['w_rel'][nb], dims_pad[nb], F).astype(jnp.bfloat16)
                      for nb in nb_list},
            'q_vec': q_vec.astype(jnp.float32),
            'k_vec': k_vec.astype(jnp.float32),
            'bias': p['bias'].astype(jnp.float32),
        }
    return prep


def hete_gcn_layer(x_pad, adj_pad, net_schema, prep, apply_elu, out_dtype,
                   allow_fused=True):
    out_d, att_d = {}, {}
    for k, nb_list in net_schema.items():
        p = prep[k]
        adj_list = [adj_pad[k][nb] for nb in nb_list]
        xnb_list = [x_pad[nb] for nb in nb_list]
        wrel_list = [p['w_rel'][nb] for nb in nb_list]
        if allow_fused and _fused_fits(x_pad[k], p['w_self'], adj_list,
                                       xnb_list, out_dtype):
            out, att = pallas_hete_agg_fused(
                x_pad[k], p['w_self'], adj_list, xnb_list, wrel_list,
                p['q_vec'], p['k_vec'], p['bias'], apply_elu, out_dtype)
        else:
            # Large-graph fallback: two-pass X@W (no per-M-tile recompute),
            # then A@XW, then the fused attention epilogue; bf16 intermediates.
            self_ft = pallas_matmul(x_pad[k], p['w_self'], out_dtype=jnp.bfloat16)
            nb_fts = []
            for adj, xnb, wrel in zip(adj_list, xnb_list, wrel_list):
                xw = pallas_matmul(xnb, wrel, out_dtype=jnp.bfloat16)
                nb_fts.append(pallas_matmul(adj, xw, out_dtype=jnp.bfloat16))
            out, att = pallas_att_fuse(self_ft, nb_fts, p['q_vec'], p['k_vec'],
                                       p['bias'], apply_elu, out_dtype)
        out_d[k] = out
        att_d[k] = att
    return out_d, att_d


def att_hgcn_forward(params, ft_dict, adj_dict, net_schema, label_keys,
                     allow_fused=True):
    n_nodes = {t: ft_dict[t].shape[0] for t in ft_dict}
    rp = {t: _row_pad(n_nodes[t]) for t in ft_dict}

    # one-time preprocessing (hoisted out of all layers / kernels):
    # bf16 cast + padding of features and adjacency; adjacency reused by both layers.
    x_pad = {t: _pad2(ft_dict[t].astype(jnp.bfloat16), rp[t],
                      _round_up(ft_dict[t].shape[1], 128)) for t in ft_dict}
    adj_pad = {k: {nb: _pad2(adj_dict[k][nb].astype(jnp.bfloat16), rp[k], rp[nb])
                   for nb in net_schema[k]} for k in net_schema}

    attention_list = []

    dims1 = {t: x_pad[t].shape[1] for t in x_pad}
    prep1 = prepare_layer_params(params['hgc1'], net_schema, dims1)
    # layer 1: inter-layer ELU fused into the epilogue, bf16 output feeds layer-2 MXU
    x_pad, att1 = hete_gcn_layer(x_pad, adj_pad, net_schema, prep1,
                                 apply_elu=True, out_dtype=jnp.bfloat16,
                                 allow_fused=allow_fused)
    attention_list.append(att1)

    dims2 = {t: x_pad[t].shape[1] for t in x_pad}
    prep2 = prepare_layer_params(params['hgc2'], net_schema, dims2)
    x_pad, att2 = hete_gcn_layer(x_pad, adj_pad, net_schema, prep2,
                                 apply_elu=False, out_dtype=jnp.float32,
                                 allow_fused=allow_fused)
    attention_list.append(att2)

    # slice padded rows / lanes off the attention slabs
    attention_list = [{k: att[k][:n_nodes[k], :len(net_schema[k]) + 1]
                       for k in att} for att in attention_list]

    logits, embd = {}, {}
    for k in label_keys:
        ln_x, lg = pallas_ln_classify(x_pad[k], params['ln_gamma'],
                                      params['ln_beta'],
                                      params['embd2class'][k],
                                      params['cls_bias'][k])
        embd[k] = ln_x[:n_nodes[k]]
        logits[k] = lg[:n_nodes[k]]
    return logits, embd, attention_list


# ----------------------------------------------------------------------------
# pure-jnp f32 reference (for the correctness smoke-check)
# ----------------------------------------------------------------------------

def reference_forward(params, ft_dict, adj_dict, net_schema, label_keys):
    def layer(x_dict, lp):
        out_d, att_d = {}, {}
        for k, nb_list in net_schema.items():
            p = lp[k]
            self_ft = x_dict[k] @ p['w_self']
            feats = [self_ft] + [adj_dict[k][nb] @ (x_dict[nb] @ p['w_rel'][nb])
                                 for nb in nb_list]
            att_query = self_ft @ p['w_query']
            e = [jax.nn.elu(jnp.concatenate([f @ p['w_keys'], att_query], axis=1)
                            @ p['w_att']) for f in feats]
            att = jax.nn.softmax(jnp.concatenate(e, axis=1), axis=1)
            agg = sum(att[:, t:t + 1] * feats[t] for t in range(len(feats)))
            out_d[k] = agg + p['bias']
            att_d[k] = att
        return out_d, att_d

    x1, a1 = layer(ft_dict, params['hgc1'])
    x1 = {k: jax.nn.elu(v) for k, v in x1.items()}
    x2, a2 = layer(x1, params['hgc2'])
    logits, embd = {}, {}
    for k in label_keys:
        x = x2[k]
        mu = jnp.mean(x, axis=-1, keepdims=True)
        var = jnp.mean((x - mu) ** 2, axis=-1, keepdims=True)
        y = (x - mu) * jax.lax.rsqrt(var + 1e-5) * params['ln_gamma'] + params['ln_beta']
        embd[k] = y
        logits[k] = y @ params['embd2class'][k] + params['cls_bias'][k]
    return logits, embd, [a1, a2]


# ----------------------------------------------------------------------------
# example run
# ----------------------------------------------------------------------------

if __name__ == "__main__":
    # Heterogeneous graph: papers 'p', authors 'a', subjects 's'
    net_schema = {'p': ['a', 's'], 'a': ['p'], 's': ['p']}
    label_keys = ['p']
    layer_shape = [
        {'p': 256, 'a': 128, 's': 128},   # input feature dims
        {'p': 128, 'a': 128, 's': 128},   # hidden dims
        {'p': 128, 'a': 128, 's': 128},   # output embedding dims (ln1 = LayerNorm(128))
        {'p': 4},                         # num classes for label keys
    ]
    n_nodes = {'p': 32, 'a': 24, 's': 16}
    type_att_size = 64

    key = jax.random.PRNGKey(0)
    key, hgc1_params = init_hete_gcn_layer(key, net_schema, layer_shape[0],
                                           layer_shape[1], type_att_size)
    key, hgc2_params = init_hete_gcn_layer(key, net_schema, layer_shape[1],
                                           layer_shape[2], type_att_size)
    params = {
        'hgc1': hgc1_params,
        'hgc2': hgc2_params,
        'ln_gamma': jnp.ones((1, 128), jnp.float32),
        'ln_beta': jnp.zeros((1, 128), jnp.float32),
        'embd2class': {},
        'cls_bias': {},
    }
    for k in label_keys:
        key, k1, k2 = jax.random.split(key, 3)
        params['embd2class'][k] = xavier_uniform(
            k1, (layer_shape[-2][k], layer_shape[-1][k]))
        params['cls_bias'][k] = xavier_uniform(k2, (1, layer_shape[-1][k]))

    # Inputs: node features + (dense, row-normalized) adjacency matrices
    ft_dict = {}
    for t in net_schema:
        key, sub = jax.random.split(key)
        ft_dict[t] = jax.random.normal(sub, (n_nodes[t], layer_shape[0][t]),
                                       jnp.float32)
    adj_dict = {}
    for curr_k, nb_list in net_schema.items():
        adj_dict[curr_k] = {}
        for nb in nb_list:
            key, sub = jax.random.split(key)
            a = jax.random.uniform(sub, (n_nodes[curr_k], n_nodes[nb]),
                                   jnp.float32)
            adj_dict[curr_k][nb] = a / jnp.sum(a, axis=1, keepdims=True)

    ref_logits, ref_embd, ref_atts = reference_forward(
        params, ft_dict, adj_dict, net_schema, label_keys)

    # Run both the fused path (used at these sizes) and the large-graph fallback.
    for allow_fused in (True, False):
        logits, embd, atts = att_hgcn_forward(params, ft_dict, adj_dict,
                                              net_schema, label_keys,
                                              allow_fused=allow_fused)
        jax.block_until_ready((logits, embd, atts))

        assert logits['p'].shape == (n_nodes['p'], layer_shape[-1]['p'])
        assert embd['p'].shape == (n_nodes['p'], 128)
        assert atts[0]['p'].shape == (n_nodes['p'], 3)
        assert atts[0]['a'].shape == (n_nodes['a'], 2)

        # numerical smoke-check vs the pure-jnp f32 reference (loose tolerance:
        # kernels use bf16 MXU operands by design)
        assert float(jnp.max(jnp.abs(logits['p'] - ref_logits['p']))) < 0.5
        assert float(jnp.max(jnp.abs(embd['p'] - ref_embd['p']))) < 0.3
        for li in range(2):
            for k in net_schema:
                a_k = atts[li][k]
                assert float(jnp.max(jnp.abs(jnp.sum(a_k, axis=1) - 1.0))) < 5e-3
                assert float(jnp.max(jnp.abs(a_k - ref_atts[li][k]))) < 0.15

    print("KERNEL_OK")
</pallas_src>

<mosaic_0001>
module attributes {stable_mosaic.version = 11 : i64} {
  func.func @kernel(%arg0: i32, %arg1: memref<128x256xbf16, #tpu.memory_space<vmem>>, %arg2: memref<256x128xbf16, #tpu.memory_space<vmem>>, %arg3: memref<128x128xbf16, #tpu.memory_space<vmem>>, %arg4: memref<128x128xbf16, #tpu.memory_space<vmem>>, %arg5: memref<128x128xbf16, #tpu.memory_space<vmem>>, %arg6: memref<128x128xbf16, #tpu.memory_space<vmem>>, %arg7: memref<128x128xbf16, #tpu.memory_space<vmem>>, %arg8: memref<128x128xbf16, #tpu.memory_space<vmem>>, %arg9: memref<1x128xf32, #tpu.memory_space<vmem>>, %arg10: memref<1x128xf32, #tpu.memory_space<vmem>>, %arg11: memref<1x128xf32, #tpu.memory_space<vmem>>, %arg12: memref<128x128xbf16, #tpu.memory_space<vmem>>, %arg13: memref<128x128xf32, #tpu.memory_space<vmem>>, %arg14: memref<128x128xbf16, #tpu.memory_space<vmem>>, %arg15: memref<128x128xbf16, #tpu.memory_space<vmem>>) attributes {dimension_semantics = [#tpu.dimension_semantics<arbitrary>], iteration_bounds = array<i64: 1>, scalar_prefetch = 0 : i64, scratch_operands = 2 : i64, tpu.core_type = #tpu.core_type<tc>, window_params = [{transform_indices = @transform_0, window_bounds = array<i64: 128, 256>}, {pipeline_mode = #tpu.pipeline_mode<synchronous>, transform_indices = @transform_1, window_bounds = array<i64: 256, 128>}, {transform_indices = @transform_2, window_bounds = array<i64: 128, 128>}, {pipeline_mode = #tpu.pipeline_mode<synchronous>, transform_indices = @transform_3, window_bounds = array<i64: 128, 128>}, {pipeline_mode = #tpu.pipeline_mode<synchronous>, transform_indices = @transform_4, window_bounds = array<i64: 128, 128>}, {transform_indices = @transform_5, window_bounds = array<i64: 128, 128>}, {pipeline_mode = #tpu.pipeline_mode<synchronous>, transform_indices = @transform_6, window_bounds = array<i64: 128, 128>}, {pipeline_mode = #tpu.pipeline_mode<synchronous>, transform_indices = @transform_7, window_bounds = array<i64: 128, 128>}, {pipeline_mode = #tpu.pipeline_mode<synchronous>, transform_indices = @transform_8, window_bounds = array<i64: 1, 128>}, {pipeline_mode = #tpu.pipeline_mode<synchronous>, transform_indices = @transform_9, window_bounds = array<i64: 1, 128>}, {pipeline_mode = #tpu.pipeline_mode<synchronous>, transform_indices = @transform_10, window_bounds = array<i64: 1, 128>}, {transform_indices = @transform_11, window_bounds = array<i64: 128, 128>}, {transform_indices = @transform_12, window_bounds = array<i64: 128, 128>}]} {
    %c0_i32 = arith.constant 0 : i32
    %0 = arith.cmpi eq, %arg0, %c0_i32 : i32
    %1 = arith.extui %0 : i1 to i32
    %c0_i32_0 = arith.constant 0 : i32
    %2 = arith.cmpi ne, %1, %c0_i32_0 : i32
    scf.if %2 {
      %c0_43 = arith.constant 0 : index
      %c0_44 = arith.constant 0 : index
      %111 = vector.load %arg4[%c0_43, %c0_44] : memref<128x128xbf16, #tpu.memory_space<vmem>>, vector<128x128xbf16>
      %c0_45 = arith.constant 0 : index
      %c0_46 = arith.constant 0 : index
      %112 = vector.load %arg5[%c0_45, %c0_46] : memref<128x128xbf16, #tpu.memory_space<vmem>>, vector<128x128xbf16>
      %cst_47 = arith.constant dense<0.000000e+00> : vector<128x128xf32>
      %113 = tpu.matmul %111, %112, %cst_47 {dimension_numbers = #tpu.dot_dimension_numbers<[1], [0], [0], [1], [0, 0, 1, 1], [], []>} : vector<128x128xbf16>, vector<128x128xbf16>, vector<128x128xf32> -> vector<128x128xf32>
      %114 = arith.truncf %113 : vector<128x128xf32> to vector<128x128xbf16>
      %c0_48 = arith.constant 0 : index
      %c0_49 = arith.constant 0 : index
      %115 = vector.load %arg14[%c0_48, %c0_49] : memref<128x128xbf16, #tpu.memory_space<vmem>>, vector<128x128xbf16>
      tpu.vector_store %arg14[%c0_48, %c0_49], %114 {strides = array<i32>} : memref<128x128xbf16, #tpu.memory_space<vmem>>, vector<128x128xbf16>,
      %c0_50 = arith.constant 0 : index
      %c0_51 = arith.constant 0 : index
      %116 = vector.load %arg7[%c0_50, %c0_51] : memref<128x128xbf16, #tpu.memory_space<vmem>>, vector<128x128xbf16>
      %c0_52 = arith.constant 0 : index
      %c0_53 = arith.constant 0 : index
      %117 = vector.load %arg8[%c0_52, %c0_53] : memref<128x128xbf16, #tpu.memory_space<vmem>>, vector<128x128xbf16>
      %cst_54 = arith.constant dense<0.000000e+00> : vector<128x128xf32>
      %118 = tpu.matmul %116, %117, %cst_54 {dimension_numbers = #tpu.dot_dimension_numbers<[1], [0], [0], [1], [0, 0, 1, 1], [], []>} : vector<128x128xbf16>, vector<128x128xbf16>, vector<128x128xf32> -> vector<128x128xf32>
      %119 = arith.truncf %118 : vector<128x128xf32> to vector<128x128xbf16>
      %c0_55 = arith.constant 0 : index
      %c0_56 = arith.constant 0 : index
      %120 = vector.load %arg15[%c0_55, %c0_56] : memref<128x128xbf16, #tpu.memory_space<vmem>>, vector<128x128xbf16>
      tpu.vector_store %arg15[%c0_55, %c0_56], %119 {strides = array<i32>} : memref<128x128xbf16, #tpu.memory_space<vmem>>, vector<128x128xbf16>,
    } else {
    }
    %c0 = arith.constant 0 : index
    %c0_1 = arith.constant 0 : index
    %3 = vector.load %arg1[%c0, %c0_1] : memref<128x256xbf16, #tpu.memory_space<vmem>>, vector<128x256xbf16>
    %c0_2 = arith.constant 0 : index
    %c0_3 = arith.constant 0 : index
    %4 = vector.load %arg2[%c0_2, %c0_3] : memref<256x128xbf16, #tpu.memory_space<vmem>>, vector<256x128xbf16>
    %cst = arith.constant dense<0.000000e+00> : vector<128x128xf32>
    %5 = tpu.matmul %3, %4, %cst {dimension_numbers = #tpu.dot_dimension_numbers<[1], [0], [0], [1], [0, 0, 1, 1], [], []>} : vector<128x256xbf16>, vector<256x128xbf16>, vector<128x128xf32> -> vector<128x128xf32>
    %c0_4 = arith.constant 0 : index
    %c0_5 = arith.constant 0 : index
    %6 = vector.load %arg3[%c0_4, %c0_5] : memref<128x128xbf16, #tpu.memory_space<vmem>>, vector<128x128xbf16>
    %c0_6 = arith.constant 0 : index
    %c0_7 = arith.constant 0 : index
    %7 = vector.load %arg14[%c0_6, %c0_7] : memref<128x128xbf16, #tpu.memory_space<vmem>>, vector<128x128xbf16>
    %cst_8 = arith.constant dense<0.000000e+00> : vector<128x128xf32>
    %8 = tpu.matmul %6, %7, %cst_8 {dimension_numbers = #tpu.dot_dimension_numbers<[1], [0], [0], [1], [0, 0, 1, 1], [], []>} : vector<128x128xbf16>, vector<128x128xbf16>, vector<128x128xf32> -> vector<128x128xf32>
    %c0_9 = arith.constant 0 : index
    %c0_10 = arith.constant 0 : index
    %9 = vector.load %arg6[%c0_9, %c0_10] : memref<128x128xbf16, #tpu.memory_space<vmem>>, vector<128x128xbf16>
    %c0_11 = arith.constant 0 : index
    %c0_12 = arith.constant 0 : index
    %10 = vector.load %arg15[%c0_11, %c0_12] : memref<128x128xbf16, #tpu.memory_space<vmem>>, vector<128x128xbf16>
    %cst_13 = arith.constant dense<0.000000e+00> : vector<128x128xf32>
    %11 = tpu.matmul %9, %10, %cst_13 {dimension_numbers = #tpu.dot_dimension_numbers<[1], [0], [0], [1], [0, 0, 1, 1], [], []>} : vector<128x128xbf16>, vector<128x128xbf16>, vector<128x128xf32> -> vector<128x128xf32>
    %c0_14 = arith.constant 0 : index
    %c0_15 = arith.constant 0 : index
    %12 = vector.load %arg9[%c0_14, %c0_15] : memref<1x128xf32, #tpu.memory_space<vmem>>, vector<1x128xf32>
    %13 = vector.shape_cast %12 : vector<1x128xf32> to vector<1x128xf32>
    %14 = vector.broadcast %13 : vector<1x128xf32> to vector<128x128xf32>
    %c0_16 = arith.constant 0 : index
    %c0_17 = arith.constant 0 : index
    %15 = vector.load %arg10[%c0_16, %c0_17] : memref<1x128xf32, #tpu.memory_space<vmem>>, vector<1x128xf32>
    %16 = vector.shape_cast %15 : vector<1x128xf32> to vector<1x128xf32>
    %17 = vector.broadcast %16 : vector<1x128xf32> to vector<128x128xf32>
    %18 = arith.mulf %5, %17 : vector<128x128xf32>
    %cst_18 = arith.constant dense<0.000000e+00> : vector<128xf32>
    %19 = vector.multi_reduction <add>, %18, %cst_18 [1] : vector<128x128xf32> to vector<128xf32>
    %20 = vector.shape_cast %19 : vector<128xf32> to vector<128x1xf32>
    %21 = arith.mulf %5, %14 : vector<128x128xf32>
    %cst_19 = arith.constant dense<0.000000e+00> : vector<128xf32>
    %22 = vector.multi_reduction <add>, %21, %cst_19 [1] : vector<128x128xf32> to vector<128xf32>
    %23 = vector.shape_cast %22 : vector<128xf32> to vector<128x1xf32>
    %24 = arith.addf %23, %20 : vector<128x1xf32>
    %cst_20 = arith.constant 0.000000e+00 : f32
    %25 = vector.broadcast %cst_20 : f32 to vector<128x1xf32>
    %26 = arith.cmpf ogt, %24, %25 : vector<128x1xf32>
    %cst_21 = arith.constant 0.000000e+00 : f32
    %27 = vector.broadcast %cst_21 : f32 to vector<128x1xf32>
    %28 = arith.minimumf %24, %27 : vector<128x1xf32>
    %29 = math.exp %28 : vector<128x1xf32>
    %cst_22 = arith.constant 1.000000e+00 : f32
    %30 = vector.broadcast %cst_22 : f32 to vector<128x1xf32>
    %31 = arith.subf %29, %30 : vector<128x1xf32>
    %32 = arith.select %26, %24, %31 : vector<128x1xi1>, vector<128x1xf32>
    %33 = arith.mulf %8, %14 : vector<128x128xf32>
    %cst_23 = arith.constant dense<0.000000e+00> : vector<128xf32>
    %34 = vector.multi_reduction <add>, %33, %cst_23 [1] : vector<128x128xf32> to vector<128xf32>
    %35 = vector.shape_cast %34 : vector<128xf32> to vector<128x1xf32>
    %36 = arith.addf %35, %20 : vector<128x1xf32>
    %cst_24 = arith.constant 0.000000e+00 : f32
    %37 = vector.broadcast %cst_24 : f32 to vector<128x1xf32>
    %38 = arith.cmpf ogt, %36, %37 : vector<128x1xf32>
    %cst_25 = arith.constant 0.000000e+00 : f32
    %39 = vector.broadcast %cst_25 : f32 to vector<128x1xf32>
    %40 = arith.minimumf %36, %39 : vector<128x1xf32>
    %41 = math.exp %40 : vector<128x1xf32>
    %cst_26 = arith.constant 1.000000e+00 : f32
    %42 = vector.broadcast %cst_26 : f32 to vector<128x1xf32>
    %43 = arith.subf %41, %42 : vector<128x1xf32>
    %44 = arith.select %38, %36, %43 : vector<128x1xi1>, vector<128x1xf32>
    %45 = arith.mulf %11, %14 : vector<128x128xf32>
    %cst_27 = arith.constant dense<0.000000e+00> : vector<128xf32>
    %46 = vector.multi_reduction <add>, %45, %cst_27 [1] : vector<128x128xf32> to vector<128xf32>
    %47 = vector.shape_cast %46 : vector<128xf32> to vector<128x1xf32>
    %48 = arith.addf %47, %20 : vector<128x1xf32>
    %cst_28 = arith.constant 0.000000e+00 : f32
    %49 = vector.broadcast %cst_28 : f32 to vector<128x1xf32>
    %50 = arith.cmpf ogt, %48, %49 : vector<128x1xf32>
    %cst_29 = arith.constant 0.000000e+00 : f32
    %51 = vector.broadcast %cst_29 : f32 to vector<128x1xf32>
    %52 = arith.minimumf %48, %51 : vector<128x1xf32>
    %53 = math.exp %52 : vector<128x1xf32>
    %cst_30 = arith.constant 1.000000e+00 : f32
    %54 = vector.broadcast %cst_30 : f32 to vector<128x1xf32>
    %55 = arith.subf %53, %54 : vector<128x1xf32>
    %56 = arith.select %50, %48, %55 : vector<128x1xi1>, vector<128x1xf32>
    %57 = arith.maximumf %32, %44 : vector<128x1xf32>
    %58 = arith.maximumf %57, %56 : vector<128x1xf32>
    %59 = arith.subf %32, %58 : vector<128x1xf32>
    %60 = math.exp %59 : vector<128x1xf32>
    %61 = arith.subf %44, %58 : vector<128x1xf32>
    %62 = math.exp %61 : vector<128x1xf32>
    %63 = arith.subf %56, %58 : vector<128x1xf32>
    %64 = math.exp %63 : vector<128x1xf32>
    %65 = arith.addf %60, %62 : vector<128x1xf32>
    %66 = arith.addf %65, %64 : vector<128x1xf32>
    %cst_31 = arith.constant 1.000000e+00 : f32
    %67 = vector.broadcast %cst_31 : f32 to vector<128x1xf32>
    %68 = arith.divf %67, %66 : vector<128x1xf32>
    %69 = arith.mulf %60, %68 : vector<128x1xf32>
    %70 = arith.mulf %62, %68 : vector<128x1xf32>
    %71 = arith.mulf %64, %68 : vector<128x1xf32>
    %72 = vector.broadcast %69 : vector<128x1xf32> to vector<128x128xf32>
    %73 = arith.mulf %72, %5 : vector<128x128xf32>
    %74 = vector.broadcast %70 : vector<128x1xf32> to vector<128x128xf32>
    %75 = arith.mulf %74, %8 : vector<128x128xf32>
    %76 = arith.addf %73, %75 : vector<128x128xf32>
    %77 = vector.broadcast %71 : vector<128x1xf32> to vector<128x128xf32>
    %78 = arith.mulf %77, %11 : vector<128x128xf32>
    %79 = arith.addf %76, %78 : vector<128x128xf32>
    %c0_32 = arith.constant 0 : index
    %c0_33 = arith.constant 0 : index
    %80 = vector.load %arg11[%c0_32, %c0_33] : memref<1x128xf32, #tpu.memory_space<vmem>>, vector<1x128xf32>
    %81 = vector.broadcast %80 : vector<1x128xf32> to vector<128x128xf32>
    %82 = arith.addf %79, %81 : vector<128x128xf32>
    %cst_34 = arith.constant 0.000000e+00 : f32
    %83 = vector.broadcast %cst_34 : f32 to vector<128x128xf32>
    %84 = arith.cmpf ogt, %82, %83 : vector<128x128xf32>
    %cst_35 = arith.constant 0.000000e+00 : f32
    %85 = vector.broadcast %cst_35 : f32 to vector<128x128xf32>
    %86 = arith.minimumf %82, %85 : vector<128x128xf32>
    %87 = math.exp %86 : vector<128x128xf32>
    %cst_36 = arith.constant 1.000000e+00 : f32
    %88 = vector.broadcast %cst_36 : f32 to vector<128x128xf32>
    %89 = arith.subf %87, %88 : vector<128x128xf32>
    %90 = arith.select %84, %82, %89 : vector<128x128xi1>, vector<128x128xf32>
    %91 = arith.truncf %90 : vector<128x128xf32> to vector<128x128xbf16>
    %c0_37 = arith.constant 0 : index
    %c0_38 = arith.constant 0 : index
    %92 = vector.load %arg12[%c0_37, %c0_38] : memref<128x128xbf16, #tpu.memory_space<vmem>>, vector<128x128xbf16>
    tpu.vector_store %arg12[%c0_37, %c0_38], %91 {strides = array<i32>} : memref<128x128xbf16, #tpu.memory_space<vmem>>, vector<128x128xbf16>,
    %93 = tpu.iota {dimensions = array<i32: 1>} : vector<128x128xi32>
    %cst_39 = arith.constant 0.000000e+00 : f32
    %94 = vector.broadcast %cst_39 : f32 to vector<128x128xf32>
    %c0_i32_40 = arith.constant 0 : i32
    %95 = vector.broadcast %c0_i32_40 : i32 to vector<128x128xi32>
    %96 = arith.cmpi eq, %93, %95 : vector<128x128xi32>
    %97 = vector.shape_cast %69 : vector<128x1xf32> to vector<128x1xf32>
    %98 = vector.broadcast %97 : vector<128x1xf32> to vector<128x128xf32>
    %99 = arith.select %96, %98, %94 : vector<128x128xi1>, vector<128x128xf32>
    %c1_i32 = arith.constant 1 : i32
    %100 = vector.broadcast %c1_i32 : i32 to vector<128x128xi32>
    %101 = arith.cmpi eq, %93, %100 : vector<128x128xi32>
    %102 = vector.shape_cast %70 : vector<128x1xf32> to vector<128x1xf32>
    %103 = vector.broadcast %102 : vector<128x1xf32> to vector<128x128xf32>
    %104 = arith.select %101, %103, %99 : vector<128x128xi1>, vector<128x128xf32>
    %c2_i32 = arith.constant 2 : i32
    %105 = vector.broadcast %c2_i32 : i32 to vector<128x128xi32>
    %106 = arith.cmpi eq, %93, %105 : vector<128x128xi32>
    %107 = vector.shape_cast %71 : vector<128x1xf32> to vector<128x1xf32>
    %108 = vector.broadcast %107 : vector<128x1xf32> to vector<128x128xf32>
    %109 = arith.select %106, %108, %104 : vector<128x128xi1>, vector<128x128xf32>
    %c0_41 = arith.constant 0 : index
    %c0_42 = arith.constant 0 : index
    %110 = vector.load %arg13[%c0_41, %c0_42] : memref<128x128xf32, #tpu.memory_space<vmem>>, vector<128x128xf32>
    tpu.vector_store %arg13[%c0_41, %c0_42], %109 {strides = array<i32>} : memref<128x128xf32, #tpu.memory_space<vmem>>, vector<128x128xf32>,
    return
  }
  func.func @transform_0(%arg0: i32) -> (i32, i32) {
    %c0_i32 = arith.constant 0 : i32
    %c0_i32_0 = arith.constant 0 : i32
    return %arg0, %c0_i32 : i32, i32
  }
  func.func @transform_1(%arg0: i32) -> (i32, i32) {
    %c0_i32 = arith.constant 0 : i32
    %c0_i32_0 = arith.constant 0 : i32
    %c0_i32_1 = arith.constant 0 : i32
    return %c0_i32, %c0_i32_0 : i32, i32
  }
  func.func @transform_2(%arg0: i32) -> (i32, i32) {
    %c0_i32 = arith.constant 0 : i32
    %c0_i32_0 = arith.constant 0 : i32
    return %arg0, %c0_i32 : i32, i32
  }
  func.func @transform_3(%arg0: i32) -> (i32, i32) {
    %c0_i32 = arith.constant 0 : i32
    %c0_i32_0 = arith.constant 0 : i32
    %c0_i32_1 = arith.constant 0 : i32
    return %c0_i32, %c0_i32_0 : i32, i32
  }
  func.func @transform_4(%arg0: i32) -> (i32, i32) {
    %c0_i32 = arith.constant 0 : i32
    %c0_i32_0 = arith.constant 0 : i32
    %c0_i32_1 = arith.constant 0 : i32
    return %c0_i32, %c0_i32_0 : i32, i32
  }
  func.func @transform_5(%arg0: i32) -> (i32, i32) {
    %c0_i32 = arith.constant 0 : i32
    %c0_i32_0 = arith.constant 0 : i32
    return %arg0, %c0_i32 : i32, i32
  }
  func.func @transform_6(%arg0: i32) -> (i32, i32) {
    %c0_i32 = arith.constant 0 : i32
    %c0_i32_0 = arith.constant 0 : i32
    %c0_i32_1 = arith.constant 0 : i32
    return %c0_i32, %c0_i32_0 : i32, i32
  }
  func.func @transform_7(%arg0: i32) -> (i32, i32) {
    %c0_i32 = arith.constant 0 : i32
    %c0_i32_0 = arith.constant 0 : i32
    %c0_i32_1 = arith.constant 0 : i32
    return %c0_i32, %c0_i32_0 : i32, i32
  }
  func.func @transform_8(%arg0: i32) -> (i32, i32) {
    %c0_i32 = arith.constant 0 : i32
    %c0_i32_0 = arith.constant 0 : i32
    %c0_i32_1 = arith.constant 0 : i32
    return %c0_i32, %c0_i32_0 : i32, i32
  }
  func.func @transform_9(%arg0: i32) -> (i32, i32) {
    %c0_i32 = arith.constant 0 : i32
    %c0_i32_0 = arith.constant 0 : i32
    %c0_i32_1 = arith.constant 0 : i32
    return %c0_i32, %c0_i32_0 : i32, i32
  }
  func.func @transform_10(%arg0: i32) -> (i32, i32) {
    %c0_i32 = arith.constant 0 : i32
    %c0_i32_0 = arith.constant 0 : i32
    %c0_i32_1 = arith.constant 0 : i32
    return %c0_i32, %c0_i32_0 : i32, i32
  }
  func.func @transform_11(%arg0: i32) -> (i32, i32) {
    %c0_i32 = arith.constant 0 : i32
    %c0_i32_0 = arith.constant 0 : i32
    return %arg0, %c0_i32 : i32, i32
  }
  func.func @transform_12(%arg0: i32) -> (i32, i32) {
    %c0_i32 = arith.constant 0 : i32
    %c0_i32_0 = arith.constant 0 : i32
    return %arg0, %c0_i32 : i32, i32
  }
}

</mosaic_0001>

<bundles_post_ra>
// kernel: tpu_custom_call.1
= control target key start
LH: loop header
LB: loop body
LE: loop exit
PB: predicated region body
PF: predicated region fallthrough
CT: control target
= control target key end

     0   :  { %18 = vsyncpa [#allocation5], 0  ;;  %s5401_s0 = inlined_call_operand.hbm [shape: bf16[128,256], index: 0, kind: input, shape index: {}]   ;;  %s5402_s1 = inlined_call_operand.hbm [shape: bf16[256,128], index: 1, kind: input, shape index: {}]   ;;  %s5403_s2 = inlined_call_operand.hbm [shape: bf16[128,128], index: 2, kind: input, shape index: {}]   ;;  %s5404_s3 = inlined_call_operand.hbm [shape: bf16[128,128], index: 3, kind: input, shape index: {}]   ;;  %s5405_s4 = inlined_call_operand.hbm [shape: bf16[128,128], index: 4, kind: input, shape index: {}]   ;;  %s5406_s5 = inlined_call_operand.hbm [shape: bf16[128,128], index: 5, kind: input, shape index: {}]   ;;  %s5407_s6 = inlined_call_operand.hbm [shape: bf16[128,128], index: 6, kind: input, shape index: {}]   ;;  %s5408_s7 = inlined_call_operand.hbm [shape: bf16[128,128], index: 7, kind: input, shape index: {}]   ;;  %s5409_s8 = inlined_call_operand.vmem [shape: f32[1,128], index: 8, kind: input, shape index: {}]   ;;  %s5410_s9 = inlined_call_operand.vmem [shape: f32[1,128], index: 9, kind: input, shape index: {}]   ;;  %s5411_s10 = inlined_call_operand.vmem [shape: f32[1,128], index: 10, kind: input, shape index: {}]   ;;  %s5412_s11 = inlined_call_operand.hbm [shape: bf16[128,128], index: 11, kind: output, shape index: {0}]   ;;  %s5413_s12 = inlined_call_operand.hbm [shape: f32[128,128], index: 12, kind: output, shape index: {1}]  }
   0x1   :  { %19 = vsyncpa [#allocation8], 0 }
   0x2   :  { %20 = vsyncpa [#allocation11], 0 }
   0x3   :  { %21 = vsyncpa [#allocation14], 0 }
   0x4   :  { %22 = vsyncpa [#allocation17], 0 }
   0x5   :  { %23 = vsyncpa [#allocation6], 0 }
   0x6   :  { %24 = vsyncpa [#allocation20], 0  ;;  %s3996_s21 = smov [#allocation7]  }
   0x7   :  { %s42_s22 = sshll.u32 %s3996_s21, 4  ;;  %s43_s22 = int_to_ptr.vmem [resolvable:$true] %s42_s22 }
   0x8   :  { %s3790_s23 = scalar_lea.vmem %s43_s22, 2048  ;;  %p3795_p1 = scmp.lt.s32.totalorder %s43_s22, %s43_s22 }
   0x9   :  { %p3791_p0 = scmp.ne.s32.totalorder %s43_s22, %s3790_s23  ;;  %p3796_p2 = scmp.lt.s32.totalorder %s3790_s23, %s3790_s23 }
   0xb   :  { %p3797_p3 = por %p3796_p2, %p3795_p1 }
   0xd   :  { %p3798_p4 = pnand %p3797_p3, %p3791_p0 }
   0xf   :  { %3801 = shalt.err (!%p3798_p4)
}
  0x10   :  { %s3997_s24 = smov 64   ;;  %s3998_s25 = smov 4  }
  0x11   :  { %48 = dma.hbm_to_vmem [thread:$0]  %s5402_s1, 2048, %s43_s22, [#allocation8], %s3997_s24, %s3997_s24, %s3998_s25  }
  0x12   :  { %s3999_s28 = smov [#allocation10]   ;;  %s4000_s30 = smov [#allocation13]  }
  0x13   :  { %s66_s29 = sshll.u32 %s3999_s28, 4  ;;  %s90_s13 = sshll.u32 %s4000_s30, 4  ;;  %s67_s29 = int_to_ptr.vmem [resolvable:$true] %s66_s29  ;;  %s91_s13 = int_to_ptr.vmem [resolvable:$true] %s90_s13 }
  0x14   :  { %s3810_s14 = scalar_lea.vmem %s67_s29, 1024  ;;  %p3815_p6 = scmp.lt.s32.totalorder %s67_s29, %s67_s29 }
  0x15   :  { %p3811_p5 = scmp.ne.s32.totalorder %s67_s29, %s3810_s14  ;;  %p3816_p7 = scmp.lt.s32.totalorder %s3810_s14, %s3810_s14 }
  0x17   :  { %p3817_p8 = por %p3816_p7, %p3815_p6 }
  0x19   :  { %p3818_p9 = pnand %p3817_p8, %p3811_p5 }
  0x1b   :  { %3821 = shalt.err (!%p3818_p9)
}
  0x1c   :  { %72 = dma.hbm_to_vmem [thread:$0]  %s5404_s3, 1024, %s67_s29, [#allocation11], %s3997_s24, %s3997_s24, %s3998_s25  }
  0x1d   :  { %s3830_s1 = scalar_lea.vmem %s91_s13, 1024  ;;  %p3835_p11 = scmp.lt.s32.totalorder %s91_s13, %s91_s13 }
  0x1e   :  { %p3831_p10 = scmp.ne.s32.totalorder %s91_s13, %s3830_s1  ;;  %p3836_p12 = scmp.lt.s32.totalorder %s3830_s1, %s3830_s1 }
  0x20   :  { %p3837_p13 = por %p3836_p12, %p3835_p11 }
  0x22   :  { %p3838_p0 = pnand %p3837_p13, %p3831_p10 }
  0x24   :  { %3841 = shalt.err (!%p3838_p0)
}
  0x25   :  { %96 = dma.hbm_to_vmem [thread:$0]  %s5406_s5, 1024, %s91_s13, [#allocation14], %s3997_s24, %s3997_s24, %s3998_s25  }
  0x26   :  { %s4001_s19 = smov [#allocation4]  }
  0x27   :  { %s30_s20 = sshll.u32 %s4001_s19, 4  ;;  %s31_s20 = int_to_ptr.vmem [resolvable:$true] %s30_s20 }
  0x28   :  { %s3850_s21 = scalar_lea.vmem %s31_s20, 2048  ;;  %p3855_p2 = scmp.lt.s32.totalorder %s31_s20, %s31_s20 }
  0x29   :  { %p3851_p1 = scmp.ne.s32.totalorder %s31_s20, %s3850_s21  ;;  %p3856_p3 = scmp.lt.s32.totalorder %s3850_s21, %s3850_s21 }
  0x2b   :  { %p3857_p4 = por %p3856_p3, %p3855_p2 }
  0x2d   :  { %p3858_p5 = pnand %p3857_p4, %p3851_p1 }
  0x2f   :  { %3861 = shalt.err (!%p3858_p5)
}
  0x30   :  { %s4002_s3 = smov 128   ;;  %s4003_s22 = smov 8  }
  0x31   :  { %36 = dma.hbm_to_vmem [thread:$0]  %s5401_s0, 2048, %s31_s20, [#allocation5], %s4002_s3, %s4002_s3, %s4003_s22  }
  0x32   :  { %s4004_s5 = smov [#allocation9]   ;;  %s4005_s28 = smov [#allocation12]  }
  0x33   :  { %s54_s27 = sshll.u32 %s4004_s5, 4  ;;  %s78_s29 = sshll.u32 %s4005_s28, 4  ;;  %s55_s27 = int_to_ptr.vmem [resolvable:$true] %s54_s27  ;;  %s79_s29 = int_to_ptr.vmem [resolvable:$true] %s78_s29 }
  0x34   :  { %s3870_s30 = scalar_lea.vmem %s55_s27, 1024  ;;  %p3875_p7 = scmp.lt.s32.totalorder %s55_s27, %s55_s27 }
  0x35   :  { %p3871_p6 = scmp.ne.s32.totalorder %s55_s27, %s3870_s30  ;;  %p3876_p8 = scmp.lt.s32.totalorder %s3870_s30, %s3870_s30 }
  0x37   :  { %p3877_p9 = por %p3876_p8, %p3875_p7 }
  0x39   :  { %p3878_p10 = pnand %p3877_p9, %p3871_p6 }
  0x3b   :  { %3881 = shalt.err (!%p3878_p10)
}
  0x3c   :  { %60 = dma.hbm_to_vmem [thread:$0]  %s5403_s2, 1024, %s55_s27, [#allocation8], %s3997_s24, %s3997_s24, %s3998_s25  }
  0x3d   :  { %s3890_s0 = scalar_lea.vmem %s79_s29, 1024  ;;  %p3895_p12 = scmp.lt.s32.totalorder %s79_s29, %s79_s29 }
  0x3e   :  { %p3891_p11 = scmp.ne.s32.totalorder %s79_s29, %s3890_s0  ;;  %p3896_p13 = scmp.lt.s32.totalorder %s3890_s0, %s3890_s0 }
  0x40   :  { %p3897_p0 = por %p3896_p13, %p3895_p12 }
  0x42   :  { %p3898_p1 = pnand %p3897_p0, %p3891_p11 }
  0x44   :  { %3901 = shalt.err (!%p3898_p1)
}
  0x45   :  { %84 = dma.hbm_to_vmem [thread:$0]  %s5405_s4, 1024, %s79_s29, [#allocation11], %s3997_s24, %s3997_s24, %s3998_s25  }
  0x46   :  { %s4006_s1 = smov [#allocation15]   ;;  %s4007_s18 = smov [#allocation16]  }
  0x47   :  { %s102_s17 = sshll.u32 %s4006_s1, 4  ;;  %s114_s19 = sshll.u32 %s4007_s18, 4  ;;  %s103_s17 = int_to_ptr.vmem [resolvable:$true] %s102_s17  ;;  %s115_s19 = int_to_ptr.vmem [resolvable:$true] %s114_s19 }
  0x48   :  { %s3910_s2 = scalar_lea.vmem %s103_s17, 1024  ;;  %p3915_p3 = scmp.lt.s32.totalorder %s103_s17, %s103_s17 }
  0x49   :  { %p3911_p2 = scmp.ne.s32.totalorder %s103_s17, %s3910_s2  ;;  %p3916_p4 = scmp.lt.s32.totalorder %s3910_s2, %s3910_s2 }
  0x4b   :  { %p3917_p5 = por %p3916_p4, %p3915_p3 }
  0x4d   :  { %p3918_p6 = pnand %p3917_p5, %p3911_p2 }
  0x4f   :  { %3921 = shalt.err (!%p3918_p6)
}
  0x50   :  { %108 = dma.hbm_to_vmem [thread:$0]  %s5407_s6, 1024, %s103_s17, [#allocation14], %s3997_s24, %s3997_s24, %s3998_s25  }
  0x51   :  { %s3930_s4 = scalar_lea.vmem %s115_s19, 1024  ;;  %p3935_p8 = scmp.lt.s32.totalorder %s115_s19, %s115_s19 }
  0x52   :  { %p3931_p7 = scmp.ne.s32.totalorder %s115_s19, %s3930_s4  ;;  %p3936_p9 = scmp.lt.s32.totalorder %s3930_s4, %s3930_s4 }
  0x54   :  { %p3937_p10 = por %p3936_p9, %p3935_p8 }
  0x56   :  { %p3938_p11 = pnand %p3937_p10, %p3931_p7 }
  0x58   :  { %3941 = shalt.err (!%p3938_p11)
}
  0x59   :  { %120 = dma.hbm_to_vmem [thread:$0]  %s5408_s7, 1024, %s115_s19, [#allocation17], %s3997_s24, %s3997_s24, %s3998_s25  }
  0x5a   :  { %3982 = dma.done.wait [#allocation5], 2048  }
  0x5b   :  { %3983 = vsyncadd [#allocation5], 4294965248 }
  0x5c   :  { %3984 = dma.done.wait [#allocation8], 3072  }
  0x5d   :  { %3985 = vsyncadd [#allocation8], 4294964224 }
  0x5e   :  { %3986 = dma.done.wait [#allocation11], 2048  }
  0x5f   :  { %3987 = vsyncadd [#allocation11], 4294965248 }
  0x60   :  { %3988 = dma.done.wait [#allocation14], 2048  }
  0x61   :  { %3989 = vsyncadd [#allocation14], 4294965248 }
  0x62   :  { %3990 = dma.done.wait [#allocation17], 1024  }
  0x63   :  { %3991 = vsyncadd [#allocation17], 4294966272  ;;  %v3422_v0 = vld [vmem:[#allocation12 + $0x38] sm:$0xff]   ;;  %v3423_v1 = vld [vmem:[#allocation12 + $0x30] sm:$0xff]  }
  0x64   :  { %3280 = vmatprep.subr.bf16.mxu0 %v3422_v0  ;;  %v3424_v2 = vld [vmem:[#allocation12 + $0x28] sm:$0xff]   ;;  %v3429_v3 = vld [vmem:[#allocation16 + $0x38] sm:$0xff]   ;;  %v3425_v4 = vld [vmem:[#allocation12 + $0x20] sm:$0xff]  }
  0x65   :  { %3281 = vmatpush3.bf16.msra.mxu0 %v3422_v0  ;;  %3312 = vmatprep.subr.bf16.mxu1 %v3429_v3  ;;  %v3431_v5 = vld [vmem:[#allocation16 + $0x30] sm:$0xff]   ;;  %v3432_v6 = vld [vmem:[#allocation10] sm:$0xff]   ;;  %v3426_v7 = vld [vmem:[#allocation12 + $0x18] sm:$0xff]  }
  0x66   :  { %3282 = vmatprep.subr.bf16.mxu0 %v3423_v1  ;;  %3313 = vmatpush3.bf16.msra.mxu1 %v3429_v3  ;;  %v3434_v8 = vld [vmem:[#allocation16 + $0x28] sm:$0xff]   ;;  %v3435_v9 = vld [vmem:[#allocation16 + $0x20] sm:$0xff]   ;;  %v3427_v10 = vld [vmem:[#allocation12 + $0x10] sm:$0xff]  }
  0x67   :  { %3314 = vmatprep.subr.bf16.mxu1 %v3431_v5  ;;  %3296 = vmatprep.mubr.bf16.mxu0 %v3432_v6  ;;  %v3438_v11 = vld [vmem:[#allocation16 + $0x18] sm:$0xff]   ;;  %v3428_v12 = vld [vmem:[#allocation12 + $0x8] sm:$0xff]   ;;  %v3430_v13 = vld [vmem:[#allocation12] sm:$0xff]  }
  0x68   :  { %v3439_v14 = vld [vmem:[#allocation16 + $0x10] sm:$0xff]   ;;  %v3446_v15 = vld [vmem:[#allocation15] sm:$0xff]   ;;  %v3442_v16 = vld [vmem:[#allocation16 + $0x8] sm:$0xff]  }
  0x69   :  { %3283 = vmatpush3.bf16.msra.mxu0 %v3423_v1  ;;  %3328 = vmatprep.mubr.bf16.mxu1 %v3446_v15  ;;  %v3433_v17 = vld [vmem:[#allocation10 + $0x8] sm:$0xff]   ;;  %v3436_v18 = vld [vmem:[#allocation10 + $0x10] sm:$0xff]   ;;  %v3443_v19 = vld [vmem:[#allocation16] sm:$0xff]  }
  0x6a   :  { %3284 = vmatprep.subr.bf16.mxu0 %v3424_v2  ;;  %3315 = vmatpush3.bf16.msra.mxu1 %v3431_v5  ;;  %v3454_v20 = vld [vmem:[#allocation7 + $0x78] sm:$0xff]   ;;  %v3456_v22 = vld [vmem:[#allocation7 + $0x70] sm:$0xff]   ;;  %v3447_v24 = vld [vmem:[#allocation15 + $0x8] sm:$0xff]  }
  0x6b   :  { %3316 = vmatprep.subr.bf16.mxu1 %v3434_v8  ;;  %v3455_v21 = vld [vmem:[#allocation7 + $0x38] sm:$0xff]   ;;  %v3440_v25 = vld [vmem:[#allocation10 + $0x20] sm:$0xff]   ;;  %v3457_v26 = vld [vmem:[#allocation7 + $0x30] sm:$0xff]  }
  0x6c   :  { %v3437_v23 = vld [vmem:[#allocation10 + $0x18] sm:$0xff]   ;;  %v3448_v27 = vld [vmem:[#allocation15 + $0x10] sm:$0xff]   ;;  %v3458_v28 = vld [vmem:[#allocation7 + $0x68] sm:$0xff]  }
  0x6d   :  { %3285 = vmatpush3.bf16.msra.mxu0 %v3424_v2  ;;  %v3459_v29 = vld [vmem:[#allocation7 + $0x28] sm:$0xff]   ;;  %v3460_v30 = vld [vmem:[#allocation7 + $0x60] sm:$0xff]   ;;  %v3449_v32 = vld [vmem:[#allocation15 + $0x18] sm:$0xff]  }
  0x6e   :  { %3286 = vmatprep.subr.bf16.mxu0 %v3425_v4  ;;  %3317 = vmatpush3.bf16.msra.mxu1 %v3434_v8  ;;  %v3441_v31 = vld [vmem:[#allocation10 + $0x28] sm:$0xff]   ;;  %v3444_v33 = vld [vmem:[#allocation10 + $0x30] sm:$0xff]   ;;  %v3461_v34 = vld [vmem:[#allocation7 + $0x20] sm:$0xff]  }
  0x6f   :  { %3318 = vmatprep.subr.bf16.mxu1 %v3435_v9  ;;  %v3450_v35 = vld [vmem:[#allocation15 + $0x20] sm:$0xff]   ;;  %v3462_v36 = vld [vmem:[#allocation7 + $0x58] sm:$0xff]   ;;  %v3464_v38 = vld [vmem:[#allocation7 + $0x50] sm:$0xff]  }
  0x70   :  { %v3463_v37 = vld [vmem:[#allocation7 + $0x18] sm:$0xff]   ;;  %v3451_v39 = vld [vmem:[#allocation15 + $0x28] sm:$0xff]   ;;  %v3465_v40 = vld [vmem:[#allocation7 + $0x10] sm:$0xff]  }
  0x71   :  { %3287 = vmatpush3.bf16.msra.mxu0 %v3425_v4  ;;  %v3445_v41 = vld [vmem:[#allocation10 + $0x38] sm:$0xff]   ;;  %v3452_v42 = vld [vmem:[#allocation15 + $0x30] sm:$0xff]   ;;  %v3466_v43 = vld [vmem:[#allocation7 + $0x48] sm:$0xff]  }
  0x72   :  { %3288 = vmatprep.subr.bf16.mxu0 %v3426_v7  ;;  %3319 = vmatpush3.bf16.msra.mxu1 %v3435_v9  ;;  %v3472_v44 = vld [vmem:[#allocation4 + $0x4] ss:$8 sps:$4 sm:$0xff]   ;;  %v3453_v47 = vld [vmem:[#allocation15 + $0x38] sm:$0xff]   ;;  %v3470_v49 = vld [vmem:[#allocation4] ss:$8 sps:$4 sm:$0xff]  }
  0x73   :  { %3320 = vmatprep.subr.bf16.mxu1 %v3438_v11  ;;  %v3467_v45 = vld [vmem:[#allocation7 + $0x8] sm:$0xff]   ;;  %v3468_v46 = vld [vmem:[#allocation7 + $0x40] sm:$0xff]   ;;  %v3473_v50 = vld [vmem:[#allocation4 + $0x14] ss:$8 sps:$4 sm:$0xff]  }
  0x74   :  { %v3469_v48 = vld [vmem:[#allocation7] sm:$0xff]   ;;  %v3475_v51 = vld [vmem:[#allocation4 + $0x10] ss:$8 sps:$4 sm:$0xff]   ;;  %v3479_v54 = vld [vmem:[#allocation4 + $0x34] ss:$8 sps:$4 sm:$0xff]  }
  0x75   :  { %3289 = vmatpush3.bf16.msra.mxu0 %v3426_v7  ;;  %v3476_v52 = vld [vmem:[#allocation4 + $0x24] ss:$8 sps:$4 sm:$0xff]   ;;  %v3478_v53 = vld [vmem:[#allocation4 + $0x20] ss:$8 sps:$4 sm:$0xff]   ;;  %v3481_v55 = vld [vmem:[#allocation4 + $0x30] ss:$8 sps:$4 sm:$0xff]  }
  0x76   :  { %3290 = vmatprep.subr.bf16.mxu0 %v3427_v10  ;;  %3321 = vmatpush3.bf16.msra.mxu1 %v3438_v11  ;;  %v3482_v56 = vld [vmem:[#allocation4 + $0x44] ss:$8 sps:$4 sm:$0xff]   ;;  %v3484_v57 = vld [vmem:[#allocation4 + $0x40] ss:$8 sps:$4 sm:$0xff]   ;;  %v3485_v58 = vld [vmem:[#allocation4 + $0x54] ss:$8 sps:$4 sm:$0xff]  }
  0x77   :  { %3322 = vmatprep.subr.bf16.mxu1 %v3439_v14  ;;  %v3487_v59 = vld [vmem:[#allocation4 + $0x50] ss:$8 sps:$4 sm:$0xff]   ;;  %v3488_v60 = vld [vmem:[#allocation4 + $0x64] ss:$8 sps:$4 sm:$0xff]   ;;  %v3490_v61 = vld [vmem:[#allocation4 + $0x60] ss:$8 sps:$4 sm:$0xff]  }
  0x78   :  { %v3491_v62 = vld [vmem:[#allocation4 + $0x74] ss:$8 sps:$4 sm:$0xff]   ;;  %v3493_v63 = vld [vmem:[#allocation4 + $0x70] ss:$8 sps:$4 sm:$0xff]   ;;  %v3503_v0 = vld [vmem:[#allocation9] sm:$0xff]  }
  0x79   :  { %3291 = vmatpush3.bf16.msra.mxu0 %v3427_v10 }
  0x7a   :  { %3292 = vmatprep.subr.bf16.mxu0 %v3428_v12  ;;  %3323 = vmatpush3.bf16.msra.mxu1 %v3439_v14 }
  0x7b   :  { %3324 = vmatprep.subr.bf16.mxu1 %v3442_v16 }
  0x7d   :  { %3293 = vmatpush3.bf16.msra.mxu0 %v3428_v12 }
  0x7e   :  { %3294 = vmatprep.subr.bf16.mxu0 %v3430_v13  ;;  %3325 = vmatpush3.bf16.msra.mxu1 %v3442_v16 }
  0x7f   :  { %3326 = vmatprep.subr.bf16.mxu1 %v3443_v19 }
  0x81   :  { %3295 = vmatpush3.bf16.msra.mxu0 %v3430_v13 }
  0x82   :  { %3184 = vmatprep.subr.bf16.mxu0 %v3454_v20  ;;  %3327 = vmatpush3.bf16.msra.mxu1 %v3443_v19 }
  0x84   :  { %3297 = vmatmul.mubr.bf16.vlgmr.msra.gmra.mxu0 %v3433_v17 }
  0x85   :  { %3300 = vmatprep.mubr.bf16.mxu0 %v3436_v18  ;;  %3185 = vmatpush3.bf16.msra.mxu0 %v3455_v21 }
  0x86   :  { %3186 = vmatprep.subr.bf16.mxu0 %v3456_v22  ;;  %3329 = vmatmul.mubr.bf16.vlgmr.msra.gmra.mxu1 %v3447_v24 }
  0x87   :  { %3332 = vmatprep.mubr.bf16.mxu1 %v3448_v27 }
  0x89   :  { %3187 = vmatpush3.bf16.msra.mxu0 %v3457_v26 }
  0x8a   :  { %3188 = vmatprep.subr.bf16.mxu0 %v3458_v28 }
  0x8c   :  { %3301 = vmatmul.mubr.bf16.gmra.mxu0 %v3437_v23 }
  0x8d   :  { %3304 = vmatprep.mubr.bf16.mxu0 %v3440_v25  ;;  %3189 = vmatpush3.bf16.msra.mxu0 %v3459_v29 }
  0x8e   :  { %3190 = vmatprep.subr.bf16.mxu0 %v3460_v30  ;;  %3333 = vmatmul.mubr.bf16.gmra.mxu1 %v3449_v32 }
  0x8f   :  { %3336 = vmatprep.mubr.bf16.mxu1 %v3450_v35 }
  0x91   :  { %3191 = vmatpush3.bf16.msra.mxu0 %v3461_v34 }
  0x92   :  { %3192 = vmatprep.subr.bf16.mxu0 %v3462_v36 }
  0x94   :  { %3305 = vmatmul.mubr.bf16.gmra.mxu0 %v3441_v31 }
  0x95   :  { %3308 = vmatprep.mubr.bf16.mxu0 %v3444_v33  ;;  %3193 = vmatpush3.bf16.msra.mxu0 %v3463_v37 }
  0x96   :  { %3194 = vmatprep.subr.bf16.mxu0 %v3464_v38  ;;  %3337 = vmatmul.mubr.bf16.gmra.mxu1 %v3451_v39 }
  0x97   :  { %3340 = vmatprep.mubr.bf16.mxu1 %v3452_v42 }
  0x99   :  { %3195 = vmatpush3.bf16.msra.mxu0 %v3465_v40 }
  0x9a   :  { %3196 = vmatprep.subr.bf16.mxu0 %v3466_v43 }
  0x9c   :  { %3309 = vmatmul.mubr.bf16.gmra.mxu0 %v3445_v41 }
  0x9d   :  { %1022 = vmatprep.mubr.bf16.mxu0 %v3472_v44  ;;  %3197 = vmatpush3.bf16.msra.mxu0 %v3467_v45 }
  0x9e   :  { %3198 = vmatprep.subr.bf16.mxu0 %v3468_v46  ;;  %3341 = vmatmul.mubr.bf16.gmra.mxu1 %v3453_v47 }
  0x9f   :  { %3360 = vmatprep.mubr.bf16.mxu1 %v3503_v0 }
  0xa1   :  { %3199 = vmatpush3.bf16.msra.mxu0 %v3469_v48 }
  0xa4   :  { %1023 = vmatmul.mubr.bf16.vlgmr.msra.gmra.mxu0 %v3470_v49  ;;  %v4126_v49 = vld [vmem:[%s5410_s9] ss:$0 sm:$0xff] }
  0xa5   :  { %1030 = vmatprep.mubr.bf16.mxu0 %v3473_v50 }
  0xac   :  { %1031 = vmatmul.mubr.bf16.gmra.mxu0 %v3475_v51 }
  0xad   :  { %1038 = vmatprep.mubr.bf16.mxu0 %v3476_v52 }
  0xb4   :  { %1039 = vmatmul.mubr.bf16.gmra.mxu0 %v3478_v53 }
  0xb5   :  { %1046 = vmatprep.mubr.bf16.mxu0 %v3479_v54 }
  0xbc   :  { %1047 = vmatmul.mubr.bf16.gmra.mxu0 %v3481_v55 }
  0xbd   :  { %1054 = vmatprep.mubr.bf16.mxu0 %v3482_v56  ;;  %v4135_v56 = vld [vmem:[%s5409_s8] ss:$0 sm:$0xff] }
  0xc4   :  { %1055 = vmatmul.mubr.bf16.gmra.mxu0 %v3484_v57 }
  0xc5   :  { %1062 = vmatprep.mubr.bf16.mxu0 %v3485_v58 }
  0xcc   :  { %1063 = vmatmul.mubr.bf16.gmra.mxu0 %v3487_v59 }
  0xcd   :  { %1070 = vmatprep.mubr.bf16.mxu0 %v3488_v60 }
  0xd4   :  { %1071 = vmatmul.mubr.bf16.gmra.mxu0 %v3490_v61 }
  0xd5   :  { %1078 = vmatprep.mubr.bf16.mxu0 %v3491_v62 }
  0xdc   :  { %1079 = vmatmul.mubr.bf16.gmra.mxu0 %v3493_v63 }
 0x144   :  { %v3298_v1 = vpop.f32.mrf.mxu0 }
 0x146   :  { %v318_v2 = vpop.f32.mrf.mxu0  ;;  %v3330_v7 = vpop.f32.mrf.mxu1 }
 0x148   :  { %v3299_v3 = vpop.f32.mrf.mxu0  ;;  %v623_v9 = vpop.f32.mrf.mxu1 }
 0x149   :  { %v3019_v4 = vpack.c.bf16 %v3299_v3, %v3298_v1 }
 0x14a   :  { %v321_v5 = vpop.f32.mrf.mxu0  ;;  %v3331_v11 = vpop.f32.mrf.mxu1 }
 0x14b   :  { %3131 = vst [vmem:[#allocation2 + $0x8] sm:$0xff] %v3019_v4   ;;  %v3014_v6 = vpack.c.bf16 %v321_v5, %v318_v2  ;;  %v3059_v13 = vpack.c.bf16 %v3331_v11, %v3330_v7 }
 0x14c   :  { %v3302_v8 = vpop.f32.mrf.mxu0  ;;  %v626_v15 = vpop.f32.mrf.mxu1 }
 0x14d   :  { %3015 = vst [vmem:[#allocation2] sm:$0xff] %v3014_v6   ;;  %3138 = vst [vmem:[#allocation3 + $0x8] sm:$0xff] %v3059_v13   ;;  %v3054_v17 = vpack.c.bf16 %v626_v15, %v623_v9 }
 0x14e   :  { %v334_v10 = vpop.f32.mrf.mxu0  ;;  %v3334_v19 = vpop.f32.mrf.mxu1 }
 0x14f   :  { %3055 = vst [vmem:[#allocation3] sm:$0xff] %v3054_v17  }
 0x150   :  { %v3303_v12 = vpop.f32.mrf.mxu0  ;;  %v639_v21 = vpop.f32.mrf.mxu1 }
 0x151   :  { %v3029_v14 = vpack.c.bf16 %v3303_v12, %v3302_v8 }
 0x152   :  { %v337_v16 = vpop.f32.mrf.mxu0  ;;  %v3335_v23 = vpop.f32.mrf.mxu1 }
 0x153   :  { %3133 = vst [vmem:[#allocation2 + $0x18] sm:$0xff] %v3029_v14   ;;  %v3024_v18 = vpack.c.bf16 %v337_v16, %v334_v10  ;;  %v3069_v25 = vpack.c.bf16 %v3335_v23, %v3334_v19 }
 0x154   :  { %v3306_v20 = vpop.f32.mrf.mxu0  ;;  %v642_v27 = vpop.f32.mrf.mxu1 }
 0x155   :  { %3132 = vst [vmem:[#allocation2 + $0x10] sm:$0xff] %v3024_v18   ;;  %3140 = vst [vmem:[#allocation3 + $0x18] sm:$0xff] %v3069_v25   ;;  %v3064_v29 = vpack.c.bf16 %v642_v27, %v639_v21 }
 0x156   :  { %v350_v22 = vpop.f32.mrf.mxu0  ;;  %v3338_v31 = vpop.f32.mrf.mxu1 }
 0x157   :  { %3139 = vst [vmem:[#allocation3 + $0x10] sm:$0xff] %v3064_v29   ;;  %v3504_v29 = vld [vmem:[#allocation9 + $0x8] sm:$0xff]  }
 0x158   :  { %v3307_v24 = vpop.f32.mrf.mxu0  ;;  %v655_v33 = vpop.f32.mrf.mxu1 }
 0x159   :  { %v3039_v26 = vpack.c.bf16 %v3307_v24, %v3306_v20  ;;  %v3501_v24 = vld [vmem:[#allocation2] sm:$0xff]  }
 0x15a   :  { %v353_v28 = vpop.f32.mrf.mxu0  ;;  %v3339_v35 = vpop.f32.mrf.mxu1  ;;  %v3498_v11 = vld [vmem:[#allocation2 + $0x18] sm:$0xff]  }
 0x15b   :  { %3135 = vst [vmem:[#allocation2 + $0x28] sm:$0xff] %v3039_v26   ;;  %v3034_v30 = vpack.c.bf16 %v353_v28, %v350_v22  ;;  %v3079_v37 = vpack.c.bf16 %v3339_v35, %v3338_v31  ;;  %v3500_v22 = vld [vmem:[#allocation2 + $0x8] sm:$0xff]   ;;  %v3507_v31 = vld [vmem:[#allocation9 + $0x10] sm:$0xff]  }
 0x15c   :  { %v3310_v32 = vpop.f32.mrf.mxu0  ;;  %v658_v39 = vpop.f32.mrf.mxu1  ;;  %v3499_v17 = vld [vmem:[#allocation2 + $0x10] sm:$0xff]  }
 0x15d   :  { %3134 = vst [vmem:[#allocation2 + $0x20] sm:$0xff] %v3034_v30   ;;  %3142 = vst [vmem:[#allocation3 + $0x28] sm:$0xff] %v3079_v37   ;;  %v3074_v41 = vpack.c.bf16 %v658_v39, %v655_v33 }
 0x15e   :  { %v366_v34 = vpop.f32.mrf.mxu0  ;;  %v3342_v43 = vpop.f32.mrf.mxu1 }
 0x15f   :  { %3141 = vst [vmem:[#allocation3 + $0x20] sm:$0xff] %v3074_v41  }
 0x160   :  { %v3311_v36 = vpop.f32.mrf.mxu0  ;;  %v671_v44 = vpop.f32.mrf.mxu1 }
 0x161   :  { %v3049_v38 = vpack.c.bf16 %v3311_v36, %v3310_v32 }
 0x162   :  { %v369_v40 = vpop.f32.mrf.mxu0  ;;  %v3343_v46 = vpop.f32.mrf.mxu1  ;;  %v3496_v63 = vld [vmem:[#allocation2 + $0x28] sm:$0xff]  }
 0x163   :  { %3137 = vst [vmem:[#allocation2 + $0x38] sm:$0xff] %v3049_v38   ;;  %v3044_v42 = vpack.c.bf16 %v369_v40, %v366_v34  ;;  %v3089_v47 = vpack.c.bf16 %v3343_v46, %v3342_v43  ;;  %v3508_v43 = vld [vmem:[#allocation9 + $0x18] sm:$0xff]  }
 0x164   :  { %v3200_v45 = vpop.f32.mrf.mxu0  ;;  %v674_v50 = vpop.f32.mrf.mxu1  ;;  %v3497_v5 = vld [vmem:[#allocation2 + $0x20] sm:$0xff]  }
 0x165   :  { %3136 = vst [vmem:[#allocation2 + $0x30] sm:$0xff] %v3044_v42   ;;  %3144 = vst [vmem:[#allocation3 + $0x38] sm:$0xff] %v3089_v47   ;;  %v3084_v53 = vpack.c.bf16 %v674_v50, %v671_v44  ;;  %v3506_v42 = vld [vmem:[#allocation3 + $0x28] sm:$0xff]  }
 0x166   :  { %v3201_v48 = vpop.f32.mrf.mxu0 }
 0x167   :  { %v4128_v51 = vadd.f32 %v3201_v48, %v3200_v45  ;;  %3143 = vst [vmem:[#allocation3 + $0x30] sm:$0xff] %v3084_v53   ;;  %v3511_v45 = vld [vmem:[#allocation9 + $0x20] sm:$0xff]  }
 0x168   :  { %v3203_v54 = vpop.f32.mrf.mxu0 }
 0x169   :  { %5469 = vst [vmem:[#allocation28_spill] sm:$0xff] %v4128_v51  ;;  %v1551_v55 = vmul.f32 %v4128_v51, %v4126_v49  ;;  %v1599_v61 = vmul.f32 %v4128_v51, %v4135_v56 }
 0x16a   :  { %v3494_v52 = vld [vmem:[#allocation2 + $0x38] sm:$0xff]   ;;  %v3204_v58 = vpop.f32.mrf.mxu0 }
 0x16b   :  { %3344 = vmatprep.subr.bf16.mxu1 %v3494_v52  ;;  %v4137_v59 = vadd.f32 %v3204_v58, %v3203_v54  ;;  %1567 = vadd.xlane.f32.xlu0 %v1551_v55 }
 0x16c   :  { %v3495_v57 = vld [vmem:[#allocation2 + $0x30] sm:$0xff]   ;;  %3345 = vmatpush3.bf16.msra.mxu1 %v3494_v52  ;;  %v3206_v60 = vpop.f32.mrf.mxu0  ;;  %v3502_v28 = vld [vmem:[#allocation3 + $0x38] sm:$0xff]   ;;  %v3509_v52 = vld [vmem:[#allocation3 + $0x20] sm:$0xff]  }
 0x16d   :  { %5470 = vst [vmem:[#allocation29_spill] sm:$0xff] %v4137_v59  ;;  %3346 = vmatprep.subr.bf16.mxu1 %v3495_v57  ;;  %v1600_v62 = vmul.f32 %v4137_v59, %v4135_v56  ;;  %v1552_v3 = vmul.f32 %v4137_v59, %v4126_v49 }
 0x16e   :  { %v3207_v0 = vpop.f32.mrf.mxu0  ;;  %v3505_v36 = vld [vmem:[#allocation3 + $0x30] sm:$0xff]  }
 0x16f   :  { %v4143_v1 = vadd.f32 %v3207_v0, %v3206_v60  ;;  %1617 = vadd.xlane.f32.xlu1 %v1600_v62  ;;  %1615 = vadd.xlane.f32.xlu0 %v1599_v61  ;;  %v3510_v60 = vld [vmem:[#allocation3 + $0x18] sm:$0xff]   ;;  %v3512_v61 = vld [vmem:[#allocation9 + $0x28] sm:$0xff]  }
 0x170   :  { %3347 = vmatpush3.bf16.msra.mxu1 %v3495_v57  ;;  %v3209_v2 = vpop.f32.mrf.mxu0 }
 0x171   :  { %5471 = vst [vmem:[#allocation30_spill] sm:$0xff] %v4143_v1  ;;  %3348 = vmatprep.subr.bf16.mxu1 %v3496_v63  ;;  %v1553_v4 = vmul.f32 %v4143_v1, %v4126_v49  ;;  %v1601_v9 = vmul.f32 %v4143_v1, %v4135_v56 }
 0x172   :  { %v3210_v6 = vpop.f32.mrf.mxu0 }
 0x173   :  { %v4149_v7 = vadd.f32 %v3210_v6, %v3209_v2  ;;  %1571 = vadd.xlane.f32.xlu1 %v1553_v4  ;;  %1569 = vadd.xlane.f32.xlu0 %v1552_v3 }
 0x174   :  { %3349 = vmatpush3.bf16.msra.mxu1 %v3496_v63  ;;  %v3212_v8 = vpop.f32.mrf.mxu0  ;;  %v3515_v63 = vld [vmem:[#allocation9 + $0x30] sm:$0xff]  }
 0x175   :  { %5472 = vst [vmem:[#allocation31_spill] sm:$0xff] %v4149_v7  ;;  %3350 = vmatprep.subr.bf16.mxu1 %v3497_v5  ;;  %v1554_v10 = vmul.f32 %v4149_v7, %v4126_v49  ;;  %v1602_v14 = vmul.f32 %v4149_v7, %v4135_v56 }
 0x176   :  { %v3213_v12 = vpop.f32.mrf.mxu0 }
 0x177   :  { %v4155_v13 = vadd.f32 %v3213_v12, %v3212_v8  ;;  %1573 = vadd.xlane.f32.xlu1 %v1554_v10  ;;  %1619 = vadd.xlane.f32.xlu0 %v1601_v9  ;;  %v3514_v12 = vld [vmem:[#allocation3 + $0x8] sm:$0xff]  }
 0x178   :  { %3351 = vmatpush3.bf16.msra.mxu1 %v3497_v5  ;;  %v3215_v15 = vpop.f32.mrf.mxu0  ;;  %v3513_v5 = vld [vmem:[#allocation3 + $0x10] sm:$0xff]  }
 0x179   :  { %5473 = vst [vmem:[#allocation32_spill] sm:$0xff] %v4155_v13  ;;  %3352 = vmatprep.subr.bf16.mxu1 %v3498_v11  ;;  %v1555_v16 = vmul.f32 %v4155_v13, %v4126_v49  ;;  %v1603_v20 = vmul.f32 %v4155_v13, %v4135_v56 }
 0x17a   :  { %v3216_v18 = vpop.f32.mrf.mxu0 }
 0x17b   :  { %v4161_v19 = vadd.f32 %v3216_v18, %v3215_v15  ;;  %1621 = vadd.xlane.f32.xlu1 %v1602_v14  ;;  %1575 = vadd.xlane.f32.xlu0 %v1555_v16  ;;  %v3516_v14 = vld [vmem:[#allocation9 + $0x38] sm:$0xff]   ;;  %v3518_v16 = vld [vmem:[#allocation13] sm:$0xff]  }
 0x17c   :  { %3353 = vmatpush3.bf16.msra.mxu1 %v3498_v11  ;;  %v3218_v25 = vpop.f32.mrf.mxu0 }
 0x17d   :  { %5474 = vst [vmem:[#allocation33_spill] sm:$0xff] %v4161_v19  ;;  %3354 = vmatprep.subr.bf16.mxu1 %v3499_v17  ;;  %v1556_v21 = vmul.f32 %v4161_v19, %v4126_v49  ;;  %v1604_v23 = vmul.f32 %v4161_v19, %v4135_v56 }
 0x17e   :  { %v3219_v26 = vpop.f32.mrf.mxu0 }
 0x17f   :  { %1577 = vadd.xlane.f32.xlu1 %v1556_v21  ;;  %1623 = vadd.xlane.f32.xlu0 %v1603_v20  ;;  %v4169_v27 = vadd.f32 %v3219_v26, %v3218_v25 }
 0x180   :  { %3355 = vmatpush3.bf16.msra.mxu1 %v3499_v17  ;;  %v3221_v30 = vpop.f32.mrf.mxu0 }
 0x181   :  { %3356 = vmatprep.subr.bf16.mxu1 %v3500_v22  ;;  %5475 = vst [vmem:[#allocation34_spill] sm:$0xff] %v4169_v27  ;;  %v1557_v32 = vmul.f32 %v4169_v27, %v4126_v49  ;;  %v1605_v35 = vmul.f32 %v4169_v27, %v4135_v56 }
 0x182   :  { %v3222_v33 = vpop.f32.mrf.mxu0 }
 0x183   :  { %1625 = vadd.xlane.f32.xlu1 %v1604_v23  ;;  %v4173_v34 = vadd.f32 %v3222_v33, %v3221_v30  ;;  %1579 = vadd.xlane.f32.xlu0 %v1557_v32 }
 0x184   :  { %3357 = vmatpush3.bf16.msra.mxu1 %v3500_v22  ;;  %v3224_v37 = vpop.f32.mrf.mxu0  ;;  %v3517_v22 = vld [vmem:[#allocation3] sm:$0xff]  }
 0x185   :  { %3358 = vmatprep.subr.bf16.mxu1 %v3501_v24  ;;  %5476 = vst [vmem:[#allocation35_spill] sm:$0xff] %v4173_v34  ;;  %v1558_v38 = vmul.f32 %v4173_v34, %v4126_v49  ;;  %v1606_v41 = vmul.f32 %v4173_v34, %v4135_v56 }
 0x186   :  { %v3225_v39 = vpop.f32.mrf.mxu0 }
 0x187   :  { %v4179_v40 = vadd.f32 %v3225_v39, %v3224_v37  ;;  %1581 = vadd.xlane.f32.xlu1 %v1558_v38  ;;  %1627 = vadd.xlane.f32.xlu0 %v1605_v35  ;;  %v3521_v39 = vld [vmem:[#allocation13 + $0x18] sm:$0xff]  }
 0x188   :  { %3359 = vmatpush3.bf16.msra.mxu1 %v3501_v24  ;;  %v3227_v44 = vpop.f32.mrf.mxu0 }
 0x189   :  { %3376 = vmatprep.subr.bf16.mxu1 %v3502_v28  ;;  %5477 = vst [vmem:[#allocation36_spill] sm:$0xff] %v4179_v40  ;;  %v1559_v46 = vmul.f32 %v4179_v40, %v4126_v49  ;;  %v1607_v50 = vmul.f32 %v4179_v40, %v4135_v56 }
 0x18a   :  { %v3228_v47 = vpop.f32.mrf.mxu0 }
 0x18b   :  { %3361 = vmatmul.mubr.bf16.vlgmr.msra.gmra.mxu1 %v3504_v29  ;;  %v4185_v48 = vadd.f32 %v3228_v47, %v3227_v44  ;;  %1629 = vadd.xlane.f32.xlu1 %v1606_v41  ;;  %v3519_v29 = vld [vmem:[#allocation13 + $0x8] sm:$0xff]   ;;  %v3522_v41 = vld [vmem:[#allocation13 + $0x20] sm:$0xff]   ;;  %v3525_v44 = vld [vmem:[#allocation13 + $0x38] sm:$0xff]  }
 0x18c   :  { %3377 = vmatpush3.bf16.msra.mxu1 %v3502_v28  ;;  %3364 = vmatprep.mubr.bf16.mxu1 %v3507_v31  ;;  %v3230_v53 = vpop.f32.mrf.mxu0  ;;  %v3520_v31 = vld [vmem:[#allocation13 + $0x10] sm:$0xff]  }
 0x18d   :  { %3378 = vmatprep.subr.bf16.mxu1 %v3505_v36  ;;  %5478 = vst [vmem:[#allocation37_spill] sm:$0xff] %v4185_v48  ;;  %1583 = vadd.xlane.f32.xlu0 %v1559_v46  ;;  %v1560_v54 = vmul.f32 %v4185_v48, %v4126_v49  ;;  %v1608_v58 = vmul.f32 %v4185_v48, %v4135_v56 }
 0x18e   :  { %v3231_v55 = vpop.f32.mrf.mxu0 }
 0x18f   :  { %v4191_v57 = vadd.f32 %v3231_v55, %v3230_v53  ;;  %1585 = vadd.xlane.f32.xlu1 %v1560_v54 }
 0x190   :  { %3379 = vmatpush3.bf16.msra.mxu1 %v3505_v36  ;;  %v3233_v62 = vpop.f32.mrf.mxu0 }
 0x191   :  { %3380 = vmatprep.subr.bf16.mxu1 %v3506_v42  ;;  %5479 = vst [vmem:[#allocation38_spill] sm:$0xff] %v4191_v57  ;;  %1631 = vadd.xlane.f32.xlu0 %v1607_v50  ;;  %v1561_v0 = vmul.f32 %v4191_v57, %v4126_v49  ;;  %v1609_v4 = vmul.f32 %v4191_v57, %v4135_v56 }
 0x192   :  { %v3234_v2 = vpop.f32.mrf.mxu0 }
 0x193   :  { %3365 = vmatmul.mubr.bf16.gmra.mxu1 %v3508_v43  ;;  %v4197_v3 = vadd.f32 %v3234_v2, %v3233_v62  ;;  %1633 = vadd.xlane.f32.xlu1 %v1608_v58  ;;  %v3524_v43 = vld [vmem:[#allocation13 + $0x30] sm:$0xff]  }
 0x194   :  { %3381 = vmatpush3.bf16.msra.mxu1 %v3506_v42  ;;  %3368 = vmatprep.mubr.bf16.mxu1 %v3511_v45  ;;  %v3236_v6 = vpop.f32.mrf.mxu0  ;;  %v3523_v42 = vld [vmem:[#allocation13 + $0x28] sm:$0xff]  }
 0x195   :  { %3382 = vmatprep.subr.bf16.mxu1 %v3509_v52  ;;  %5480 = vst [vmem:[#allocation39_spill] sm:$0xff] %v4197_v3  ;;  %1587 = vadd.xlane.f32.xlu0 %v1561_v0  ;;  %v1562_v8 = vmul.f32 %v4197_v3, %v4126_v49  ;;  %v1610_v11 = vmul.f32 %v4197_v3, %v4135_v56 }
 0x196   :  { %v3237_v9 = vpop.f32.mrf.mxu0 }
 0x197   :  { %v4203_v10 = vadd.f32 %v3237_v9, %v3236_v6  ;;  %1589 = vadd.xlane.f32.xlu1 %v1562_v8 }
 0x198   :  { %3383 = vmatpush3.bf16.msra.mxu1 %v3509_v52  ;;  %v3239_v15 = vpop.f32.mrf.mxu0 }
 0x199   :  { %3384 = vmatprep.subr.bf16.mxu1 %v3510_v60  ;;  %5481 = vst [vmem:[#allocation40_spill] sm:$0xff] %v4203_v10  ;;  %1635 = vadd.xlane.f32.xlu0 %v1609_v4  ;;  %v1563_v17 = vmul.f32 %v4203_v10, %v4126_v49  ;;  %v1611_v21 = vmul.f32 %v4203_v10, %v4135_v56 }
 0x19a   :  { %v3240_v18 = vpop.f32.mrf.mxu0 }
 0x19b   :  { %3369 = vmatmul.mubr.bf16.gmra.mxu1 %v3512_v61  ;;  %v4209_v20 = vadd.f32 %v3240_v18, %v3239_v15  ;;  %1637 = vadd.xlane.f32.xlu1 %v1610_v11 }
 0x19c   :  { %3385 = vmatpush3.bf16.msra.mxu1 %v3510_v60  ;;  %3372 = vmatprep.mubr.bf16.mxu1 %v3515_v63  ;;  %v3242_v23 = vpop.f32.mrf.mxu0 }
 0x19d   :  { %3386 = vmatprep.subr.bf16.mxu1 %v3513_v5  ;;  %5482 = vst [vmem:[#allocation41_spill] sm:$0xff] %v4209_v20  ;;  %1591 = vadd.xlane.f32.xlu0 %v1563_v17  ;;  %v1564_v24 = vmul.f32 %v4209_v20, %v4126_v49  ;;  %v1612_v28 = vmul.f32 %v4209_v20, %v4135_v56 }
 0x19e   :  { %v3243_v25 = vpop.f32.mrf.mxu0 }
 0x19f   :  { %v4215_v26 = vadd.f32 %v3243_v25, %v3242_v23  ;;  %1593 = vadd.xlane.f32.xlu1 %v1564_v24 }
 0x1a0   :  { %3387 = vmatpush3.bf16.msra.mxu1 %v3513_v5  ;;  %v3245_v30 = vpop.f32.mrf.mxu0 }
 0x1a1   :  { %3388 = vmatprep.subr.bf16.mxu1 %v3514_v12  ;;  %5483 = vst [vmem:[#allocation42_spill] sm:$0xff] %v4215_v26  ;;  %1639 = vadd.xlane.f32.xlu0 %v1611_v21  ;;  %v1565_v32 = vmul.f32 %v4215_v26, %v4126_v49  ;;  %v1613_v36 = vmul.f32 %v4215_v26, %v4135_v56 }
 0x1a2   :  { %v3246_v33 = vpop.f32.mrf.mxu0 }
 0x1a3   :  { %3373 = vmatmul.mubr.bf16.gmra.mxu1 %v3516_v14  ;;  %v4221_v35 = vadd.f32 %v3246_v33, %v3245_v30  ;;  %1641 = vadd.xlane.f32.xlu1 %v1612_v28 }
 0x1a4   :  { %3389 = vmatpush3.bf16.msra.mxu1 %v3514_v12  ;;  %3392 = vmatprep.mubr.bf16.mxu1 %v3518_v16 }
 0x1a5   :  { %3390 = vmatprep.subr.bf16.mxu1 %v3517_v22  ;;  %5484 = vst [vmem:[#allocation43_spill] sm:$0xff] %v4221_v35  ;;  %1595 = vadd.xlane.f32.xlu0 %v1565_v32  ;;  %v1566_v37 = vmul.f32 %v4221_v35, %v4126_v49  ;;  %v1614_v38 = vmul.f32 %v4221_v35, %v4135_v56 }
 0x1a7   :  { %1597 = vadd.xlane.f32.xlu1 %v1566_v37 }
 0x1a8   :  { %3391 = vmatpush3.bf16.msra.mxu1 %v3517_v22 }
 0x1a9   :  { %1643 = vadd.xlane.f32.xlu0 %v1613_v36 }
 0x1ab   :  { %3393 = vmatmul.mubr.bf16.vlgmr.msra.gmra.mxu1 %v3519_v29  ;;  %1645 = vadd.xlane.f32.xlu1 %v1614_v38 }
 0x1ac   :  { %3396 = vmatprep.mubr.bf16.mxu1 %v3520_v31 }
 0x1b3   :  { %3397 = vmatmul.mubr.bf16.gmra.mxu1 %v3521_v39 }
 0x1b4   :  { %3400 = vmatprep.mubr.bf16.mxu1 %v3522_v41 }
 0x1bb   :  { %3401 = vmatmul.mubr.bf16.gmra.mxu1 %v3523_v42 }
 0x1bc   :  { %3404 = vmatprep.mubr.bf16.mxu1 %v3524_v43 }
 0x1c3   :  { %3405 = vmatmul.mubr.bf16.gmra.mxu1 %v3525_v44 }
 0x24b   :  { %v4229_v45 = vpop.f32.mrf.mxu1 }
 0x24c   :  { %5485 = vst [vmem:[#allocation44_spill] sm:$0xff] %v4229_v45  ;;  %v1761_v49 = vmul.f32 %v4229_v45, %v4135_v56 }
 0x24d   :  { %v4233_v46 = vpop.f32.mrf.mxu1 }
 0x24e   :  { %5486 = vst [vmem:[#allocation45_spill] sm:$0xff] %v4233_v46  ;;  %1779 = vadd.xlane.f32.xlu0 %v1761_v49  ;;  %v1759_v50 = vmul.f32 %v4135_v56, %v4233_v46 }
 0x24f   :  { %v4235_v47 = vpop.f32.mrf.mxu1 }
 0x250   :  { %5487 = vst [vmem:[#allocation46_spill] sm:$0xff] %v4235_v47  ;;  %v1762_v52 = vmul.f32 %v4235_v47, %v4135_v56 }
 0x251   :  { %v4241_v53 = vpop.f32.mrf.mxu1 }
 0x252   :  { %5488 = vst [vmem:[#allocation47_spill] sm:$0xff] %v4241_v53  ;;  %1775 = vadd.xlane.f32.xlu0 %v1759_v50  ;;  %1781 = vadd.xlane.f32.xlu1 %v1762_v52  ;;  %v1760_v55 = vmul.f32 %v4135_v56, %v4241_v53  ;;  %v4325_v50 = vpop.xlane.xlu0 %1567 }
 0x253   :  { %v4243_v54 = vpop.f32.mrf.mxu1 }
 0x254   :  { %5489 = vst [vmem:[#allocation48_spill] sm:$0xff] %v4243_v54  ;;  %v1765_v58 = vmul.f32 %v4243_v54, %v4135_v56 }
 0x255   :  { %v4249_v60 = vpop.f32.mrf.mxu1 }
 0x256   :  { %5490 = vst [vmem:[#allocation49_spill] sm:$0xff] %v4249_v60  ;;  %1777 = vadd.xlane.f32.xlu1 %v1760_v55  ;;  %1787 = vadd.xlane.f32.xlu0 %v1765_v58  ;;  %v1763_v62 = vmul.f32 %v4135_v56, %v4249_v60 }
 0x257   :  { %v4251_v61 = vpop.f32.mrf.mxu1 }
 0x258   :  { %5491 = vst [vmem:[#allocation50_spill] sm:$0xff] %v4251_v61  ;;  %v1766_v63 = vmul.f32 %v4251_v61, %v4135_v56 }
 0x259   :  { %v4257_v0 = vpop.f32.mrf.mxu1 }
 0x25a   :  { %5492 = vst [vmem:[#allocation51_spill] sm:$0xff] %v4257_v0  ;;  %1783 = vadd.xlane.f32.xlu0 %v1763_v62  ;;  %1789 = vadd.xlane.f32.xlu1 %v1766_v63  ;;  %v1764_v4 = vmul.f32 %v4135_v56, %v4257_v0  ;;  %v1618_v62 = vpop.xlane.xlu1 %1617 }
 0x25b   :  { %v4259_v2 = vpop.f32.mrf.mxu1 }
 0x25c   :  { %5493 = vst [vmem:[#allocation52_spill] sm:$0xff] %v4259_v2  ;;  %v1769_v5 = vmul.f32 %v4259_v2, %v4135_v56 }
 0x25d   :  { %v4265_v6 = vpop.f32.mrf.mxu1 }
 0x25e   :  { %5494 = vst [vmem:[#allocation53_spill] sm:$0xff] %v4265_v6  ;;  %1785 = vadd.xlane.f32.xlu1 %v1764_v4  ;;  %1795 = vadd.xlane.f32.xlu0 %v1769_v5  ;;  %v1767_v9 = vmul.f32 %v4135_v56, %v4265_v6 }
 0x25f   :  { %v4267_v8 = vpop.f32.mrf.mxu1 }
 0x260   :  { %5495 = vst [vmem:[#allocation54_spill] sm:$0xff] %v4267_v8  ;;  %v1770_v11 = vmul.f32 %v4267_v8, %v4135_v56 }
 0x261   :  { %v4273_v12 = vpop.f32.mrf.mxu1 }
 0x262   :  { %5496 = vst [vmem:[#allocation55_spill] sm:$0xff] %v4273_v12  ;;  %1791 = vadd.xlane.f32.xlu0 %v1767_v9  ;;  %1797 = vadd.xlane.f32.xlu1 %v1770_v11  ;;  %v1768_v15 = vmul.f32 %v4135_v56, %v4273_v12  ;;  %v1616_v9 = vpop.xlane.xlu0 %1615 }
 0x263   :  { %v4275_v14 = vpop.f32.mrf.mxu1 }
 0x264   :  { %5497 = vst [vmem:[#allocation56_spill] sm:$0xff] %v4275_v14  ;;  %v1773_v16 = vmul.f32 %v4275_v14, %v4135_v56 }
 0x265   :  { %v4281_v17 = vpop.f32.mrf.mxu1 }
 0x266   :  { %5498 = vst [vmem:[#allocation57_spill] sm:$0xff] %v4281_v17  ;;  %1793 = vadd.xlane.f32.xlu1 %v1768_v15  ;;  %1803 = vadd.xlane.f32.xlu0 %v1773_v16  ;;  %v1771_v21 = vmul.f32 %v4135_v56, %v4281_v17  ;;  %v4343_v16 = vpop.xlane.xlu1 %1571 }
 0x267   :  { %v4283_v18 = vpop.f32.mrf.mxu1 }
 0x268   :  { %5499 = vst [vmem:[#allocation58_spill] sm:$0xff] %v4283_v18  ;;  %v1774_v22 = vmul.f32 %v4283_v18, %v4135_v56 }
 0x269   :  { %v4289_v23 = vpop.f32.mrf.mxu1 }
 0x26a   :  { %5500 = vst [vmem:[#allocation59_spill] sm:$0xff] %v4289_v23  ;;  %1799 = vadd.xlane.f32.xlu0 %v1771_v21  ;;  %1805 = vadd.xlane.f32.xlu1 %v1774_v22  ;;  %v1772_v25 = vmul.f32 %v4135_v56, %v4289_v23 }
 0x26b   :  { %v4291_v24 = vpop.f32.mrf.mxu1 }
 0x26c   :  { %5501 = vst [vmem:[#allocation60_spill] sm:$0xff] %v4291_v24  ;;  %v1921_v28 = vmul.f32 %v4291_v24, %v4135_v56 }
 0x26d   :  { %v4297_v29 = vpop.f32.mrf.mxu1 }
 0x26e   :  { %5502 = vst [vmem:[#allocation61_spill] sm:$0xff] %v4297_v29  ;;  %1801 = vadd.xlane.f32.xlu1 %v1772_v25  ;;  %1939 = vadd.xlane.f32.xlu0 %v1921_v28  ;;  %v1919_v31 = vmul.f32 %v4135_v56, %v4297_v29  ;;  %v4351_v28 = vpop.xlane.xlu0 %1569 }
 0x26f   :  { %v4299_v30 = vpop.f32.mrf.mxu1  ;;  %v4389_v10 = vadd.f32 %v1618_v62, %v4351_v28 }
 0x270   :  { %5503 = vst [vmem:[#allocation62_spill] sm:$0xff] %v4299_v30  ;;  %v1922_v32 = vmul.f32 %v4299_v30, %v4135_v56 }
 0x271   :  { %v4305_v33 = vpop.f32.mrf.mxu1  ;;  %v1680_v8 = vmin.f32 %v4389_v10, 0.0  ;;  %vm1664_vm1 = vcmp.gt.f32.partialorder %v4389_v10, 0.0 }
 0x272   :  { %5504 = vst [vmem:[#allocation63_spill] sm:$0xff] %v4305_v33  ;;  %1935 = vadd.xlane.f32.xlu0 %v1919_v31  ;;  %1941 = vadd.xlane.f32.xlu1 %v1922_v32  ;;  %v1920_v37 = vmul.f32 %v4135_v56, %v4305_v33  ;;  %v4355_v32 = vpop.xlane.xlu1 %1573 }
 0x273   :  { %v4307_v36 = vpop.f32.mrf.mxu1  ;;  %v1697_v2 = vmul.f32 1.442695, %v1680_v8 }
 0x274   :  { %5505 = vst [vmem:[#allocation64_spill] sm:$0xff] %v4307_v36  ;;  %v1925_v38 = vmul.f32 %v4307_v36, %v4135_v56 }
 0x275   :  { %v4313_v39 = vpop.f32.mrf.mxu1 }
 0x276   :  { %5506 = vst [vmem:[#allocation65_spill] sm:$0xff] %v4313_v39  ;;  %1937 = vadd.xlane.f32.xlu1 %v1920_v37  ;;  %1947 = vadd.xlane.f32.xlu0 %v1925_v38  ;;  %v1923_v42 = vmul.f32 %v4135_v56, %v4313_v39 }
 0x277   :  { %v4315_v41 = vpop.f32.mrf.mxu1 }
 0x278   :  { %5507 = vst [vmem:[#allocation66_spill] sm:$0xff] %v4315_v41  ;;  %v1926_v43 = vmul.f32 %v4315_v41, %v4135_v56 }
 0x279   :  { %v4321_v44 = vpop.f32.mrf.mxu1 }
 0x27a   :  { %5508 = vst [vmem:[#allocation67_spill] sm:$0xff] %v4321_v44  ;;  %1943 = vadd.xlane.f32.xlu0 %v1923_v42  ;;  %1949 = vadd.xlane.f32.xlu1 %v1926_v43  ;;  %v1924_v52 = vmul.f32 %v4135_v56, %v4321_v44  ;;  %v1620_v43 = vpop.xlane.xlu0 %1619 }
 0x27b   :  { %v4323_v49 = vpop.f32.mrf.mxu1  ;;  %v4393_v48 = vadd.f32 %v1620_v43, %v4343_v16 }
 0x27c   :  { %5509 = vst [vmem:[#allocation68_spill] sm:$0xff] %v4323_v49  ;;  %v1929_v55 = vmul.f32 %v4323_v49, %v4135_v56 }
 0x27d   :  { %v4331_v58 = vpop.f32.mrf.mxu1  ;;  %v1681_v6 = vmin.f32 %v4393_v48, 0.0  ;;  %vm1665_vm3 = vcmp.gt.f32.partialorder %v4393_v48, 0.0 }
 0x27e   :  { %5510 = vst [vmem:[#allocation69_spill] sm:$0xff] %v4331_v58  ;;  %1945 = vadd.xlane.f32.xlu1 %v1924_v52  ;;  %1955 = vadd.xlane.f32.xlu0 %v1929_v55  ;;  %v1927_v4 = vmul.f32 %v4135_v56, %v4331_v58  ;;  %v1622_v55 = vpop.xlane.xlu1 %1621 }
 0x27f   :  { %v4333_v63 = vpop.f32.mrf.mxu1  ;;  %v1699_v57 = vmul.f32 1.442695, %v1681_v6 }
 0x280   :  { %5511 = vst [vmem:[#allocation70_spill] sm:$0xff] %v4333_v63  ;;  %v1930_v5 = vmul.f32 %v4333_v63, %v4135_v56  ;;  %v4396_v63 = vadd.f32 %v1622_v55, %v4355_v32 }
 0x281   :  { %v4339_v11 = vpop.f32.mrf.mxu1 }
 0x282   :  { %5512 = vst [vmem:[#allocation71_spill] sm:$0xff] %v4339_v11  ;;  %1951 = vadd.xlane.f32.xlu0 %v1927_v4  ;;  %1957 = vadd.xlane.f32.xlu1 %v1930_v5  ;;  %v1928_v21 = vmul.f32 %v4135_v56, %v4339_v11  ;;  %v4365_v4 = vpop.xlane.xlu0 %1575  ;;  %v4367_v5 = vpop.xlane.xlu1 %1577  ;;  %v1682_v43 = vmin.f32 %v4396_v63, 0.0  ;;  %vm1666_vm2 = vcmp.gt.f32.partialorder %v4396_v63, 0.0 }
 0x283   :  { %v4341_v15 = vpop.f32.mrf.mxu1 }
 0x284   :  { %5513 = vst [vmem:[#allocation72_spill] sm:$0xff] %v4341_v15  ;;  %v1933_v42 = vmul.f32 %v4341_v15, %v4135_v56  ;;  %v1701_v0 = vmul.f32 1.442695, %v1682_v43 }
 0x285   :  { %v4347_v22 = vpop.f32.mrf.mxu1 }
 0x286   :  { %5514 = vst [vmem:[#allocation73_spill] sm:$0xff] %v4347_v22  ;;  %1953 = vadd.xlane.f32.xlu1 %v1928_v21  ;;  %v1931_v25 = vmul.f32 %v4135_v56, %v4347_v22  ;;  %v1624_v21 = vpop.xlane.xlu0 %1623  ;;  %v4384_v22 = vadd.f32 %v1616_v9, %v4325_v50 }
 0x287   :  { %v4353_v31 = vpop.f32.mrf.mxu1  ;;  %v4400_v3 = vadd.f32 %v1624_v21, %v4365_v4 }
 0x288   :  { %5515 = vst [vmem:[#allocation74_spill] sm:$0xff] %v4353_v31  ;;  %1959 = vadd.xlane.f32.xlu0 %v1931_v25  ;;  %v1934_v52 = vmul.f32 %v4353_v31, %v4135_v56  ;;  %v1626_v25 = vpop.xlane.xlu1 %1625  ;;  %v1679_v11 = vmin.f32 %v4384_v22, 0.0  ;;  %vm1663_vm0 = vcmp.gt.f32.partialorder %v4384_v22, 0.0 }
 0x289   :  { %v4357_v37 = vpop.f32.mrf.mxu1  ;;  %v4403_v58 = vadd.f32 %v1626_v25, %v4367_v5  ;;  %v1683_v21 = vmin.f32 %v4400_v3, 0.0  ;;  %vm1667_vm4 = vcmp.gt.f32.partialorder %v4400_v3, 0.0 }
 0x28a   :  { %5516 = vst [vmem:[#allocation75_spill] sm:$0xff] %v4357_v37  ;;  %v1932_v38 = vmul.f32 %v4135_v56, %v4357_v37  ;;  %v4369_v18 = vpop.xlane.xlu0 %1579  ;;  %v1695_v9 = vmul.f32 1.442695, %v1679_v11 }
 0x28b   :  { %v1684_v11 = vmin.f32 %v4403_v58, 0.0  ;;  %vm1668_vm5 = vcmp.gt.f32.partialorder %v4403_v58, 0.0 }
 0x28c   :  { %1963 = vadd.xlane.f32.xlu0 %v1933_v42  ;;  %1961 = vadd.xlane.f32.xlu1 %v1932_v38  ;;  %v4371_v35 = vpop.xlane.xlu1 %1581  ;;  %3526 = vpow2.f32 %v1695_v9  ;;  %v1703_v9 = vmul.f32 1.442695, %v1683_v21 }
 0x28d   :  { %3528 = vpow2.f32 %v1697_v2 }
 0x28e   :  { %v1628_v37 = vpop.xlane.xlu0 %1627  ;;  %3530 = vpow2.f32 %v1699_v57 }
 0x28f   :  { %v4407_v40 = vadd.f32 %v1628_v37, %v4369_v18  ;;  %3532 = vpow2.f32 %v1701_v0 }
 0x290   :  { %1965 = vadd.xlane.f32.xlu1 %v1934_v52  ;;  %v1630_v15 = vpop.xlane.xlu1 %1629  ;;  %3534 = vpow2.f32 %v1703_v9 }
 0x291   :  { %v4411_v55 = vadd.f32 %v1630_v15, %v4371_v35  ;;  %v1685_v37 = vmin.f32 %v4407_v40, 0.0  ;;  %vm1669_vm6 = vcmp.gt.f32.partialorder %v4407_v40, 0.0 }
 0x292   :  { %v4373_v23 = vpop.xlane.xlu0 %1583 }
 0x293   :  { %v1686_v15 = vmin.f32 %v4411_v55, 0.0  ;;  %v1707_v43 = vmul.f32 1.442695, %v1685_v37  ;;  %vm1670_vm7 = vcmp.gt.f32.partialorder %v4411_v55, 0.0 }
 0x294   :  { %v4375_v38 = vpop.xlane.xlu1 %1585 }
 0x296   :  { %v1632_v42 = vpop.xlane.xlu0 %1631 }
 0x297   :  { %v4418_v25 = vadd.f32 %v1632_v42, %v4373_v23  ;;  %v1705_v42 = vmul.f32 1.442695, %v1684_v11 }
 0x298   :  { %v1634_v56 = vpop.xlane.xlu1 %1633 }
 0x299   :  { %v4422_v44 = vadd.f32 %v1634_v56, %v4375_v38  ;;  %v1687_v6 = vmin.f32 %v4418_v25, 0.0  ;;  %3536 = vpow2.f32 %v1705_v42  ;;  %vm1671_vm9 = vcmp.gt.f32.partialorder %v4418_v25, 0.0 }
 0x29a   :  { %v4377_v31 = vpop.xlane.xlu0 %1587  ;;  %3538 = vpow2.f32 %v1707_v43  ;;  %v3527_v43 = vpop.eup %3526 }
 0x29b   :  { %v1688_v61 = vmin.f32 %v4422_v44, 0.0  ;;  %v1711_v21 = vmul.f32 1.442695, %v1687_v6  ;;  %vm1672_vm8 = vcmp.gt.f32.partialorder %v4422_v44, 0.0 }
 0x29c   :  { %v4379_v52 = vpop.xlane.xlu1 %1589 }
 0x29d   :  { %5517 = vst [vmem:[#allocation76_spill] sm:$0xff] %v4379_v52  ;;  %v1713_v57 = vmul.f32 1.442695, %v1688_v61 }
 0x29e   :  { %v1636_v20 = vpop.xlane.xlu0 %1635 }
 0x29f   :  { %v4426_v19 = vadd.f32 %v1636_v20, %v4377_v31  ;;  %v1709_v20 = vmul.f32 1.442695, %v1686_v15 }
 0x2a0   :  { %v1638_v14 = vpop.xlane.xlu1 %1637 }
 0x2a1   :  { %v4431_v41 = vadd.f32 %v1638_v14, %v4379_v52  ;;  %v1689_v34 = vmin.f32 %v4426_v19, 0.0  ;;  %3540 = vpow2.f32 %v1709_v20  ;;  %vm1673_vm11 = vcmp.gt.f32.partialorder %v4426_v19, 0.0 }
 0x2a2   :  { %v4381_v26 = vpop.xlane.xlu0 %1591  ;;  %3542 = vpow2.f32 %v1711_v21  ;;  %v3529_v21 = vpop.eup %3528 }
 0x2a3   :  { %v1690_v14 = vmin.f32 %v4431_v41, 0.0  ;;  %v1715_v0 = vmul.f32 1.442695, %v1689_v34  ;;  %3544 = vpow2.f32 %v1713_v57  ;;  %vm1674_vm10 = vcmp.gt.f32.partialorder %v4431_v41, 0.0 }
 0x2a4   :  { %v4386_v17 = vpop.xlane.xlu1 %1593 }
 0x2a5   :  { %v1717_v9 = vmul.f32 1.442695, %v1690_v14  ;;  %3546 = vpow2.f32 %v1715_v0 }
 0x2a6   :  { %v1640_v12 = vpop.xlane.xlu0 %1639 }
 0x2a7   :  { %v4435_v36 = vadd.f32 %v1640_v12, %v4381_v26  ;;  %3548 = vpow2.f32 %v1717_v9 }
 0x2a8   :  { %v1642_v62 = vpop.xlane.xlu1 %1641 }
 0x2a9   :  { %v4440_v2 = vadd.f32 %v1642_v62, %v4386_v17  ;;  %v1691_v12 = vmin.f32 %v4435_v36, 0.0  ;;  %vm1675_vm12 = vcmp.gt.f32.partialorder %v4435_v36, 0.0 }
 0x2aa   :  { %v4413_v49 = vpop.xlane.xlu0 %1595 }
 0x2ab   :  { %v1692_v15 = vmin.f32 %v4440_v2, 0.0  ;;  %v1719_v6 = vmul.f32 1.442695, %v1691_v12  ;;  %v2882_v12 = vadd.f32 -1.0, %v3527_v43  ;;  %vm1676_vm13 = vcmp.gt.f32.partialorder %v4440_v2, 0.0 }
 0x2ac   :  { %v4428_v8 = vpop.xlane.xlu1 %1597 }
 0x2ad   :  { %3550 = vpow2.f32 %v1719_v6 }
 0x2ae   :  { %v1644_v56 = vpop.xlane.xlu0 %1643 }
 0x2af   :  { %v4449_v62 = vadd.f32 %v1644_v56, %v4413_v49  ;;  %v1721_v56 = vmul.f32 1.442695, %v1692_v15  ;;  %v3531_v15 = vpop.eup %3530 }
 0x2b0   :  { %v1646_v11 = vpop.xlane.xlu1 %1645  ;;  %v3533_v43 = vpop.eup %3532  ;;  %v2884_v7 = vadd.f32 -1.0, %v3531_v15 }
 0x2b1   :  { %5518 = vst [vmem:[#allocation77_spill] sm:$0xff] %v4449_v62  ;;  %v4452_v42 = vadd.f32 %v1646_v11, %v4428_v8  ;;  %v1693_v20 = vmin.f32 %v4449_v62, 0.0  ;;  %3552 = vpow2.f32 %v1721_v56  ;;  %v2883_v62 = vadd.f32 -1.0, %v3529_v21 }
 0x2b2   :  { %v4480_v56 = vsel %vm1663_vm0, %v4384_v22, %v2882_v12  ;;  %v2885_v47 = vadd.f32 -1.0, %v3533_v43 }
 0x2b3   :  { %5519 = vst [vmem:[#allocation78_spill] sm:$0xff] %v4452_v42  ;;  %v1694_v14 = vmin.f32 %v4452_v42, 0.0  ;;  %v1723_v9 = vmul.f32 1.442695, %v1693_v20  ;;  %v3535_v42 = vpop.eup %3534  ;;  %v4490_v22 = vsel %vm1664_vm1, %v4389_v10, %v2883_v62 }
 0x2b4   :  { %v3537_v53 = vpop.eup %3536  ;;  %v2886_v12 = vadd.f32 -1.0, %v3535_v42  ;;  %v4501_v62 = vsel %vm1666_vm2, %v4396_v63, %v2885_v47  ;;  %v4506_v42 = vsel %vm1665_vm3, %v4393_v48, %v2884_v7 }
 0x2b5   :  { %v1725_v6 = vmul.f32 1.442695, %v1694_v14  ;;  %v3539_v21 = vpop.eup %3538 }
 0x2b6   :  { %v2888_v29 = vadd.f32 -1.0, %v3539_v21  ;;  %v4518_v47 = vsel %vm1667_vm4, %v4400_v3, %v2886_v12 }
 0x2d7   :  { %v1780_v39 = vpop.xlane.xlu0 %1779 }
 0x2d8   :  { %v4445_v37 = vadd.f32 %v1780_v39, %v4343_v16 }
 0x2da   :  { %v1841_v61 = vmin.f32 %v4445_v37, 0.0  ;;  %vm1825_vm14 = vcmp.gt.f32.partialorder %v4445_v37, 0.0 }
 0x2db   :  { %v1776_v60 = vpop.xlane.xlu0 %1775  ;;  %v1782_v13 = vpop.xlane.xlu1 %1781 }
 0x2dc   :  { %v4456_v39 = vadd.f32 %v1776_v60, %v4325_v50  ;;  %v4459_v34 = vadd.f32 %v1782_v13, %v4355_v32  ;;  %v1859_v27 = vmul.f32 1.442695, %v1841_v61 }
 0x2de   :  { %v1839_v11 = vmin.f32 %v4456_v39, 0.0  ;;  %v1842_v60 = vmin.f32 %v4459_v34, 0.0  ;;  %3554 = vpow2.f32 %v1859_v27  ;;  %v2887_v27 = vadd.f32 -1.0, %v3537_v53 }
 0x2df   :  { %v1778_v57 = vpop.xlane.xlu1 %1777  ;;  %v1788_v54 = vpop.xlane.xlu0 %1787  ;;  %3556 = vpow2.f32 %v1723_v9  ;;  %vm1823_vm15 = vcmp.gt.f32.partialorder %v4456_v39, 0.0  ;;  %vm1826_vm0 = vcmp.gt.f32.partialorder %v4459_v34, 0.0 }
 0x2e0   :  { %v4466_v13 = vadd.f32 %v1778_v57, %v4351_v28  ;;  %v4469_v0 = vadd.f32 %v1788_v54, %v4369_v18  ;;  %v1855_v54 = vmul.f32 1.442695, %v1839_v11  ;;  %v1861_v20 = vmul.f32 1.442695, %v1842_v60  ;;  %v3541_v11 = vpop.eup %3540 }
 0x2e1   :  { %3558 = vpow2.f32 %v1725_v6  ;;  %v2889_v6 = vadd.f32 -1.0, %v3541_v11 }
 0x2e2   :  { %v1840_v61 = vmin.f32 %v4466_v13, 0.0  ;;  %v1845_v14 = vmin.f32 %v4469_v0, 0.0  ;;  %3560 = vpow2.f32 %v1855_v54  ;;  %vm1824_vm1 = vcmp.gt.f32.partialorder %v4466_v13, 0.0 }
 0x2e3   :  { %v1784_v57 = vpop.xlane.xlu0 %1783  ;;  %v1790_v33 = vpop.xlane.xlu1 %1789  ;;  %3562 = vpow2.f32 %v1861_v20  ;;  %v4532_v3 = vsel %vm1670_vm7, %v4411_v55, %v2889_v6  ;;  %vm1829_vm2 = vcmp.gt.f32.partialorder %v4469_v0, 0.0 }
 0x2e4   :  { %v1857_v59 = vmul.f32 1.442695, %v1840_v61  ;;  %v4485_v30 = vadd.f32 %v1784_v57, %v4365_v4  ;;  %v3543_v61 = vpop.eup %3542  ;;  %v1867_v57 = vmul.f32 1.442695, %v1845_v14  ;;  %v4495_v15 = vadd.f32 %v1790_v33, %v4371_v35 }
 0x2e5   :  { %v3545_v43 = vpop.eup %3544  ;;  %v4537_v14 = vsel %vm1669_vm6, %v4407_v40, %v2888_v29  ;;  %v2890_v12 = vadd.f32 -1.0, %v3543_v61 }
 0x2e6   :  { %3564 = vpow2.f32 %v1857_v59  ;;  %v1843_v10 = vmin.f32 %v4485_v30, 0.0  ;;  %v3547_v53 = vpop.eup %3546  ;;  %v4513_v59 = vsel %vm1668_vm5, %v4403_v58, %v2887_v27  ;;  %v1846_v54 = vmin.f32 %v4495_v15, 0.0 }
 0x2e7   :  { %v1786_v60 = vpop.xlane.xlu1 %1785  ;;  %v1796_v9 = vpop.xlane.xlu0 %1795  ;;  %3566 = vpow2.f32 %v1867_v57  ;;  %v2891_v55 = vadd.f32 -1.0, %v3545_v43  ;;  %vm1827_vm4 = vcmp.gt.f32.partialorder %v4485_v30, 0.0  ;;  %vm1830_vm7 = vcmp.gt.f32.partialorder %v4495_v15, 0.0 }
 0x2e8   :  { %v3549_v33 = vpop.eup %3548  ;;  %v1863_v21 = vmul.f32 1.442695, %v1843_v10  ;;  %v4540_v11 = vadd.f32 %v1786_v60, %v4367_v5  ;;  %v4544_v57 = vadd.f32 %v1796_v9, %v4377_v31  ;;  %v1869_v51 = vmul.f32 1.442695, %v1846_v54 }
 0x2e9   :  { %v3551_v63 = vpop.eup %3550  ;;  %v2893_v6 = vadd.f32 -1.0, %v3549_v33  ;;  %v4563_v54 = vsel %vm1671_vm9, %v4418_v25, %v2890_v12 }
 0x2ea   :  { %v3553_v27 = vpop.eup %3552  ;;  %v2894_v10 = vadd.f32 -1.0, %v3551_v63  ;;  %3568 = vpow2.f32 %v1863_v21  ;;  %v1844_v9 = vmin.f32 %v4540_v11, 0.0  ;;  %v1849_v43 = vmin.f32 %v4544_v57, 0.0 }
 0x2eb   :  { %v1792_v7 = vpop.xlane.xlu0 %1791  ;;  %v1798_v48 = vpop.xlane.xlu1 %1797  ;;  %v2895_v45 = vadd.f32 -1.0, %v3553_v27  ;;  %v4558_v63 = vsel %vm1672_vm8, %v4422_v44, %v2891_v55  ;;  %vm1828_vm9 = vcmp.gt.f32.partialorder %v4540_v11, 0.0 }
 0x2ec   :  { %v4524_v20 = vadd.f32 %v1792_v7, %v4373_v23  ;;  %v4527_v58 = vadd.f32 %v1798_v48, %v4379_v52  ;;  %v2892_v48 = vadd.f32 -1.0, %v3547_v53  ;;  %v3555_v61 = vpop.eup %3554 }
 0x2ed   :  { %v3557_v52 = vpop.eup %3556  ;;  %v2900_v44 = vadd.f32 -1.0, %v3555_v61  ;;  %v4578_v25 = vsel %vm1676_vm13, %v4440_v2, %v2895_v45 }
 0x2ee   :  { %v1847_v7 = vmin.f32 %v4524_v20, 0.0  ;;  %v1850_v46 = vmin.f32 %v4527_v58, 0.0  ;;  %v3559_v33 = vpop.eup %3558  ;;  %vm1831_vm3 = vcmp.gt.f32.partialorder %v4524_v20, 0.0  ;;  %vm1834_vm5 = vcmp.gt.f32.partialorder %v4527_v58, 0.0 }
 0x2ef   :  { %v1794_v40 = vpop.xlane.xlu1 %1793  ;;  %v1804_v29 = vpop.xlane.xlu0 %1803 }
 0x2f0   :  { %v1871_v60 = vmul.f32 1.442695, %v1847_v7  ;;  %v4549_v24 = vadd.f32 %v1794_v40, %v4375_v38  ;;  %v1877_v1 = vmul.f32 1.442695, %v1850_v46  ;;  %v4568_v46 = vsel %vm1673_vm11, %v4426_v19, %v2892_v48  ;;  %v3561_v7 = vpop.eup %3560 }
 0x2f1   :  { %v4573_v40 = vsel %vm1674_vm10, %v4431_v41, %v2893_v6  ;;  %v1865_v19 = vmul.f32 1.442695, %v1844_v9  ;;  %v4588_v6 = vadd.f32 -1.0, %v3559_v33  ;;  %v1875_v48 = vmul.f32 1.442695, %v1849_v43 }
 0x2f2   :  { %3570 = vpow2.f32 %v1871_v60  ;;  %v1848_v53 = vmin.f32 %v4549_v24, 0.0  ;;  %v3563_v60 = vpop.eup %3562  ;;  %v2898_v45 = vadd.f32 -1.0, %v3561_v7  ;;  %v4594_v2 = vadd.f32 %v1804_v29, %v4413_v49 }
 0x2f3   :  { %3572 = vpow2.f32 %v1877_v1  ;;  %v1800_v21 = vpop.xlane.xlu0 %1799  ;;  %v1806_v27 = vpop.xlane.xlu1 %1805  ;;  %v4583_v1 = vsel %vm1675_vm12, %v4435_v36, %v2894_v10  ;;  %5520 = vst [vmem:[#allocation79_spill] sm:$0xff] %v4588_v6  ;;  %v4598_v9 = vsel %vm1825_vm14, %v4445_v37, %v2900_v44  ;;  %vm1832_vm6 = vcmp.gt.f32.partialorder %v4549_v24, 0.0 }
 0x2f4   :  { %3574 = vpow2.f32 %v1869_v51  ;;  %v1873_v55 = vmul.f32 1.442695, %v1848_v53  ;;  %v4586_v12 = vadd.f32 %v1800_v21, %v4381_v26  ;;  %v3565_v41 = vpop.eup %3564  ;;  %v4590_v51 = vadd.f32 -1.0, %v3557_v52  ;;  %5522 = vst [vmem:[#allocation81_spill] sm:$0xff] %v4594_v2 }
 0x2f5   :  { %v2901_v52 = vadd.f32 -1.0, %v3563_v60  ;;  %v3567_v43 = vpop.eup %3566  ;;  %v2899_v53 = vadd.f32 -1.0, %v3565_v41  ;;  %v4611_v29 = vsel %vm1823_vm15, %v4456_v39, %v2898_v45  ;;  %v1853_v7 = vmin.f32 %v4594_v2, 0.0 }
 0x2f6   :  { %5521 = vst [vmem:[#allocation80_spill] sm:$0xff] %v4590_v51  ;;  %3576 = vpow2.f32 %v1873_v55  ;;  %v1851_v36 = vmin.f32 %v4586_v12, 0.0  ;;  %vm1835_vm8 = vcmp.gt.f32.partialorder %v4586_v12, 0.0  ;;  %vm1833_vm10 = vcmp.gt.f32.partialorder %v4544_v57, 0.0 }
 0x2f7   :  { %v1802_v10 = vpop.xlane.xlu1 %1801  ;;  %v1940_v61 = vpop.xlane.xlu0 %1939  ;;  %3578 = vpow2.f32 %v1865_v19  ;;  %v4620_v19 = vsel %vm1826_vm0, %v4459_v34, %v2901_v52  ;;  %v4625_v41 = vsel %vm1824_vm1, %v4466_v13, %v2899_v53  ;;  %v4641_v53 = vadd.f32 %v1806_v27, %v4428_v8 }
 0x2f8   :  { %v1879_v33 = vmul.f32 1.442695, %v1851_v36  ;;  %v4603_v21 = vadd.f32 %v1802_v10, %v4386_v17  ;;  %3580 = vpow2.f32 %v1875_v48  ;;  %v4608_v37 = vadd.f32 %v1940_v61, %v4343_v16  ;;  %v3569_v45 = vpop.eup %3568 }
 0x2f9   :  { %v2904_v16 = vadd.f32 -1.0, %v3567_v43  ;;  %v1883_v43 = vmul.f32 1.442695, %v1853_v7 }
 0x2fa   :  { %3582 = vpow2.f32 %v1879_v33  ;;  %v1852_v39 = vmin.f32 %v4603_v21, 0.0  ;;  %v2001_v48 = vmin.f32 %v4608_v37, 0.0  ;;  %vm1836_vm11 = vcmp.gt.f32.partialorder %v4603_v21, 0.0 }
 0x2fb   :  { %v1936_v44 = vpop.xlane.xlu0 %1935  ;;  %v1942_v55 = vpop.xlane.xlu1 %1941  ;;  %vm1985_vm12 = vcmp.gt.f32.partialorder %v4608_v37, 0.0 }
 0x2fc   :  { %v1881_v34 = vmul.f32 1.442695, %v1852_v39  ;;  %v4633_v10 = vadd.f32 %v1936_v44, %v4325_v50  ;;  %v4636_v61 = vadd.f32 %v1942_v55, %v4355_v32  ;;  %v2019_v33 = vmul.f32 1.442695, %v2001_v48 }
 0x2fd   :  { %v4648_v50 = vsel %vm1829_vm2, %v4469_v0, %v2904_v16  ;;  %v2902_v44 = vadd.f32 -1.0, %v3569_v45 }
 0x2fe   :  { %3584 = vpow2.f32 %v1881_v34  ;;  %v1999_v55 = vmin.f32 %v4633_v10, 0.0  ;;  %v2002_v0 = vmin.f32 %v4636_v61, 0.0  ;;  %vm1983_vm13 = vcmp.gt.f32.partialorder %v4633_v10, 0.0 }
 0x2ff   :  { %v3571_v52 = vpop.eup %3570  ;;  %v1938_v60 = vpop.xlane.xlu1 %1937  ;;  %3586 = vpow2.f32 %v2019_v33  ;;  %vm1986_vm14 = vcmp.gt.f32.partialorder %v4636_v61, 0.0 }
 0x300   :  { %v1948_v2 = vpop.xlane.xlu0 %1947  ;;  %v3573_v51 = vpop.eup %3572  ;;  %v2906_v32 = vadd.f32 -1.0, %v3571_v52  ;;  %v4660_v16 = vadd.f32 %v1938_v60, %v4351_v28  ;;  %v2015_v33 = vmul.f32 1.442695, %v1999_v55  ;;  %v2021_v60 = vmul.f32 1.442695, %v2002_v0 }
 0x301   :  { %v3575_v7 = vpop.eup %3574  ;;  %v2909_v27 = vadd.f32 -1.0, %v3573_v51  ;;  %v4663_v34 = vadd.f32 %v1948_v2, %v4369_v18  ;;  %v4680_v52 = vsel %vm1827_vm4, %v4485_v30, %v2902_v44  ;;  %v1854_v0 = vmin.f32 %v4641_v53, 0.0 }
 0x302   :  { %v4655_v48 = vsel %vm1831_vm3, %v4524_v20, %v2906_v32  ;;  %v2905_v28 = vadd.f32 -1.0, %v3575_v7  ;;  %3588 = vpow2.f32 %v2015_v33  ;;  %vm1984_vm15 = vcmp.gt.f32.partialorder %v4660_v16, 0.0 }
 0x303   :  { %v3577_v45 = vpop.eup %3576  ;;  %v4672_v20 = vsel %vm1834_vm5, %v4527_v58, %v2909_v27  ;;  %v1950_v39 = vpop.xlane.xlu1 %1949  ;;  %v2000_v58 = vmin.f32 %v4660_v16, 0.0  ;;  %v2005_v27 = vmin.f32 %v4663_v34, 0.0  ;;  %3590 = vpow2.f32 %v2021_v60 }
 0x304   :  { %v1944_v32 = vpop.xlane.xlu0 %1943  ;;  %v2907_v2 = vadd.f32 -1.0, %v3577_v45  ;;  %v3579_v7 = vpop.eup %3578  ;;  %v4697_v51 = vadd.f32 %v1950_v39, %v4371_v35  ;;  %3592 = vpow2.f32 %v1883_v43  ;;  %vm1989_vm0 = vcmp.gt.f32.partialorder %v4663_v34, 0.0 }
 0x305   :  { %v4692_v45 = vadd.f32 %v1944_v32, %v4365_v4  ;;  %v3581_v30 = vpop.eup %3580  ;;  %v2017_v33 = vmul.f32 1.442695, %v2000_v58  ;;  %v2027_v18 = vmul.f32 1.442695, %v2005_v27  ;;  %v4708_v32 = vsel %vm1830_vm7, %v4495_v15, %v2905_v28 }
 0x306   :  { %v4688_v55 = vsel %vm1832_vm6, %v4549_v24, %v2907_v2  ;;  %v2083_v24 = vmax.f32 %v4518_v47, %v4680_v52  ;;  %v2903_v60 = vadd.f32 -1.0, %v3579_v7  ;;  %v2908_v39 = vadd.f32 -1.0, %v3581_v30 }
 0x307   :  { %v1946_v13 = vpop.xlane.xlu1 %1945  ;;  %v3583_v6 = vpop.eup %3582  ;;  %v2003_v2 = vmin.f32 %v4692_v45, 0.0  ;;  %3594 = vpow2.f32 %v2017_v33  ;;  %v2006_v27 = vmin.f32 %v4697_v51, 0.0  ;;  %vm1987_vm1 = vcmp.gt.f32.partialorder %v4692_v45, 0.0 }
 0x308   :  { %v1956_v36 = vpop.xlane.xlu0 %1955  ;;  %v4703_v4 = vadd.f32 %v1946_v13, %v4367_v5  ;;  %v2910_v35 = vadd.f32 -1.0, %v3583_v6  ;;  %3596 = vpow2.f32 %v2027_v18  ;;  %v1885_v5 = vmul.f32 1.442695, %v1854_v0 }
 0x309   :  { %v2023_v58 = vmul.f32 1.442695, %v2003_v2  ;;  %v4718_v44 = vadd.f32 %v1956_v36, %v4377_v31  ;;  %v2029_v28 = vmul.f32 1.442695, %v2006_v27  ;;  %v4730_v0 = vsel %vm1828_vm9, %v4540_v11, %v2903_v60 }
 0x30a   :  { %v4714_v43 = vsel %vm1835_vm8, %v4586_v12, %v2910_v35  ;;  %v2004_v13 = vmin.f32 %v4703_v4, 0.0  ;;  %v2086_v12 = vmax.f32 %v4532_v3, %v4708_v32  ;;  %vm1990_vm2 = vcmp.gt.f32.partialorder %v4697_v51, 0.0 }
 0x30b   :  { %3598 = vpow2.f32 %v2023_v58  ;;  %v3585_v7 = vpop.eup %3584  ;;  %v2009_v31 = vmin.f32 %v4718_v44, 0.0  ;;  %v1958_v36 = vpop.xlane.xlu1 %1957  ;;  %vm1988_vm3 = vcmp.gt.f32.partialorder %v4703_v4, 0.0  ;;  %vm1993_vm4 = vcmp.gt.f32.partialorder %v4718_v44, 0.0 }
 0x30c   :  { %v1952_v15 = vpop.xlane.xlu0 %1951  ;;  %v3587_v30 = vpop.eup %3586  ;;  %v2911_v33 = vadd.f32 -1.0, %v3585_v7  ;;  %3600 = vpow2.f32 %v2029_v28  ;;  %v2025_v2 = vmul.f32 1.442695, %v2004_v13  ;;  %v5524_v7 = vmax.f32 %v4506_v42, %v4598_v9 }
 0x30d   :  { %v4723_v18 = vadd.f32 %v1952_v15, %v4373_v23  ;;  %v4737_v23 = vsel %vm1833_vm10, %v4544_v57, %v2908_v39  ;;  %3602 = vpow2.f32 %v1885_v5  ;;  %v2916_v35 = vadd.f32 -1.0, %v3587_v30  ;;  %v5523_v15 = vld [vmem:[#allocation76_spill] sm:$0xff] }
 0x30e   :  { %v2035_v58 = vmul.f32 1.442695, %v2009_v31  ;;  %v4743_v27 = vsel %vm1836_vm11, %v4603_v21, %v2911_v33  ;;  %v4747_v6 = vadd.f32 %v1958_v36, %v5523_v15  ;;  %3604 = vpow2.f32 %v2025_v2 }
 0x30f   :  { %v2007_v11 = vmin.f32 %v4723_v18, 0.0  ;;  %v2065_v5 = vsel %vm1985_vm12, %v4608_v37, %v2916_v35  ;;  %v3589_v28 = vpop.eup %3588  ;;  %vm1991_vm5 = vcmp.gt.f32.partialorder %v4723_v18, 0.0 }
 0x310   :  { %v2097_v21 = vmax.f32 %v5524_v7, %v2065_v5  ;;  %v2010_v31 = vmin.f32 %v4747_v6, 0.0  ;;  %v3591_v36 = vpop.eup %3590  ;;  %v2914_v30 = vadd.f32 -1.0, %v3589_v28  ;;  %3606 = vpow2.f32 %v2035_v58 }
 0x311   :  { %v2031_v13 = vmul.f32 1.442695, %v2007_v11  ;;  %v2917_v11 = vadd.f32 -1.0, %v3591_v36  ;;  %v4763_v15 = vpop.eup %3592  ;;  %v5525_v58 = vmax.f32 %v4480_v56, %v4611_v29  ;;  %vm1994_vm6 = vcmp.gt.f32.partialorder %v4747_v6, 0.0 }
 0x312   :  { %v2113_v37 = vsub.f32 %v4506_v42, %v2097_v21  ;;  %v2161_v33 = vsub.f32 %v4598_v9, %v2097_v21  ;;  %v2209_v35 = vsub.f32 %v2065_v5, %v2097_v21  ;;  %v2063_v7 = vsel %vm1983_vm13, %v4633_v10, %v2914_v30 }
 0x313   :  { %3608 = vpow2.f32 %v2031_v13  ;;  %v2037_v2 = vmul.f32 1.442695, %v2010_v31  ;;  %v2095_v42 = vmax.f32 %v5525_v58, %v2063_v7  ;;  %v2066_v5 = vsel %vm1986_vm14, %v4636_v61, %v2917_v11 }
 0x314   :  { %v3595_v28 = vpop.eup %3594  ;;  %v2131_v39 = vmul.f32 1.442695, %v2113_v37  ;;  %v2179_v57 = vmul.f32 1.442695, %v2161_v33  ;;  %v2227_v60 = vmul.f32 1.442695, %v2209_v35  ;;  %v5526_v30 = vmax.f32 %v4501_v62, %v4620_v19 }
 0x315   :  { %v3597_v9 = vpop.eup %3596  ;;  %v2915_v10 = vadd.f32 -1.0, %v3595_v28  ;;  %3610 = vpow2.f32 %v2037_v2  ;;  %v2111_v13 = vsub.f32 %v4480_v56, %v2095_v42  ;;  %v2159_v21 = vsub.f32 %v4611_v29, %v2095_v42 }
 0x316   :  { %3612 = vpow2.f32 %v2131_v39  ;;  %v2207_v31 = vsub.f32 %v2063_v7, %v2095_v42  ;;  %v2098_v37 = vmax.f32 %v5526_v30, %v2066_v5  ;;  %v2920_v33 = vadd.f32 -1.0, %v3597_v9 }
 0x317   :  { %3614 = vpow2.f32 %v2179_v57  ;;  %v2064_v61 = vsel %vm1984_vm15, %v4660_v16, %v2915_v10  ;;  %v2127_v35 = vmul.f32 1.442695, %v2111_v13  ;;  %v2175_v11 = vmul.f32 1.442695, %v2159_v21 }
 0x318   :  { %v3599_v36 = vpop.eup %3598  ;;  %3616 = vpow2.f32 %v2227_v60  ;;  %v2223_v39 = vmul.f32 1.442695, %v2207_v31  ;;  %v2114_v56 = vsub.f32 %v4501_v62, %v2098_v37  ;;  %v2162_v29 = vsub.f32 %v4620_v19, %v2098_v37 }
 0x319   :  { %v3601_v2 = vpop.eup %3600  ;;  %v2210_v7 = vsub.f32 %v2066_v5, %v2098_v37  ;;  %v5527_v57 = vmax.f32 %v4490_v22, %v4625_v41  ;;  %3618 = vpow2.f32 %v2127_v35  ;;  %v2069_v16 = vsel %vm1989_vm0, %v4663_v34, %v2920_v33 }
 0x31a   :  { %v4788_v58 = vpop.eup %3602  ;;  %v2918_v60 = vadd.f32 -1.0, %v3599_v36  ;;  %v2921_v42 = vadd.f32 -1.0, %v3601_v2  ;;  %3620 = vpow2.f32 %v2175_v11  ;;  %v2133_v9 = vmul.f32 1.442695, %v2114_v56 }
 0x31b   :  { %v2096_v28 = vmax.f32 %v5527_v57, %v2064_v61  ;;  %v2181_v10 = vmul.f32 1.442695, %v2162_v29  ;;  %v2229_v62 = vmul.f32 1.442695, %v2210_v7  ;;  %3622 = vpow2.f32 %v2223_v39  ;;  %v3605_v21 = vpop.eup %3604 }
 0x31c   :  { %3624 = vpow2.f32 %v2133_v9  ;;  %v5528_v31 = vmax.f32 %v4537_v14, %v4648_v50  ;;  %v2067_v34 = vsel %vm1987_vm1, %v4692_v45, %v2918_v60  ;;  %v2070_v36 = vsel %vm1990_vm2, %v4697_v51, %v2921_v42 }
 0x31d   :  { %v2112_v19 = vsub.f32 %v4490_v22, %v2096_v28  ;;  %v2160_v5 = vsub.f32 %v4625_v41, %v2096_v28  ;;  %v2208_v13 = vsub.f32 %v2064_v61, %v2096_v28  ;;  %v3607_v22 = vpop.eup %3606  ;;  %3626 = vpow2.f32 %v2181_v10 }
 0x31e   :  { %v2101_v30 = vmax.f32 %v5528_v31, %v2069_v16  ;;  %3628 = vpow2.f32 %v2229_v62  ;;  %v2099_v51 = vmax.f32 %v2083_v24, %v2067_v34  ;;  %v2102_v39 = vmax.f32 %v2086_v12, %v2070_v36 }
 0x31f   :  { %v2129_v41 = vmul.f32 1.442695, %v2112_v19  ;;  %v2177_v37 = vmul.f32 1.442695, %v2160_v5  ;;  %v2225_v61 = vmul.f32 1.442695, %v2208_v13  ;;  %v5529_v31 = vmax.f32 %v4513_v59, %v4730_v0 }
 0x320   :  { %v2117_v33 = vsub.f32 %v4537_v14, %v2101_v30  ;;  %v2165_v35 = vsub.f32 %v4648_v50, %v2101_v30  ;;  %v2213_v11 = vsub.f32 %v2069_v16, %v2101_v30  ;;  %v3609_v45 = vpop.eup %3608  ;;  %v2919_v2 = vadd.f32 -1.0, %v3605_v21 }
 0x321   :  { %3630 = vpow2.f32 %v2129_v41  ;;  %v2115_v50 = vsub.f32 %v4518_v47, %v2099_v51  ;;  %v2163_v57 = vsub.f32 %v4680_v52, %v2099_v51  ;;  %v2211_v28 = vsub.f32 %v2067_v34, %v2099_v51 }
 0x322   :  { %3632 = vpow2.f32 %v2177_v37  ;;  %v2139_v56 = vmul.f32 1.442695, %v2117_v33  ;;  %v2187_v29 = vmul.f32 1.442695, %v2165_v35  ;;  %v2235_v14 = vmul.f32 1.442695, %v2213_v11  ;;  %v3611_v7 = vpop.eup %3610  ;;  %v1954_v11 = vpop.xlane.xlu1 %1953 }
 0x323   :  { %3634 = vpow2.f32 %v2225_v61  ;;  %v4816_v16 = vpop.eup %3612  ;;  %v2118_v24 = vsub.f32 %v4532_v3, %v2102_v39  ;;  %v2166_v60 = vsub.f32 %v4708_v32, %v2102_v39  ;;  %v2214_v12 = vsub.f32 %v2070_v36, %v2102_v39 }
 0x324   :  { %3636 = vpow2.f32 %v2139_v56  ;;  %v4820_v42 = vpop.eup %3614  ;;  %v2135_v9 = vmul.f32 1.442695, %v2115_v50  ;;  %v2183_v10 = vmul.f32 1.442695, %v2163_v57  ;;  %v2231_v62 = vmul.f32 1.442695, %v2211_v28 }
 0x325   :  { %3638 = vpow2.f32 %v2187_v29  ;;  %v4822_v19 = vpop.eup %3616  ;;  %v2257_v47 = vadd.f32 %v4820_v42, %v4816_v16  ;;  %v2141_v52 = vmul.f32 1.442695, %v2118_v24  ;;  %v2189_v3 = vmul.f32 1.442695, %v2166_v60 }
 0x326   :  { %3640 = vpow2.f32 %v2235_v14  ;;  %v2068_v32 = vsel %vm1988_vm3, %v4703_v4, %v2919_v2  ;;  %v2924_v5 = vadd.f32 -1.0, %v3607_v22  ;;  %v4830_v13 = vpop.eup %3618  ;;  %v2922_v34 = vadd.f32 -1.0, %v3609_v45 }
 0x327   :  { %3642 = vpow2.f32 %v2135_v9  ;;  %v2273_v21 = vadd.f32 %v4822_v19, %v2257_v47  ;;  %v2100_v30 = vmax.f32 %v5529_v31, %v2068_v32  ;;  %v4836_v36 = vpop.eup %3620  ;;  %v2237_v41 = vmul.f32 1.442695, %v2214_v12 }
 0x328   :  { %3644 = vpow2.f32 %v2183_v10  ;;  %v2073_v37 = vsel %vm1993_vm4, %v4718_v44, %v2924_v5  ;;  %v2925_v4 = vadd.f32 -1.0, %v3611_v7  ;;  %v4841_v22 = vpop.eup %3622  ;;  %v2255_v61 = vadd.f32 %v4836_v36, %v4830_v13 }
 0x329   :  { %3646 = vpow2.f32 %v2231_v62  ;;  %v2116_v33 = vsub.f32 %v4513_v59, %v2100_v30  ;;  %v2164_v35 = vsub.f32 %v4730_v0, %v2100_v30  ;;  %v4847_v45 = vpop.eup %3624  ;;  %v2212_v51 = vsub.f32 %v2068_v32, %v2100_v30 }
 0x32a   :  { %3648 = vrcp.f32 %v2273_v21  ;;  %v5530_v39 = vmax.f32 %v4568_v46, %v4737_v23  ;;  %v4855_v2 = vsel %vm1991_vm5, %v4723_v18, %v2922_v34  ;;  %v4857_v56 = vpop.eup %3626  ;;  %v2646_v29 = vlaneseq }
 0x32b   :  { %3650 = vpow2.f32 %v2141_v52  ;;  %v2271_v59 = vadd.f32 %v4841_v22, %v2255_v61  ;;  %v2137_v0 = vmul.f32 1.442695, %v2116_v33  ;;  %v4860_v14 = vpop.eup %3628  ;;  %v2258_v7 = vadd.f32 %v4857_v56, %v4847_v45 }
 0x32c   :  { %v2105_v44 = vmax.f32 %v5530_v39, %v2073_v37  ;;  %3652 = vpow2.f32 %v2189_v3  ;;  %v4867_v57 = vadd.f32 %v1954_v11, %v4375_v38  ;;  %v2185_v28 = vmul.f32 1.442695, %v2164_v35  ;;  %v1960_v3 = vpop.xlane.xlu0 %1959 }
 0x32d   :  { %3654 = vrcp.f32 %v2271_v59  ;;  %v5531_v60 = vmax.f32 %v4563_v54, %v4655_v48  ;;  %v2233_v10 = vmul.f32 1.442695, %v2212_v51  ;;  %v4880_v38 = vsel %vm1994_vm6, %v4747_v6, %v2925_v4 }
 0x32e   :  { %v2121_v50 = vsub.f32 %v4568_v46, %v2105_v44  ;;  %v4869_v18 = vpop.eup %3630  ;;  %v2169_v24 = vsub.f32 %v4737_v23, %v2105_v44  ;;  %v2274_v46 = vadd.f32 %v4860_v14, %v2258_v7  ;;  %3656 = vpow2.f32 %v2237_v41 }
 0x32f   :  { %v2103_v12 = vmax.f32 %v5531_v60, %v4855_v2  ;;  %v4876_v9 = vpop.eup %3632  ;;  %v4884_v47 = vand.u32 127, %v2646_v29  ;;  %3658 = vpow2.f32 %v2137_v0  ;;  %v2217_v52 = vsub.f32 %v2073_v37, %v2105_v44 }
 0x330   :  { %v4882_v62 = vpop.eup %3634  ;;  %v2256_v23 = vadd.f32 %v4876_v9, %v4869_v18  ;;  %3660 = vrcp.f32 %v2274_v46  ;;  %v2147_v5 = vmul.f32 1.442695, %v2121_v50  ;;  %v2195_v34 = vmul.f32 1.442695, %v2169_v24  ;;  %v1964_v7 = vpop.xlane.xlu0 %1963 }
 0x331   :  { %v4888_v32 = vpop.eup %3636  ;;  %v2119_v21 = vsub.f32 %v4563_v54, %v2103_v12  ;;  %v2167_v31 = vsub.f32 %v4655_v48, %v2103_v12  ;;  %3662 = vpow2.f32 %v2185_v28  ;;  %v5532_v41 = vmax.f32 %v4573_v40, %v4672_v20 }
 0x332   :  { %v4892_v6 = vpop.eup %3638  ;;  %v2272_v30 = vadd.f32 %v4882_v62, %v2256_v23  ;;  %3664 = vpow2.f32 %v2233_v10  ;;  %v2008_v54 = vmin.f32 %v4867_v57, 0.0  ;;  %v4907_v48 = vadd.f32 %v1960_v3, %v4381_v26 }
 0x333   :  { %v4899_v37 = vmax.f32 %v5532_v41, %v4880_v38  ;;  %v4901_v4 = vpop.eup %3640  ;;  %v2261_v61 = vadd.f32 %v4892_v6, %v4888_v32  ;;  %vm2648_vm7 = vcmp.eq.s32.totalorder %v4884_v47, 0  ;;  %v2243_v44 = vmul.f32 1.442695, %v2217_v52 }
 0x334   :  { %v4909_v33 = vpop.eup %3642  ;;  %3666 = vrcp.f32 %v2272_v30  ;;  %v2215_v26 = vsub.f32 %v4855_v2, %v2103_v12  ;;  %vm2665_vm8 = vcmp.eq.s32.totalorder %v4884_v47, 1  ;;  %v2143_v0 = vmul.f32 1.442695, %v2119_v21  ;;  %v5533_v21 = vld [vmem:[#allocation30_spill] sm:$0xff] }
 0x335   :  { %v2122_v35 = vsub.f32 %v4573_v40, %v4899_v37  ;;  %v2170_v11 = vsub.f32 %v4672_v20, %v4899_v37  ;;  %v4916_v51 = vpop.eup %3644  ;;  %v2277_v39 = vadd.f32 %v4901_v4, %v2261_v61  ;;  %3668 = vpow2.f32 %v2147_v5 }
 0x336   :  { %v4920_v29 = vpop.eup %3646  ;;  %v2259_v59 = vadd.f32 %v4916_v51, %v4909_v33  ;;  %3670 = vpow2.f32 %v2195_v34  ;;  %vm2682_vm9 = vcmp.eq.s32.totalorder %v4884_v47, 2  ;;  %v4926_v28 = vmul.f32 1.442695, %v2008_v54  ;;  %v5534_v34 = vld [vmem:[#allocation44_spill] sm:$0xff] }
 0x337   :  { %v3649_v50 = vpop.eup %3648  ;;  %3672 = vrcp.f32 %v2277_v39  ;;  %v2011_v24 = vmin.f32 %v4907_v48, 0.0  ;;  %v2191_v52 = vmul.f32 1.442695, %v2167_v31  ;;  %v4937_v3 = vmul.f32 1.442695, %v2215_v26 }
 0x338   :  { %v4929_v60 = vpop.eup %3650  ;;  %v2321_v2 = vmul.f32 %v3649_v50, %v4816_v16  ;;  %v2337_v12 = vmul.f32 %v3649_v50, %v4820_v42  ;;  %v2353_v46 = vmul.f32 %v3649_v50, %v4822_v19  ;;  %v2275_v10 = vadd.f32 %v4920_v29, %v2259_v59  ;;  %v5535_v19 = vld [vmem:[#allocation60_spill] sm:$0xff] }
 0x339   :  { %v4935_v23 = vpop.eup %3652  ;;  %3674 = vpow2.f32 %v2243_v44  ;;  %v4940_v5 = vadd.f32 %v1964_v7, %v4413_v49  ;;  %v4962_v7 = vld [vmem:[%s5411_s10] ss:$0 sm:$0xff]  ;;  %vm1838_vm1 = vcmp.gt.f32.partialorder %v4641_v53, 0.0  ;;  %vm1992_vm2 = vcmp.gt.f32.partialorder %v4867_v57, 0.0  ;;  %s4008_s10 = smov [#allocation19]  }
 0x33a   :  { %v2369_v30 = vmul.f32 %v5533_v21, %v2321_v2  ;;  %v2385_v41 = vmul.f32 %v5534_v34, %v2337_v12  ;;  %v2651_v16 = vsel %vm2648_vm7, %v2321_v2, 0.0  ;;  %3676 = vpow2.f32 %v2143_v0  ;;  %v3655_v42 = vpop.eup %3654  ;;  %v5537_v21 = vld [vmem:[#allocation45_spill] sm:$0xff]  ;;  %s2732_s28 = sshll.u32 %s4008_s10, 4  ;;  %s2733_s28 = int_to_ptr.vmem [resolvable:$true] %s2732_s28 }
 0x33b   :  { %v2417_v61 = vmul.f32 %v5535_v19, %v2353_v46  ;;  %v2668_v54 = vsel %vm2665_vm8, %v2337_v12, %v2651_v16  ;;  %3678 = vrcp.f32 %v2275_v10  ;;  %v2262_v31 = vadd.f32 %v4935_v23, %v4929_v60  ;;  %v4951_v49 = vpop.eup %3656  ;;  %v5536_v10 = vld [vmem:[#allocation28_spill] sm:$0xff]  ;;  %v5538_v16 = vld [vmem:[#allocation61_spill] sm:$0xff]  ;;  %s3942_s29 = scalar_lea.vmem %s2733_s28, 2048  ;;  %p3947_p13 = scmp.lt.s32.totalorder %s2733_s28, %s2733_s28 }
 0x33c   :  { %v2401_v39 = vadd.f32 %v2385_v41, %v2369_v30  ;;  %v2685_v44 = vsel %vm2682_vm9, %v2353_v46, %v2668_v54  ;;  %v2319_v26 = vmul.f32 %v3655_v42, %v4830_v13  ;;  %v2335_v59 = vmul.f32 %v3655_v42, %v4836_v36  ;;  %v4957_v0 = vpop.eup %3658  ;;  %p3943_p12 = scmp.ne.s32.totalorder %s2733_s28, %s3942_s29  ;;  %p3948_p0 = scmp.lt.s32.totalorder %s3942_s29, %s3942_s29 }
 0x33d   :  { %2701 = vst [vmem:[#allocation19 + $0x10] sm:$0xff] %v2685_v44  ;;  %v2351_v50 = vmul.f32 %v3655_v42, %v4841_v22  ;;  %v2278_v2 = vadd.f32 %v4951_v49, %v2262_v31  ;;  %3680 = vpow2.f32 %v2191_v52  ;;  %v2218_v12 = vsub.f32 %v4880_v38, %v4899_v37  ;;  %v3661_v46 = vpop.eup %3660 }
 0x33e   :  { %v2433_v13 = vadd.f32 %v2417_v61, %v2401_v39  ;;  %v2367_v36 = vmul.f32 %v5536_v10, %v2319_v26  ;;  %v2383_v30 = vmul.f32 %v2335_v59, %v5537_v21  ;;  %v2649_v34 = vsel %vm2648_vm7, %v2319_v26, 0.0  ;;  %v4972_v41 = vpop.eup %3662  ;;  %v5539_v10 = vld [vmem:[#allocation31_spill] sm:$0xff]  ;;  %p3949_p1 = por %p3948_p0, %p3947_p13 }
 0x33f   :  { %v2415_v19 = vmul.f32 %v2351_v50, %v5538_v16  ;;  %v2666_v22 = vsel %vm2665_vm8, %v2335_v59, %v2649_v34  ;;  %v2322_v52 = vmul.f32 %v3661_v46, %v4847_v45  ;;  %v2338_v42 = vmul.f32 %v3661_v46, %v4857_v56  ;;  %v4979_v54 = vpop.eup %3664  ;;  %v5540_v59 = vld [vmem:[#allocation46_spill] sm:$0xff] }
 0x340   :  { %v4982_v61 = vadd.f32 %v4962_v7, %v2433_v13  ;;  %v2399_v31 = vadd.f32 %v2383_v30, %v2367_v36  ;;  %v2683_v39 = vsel %vm2682_vm9, %v2351_v50, %v2666_v22  ;;  %v2354_v44 = vmul.f32 %v3661_v46, %v4860_v14  ;;  %v5541_v30 = vld [vmem:[#allocation62_spill] sm:$0xff]  ;;  %p3950_p2 = pnand %p3949_p1, %p3943_p12 }
 0x341   :  { %v3667_v26 = vpop.eup %3666  ;;  %2699 = vst [vmem:[#allocation19] sm:$0xff] %v2683_v39  ;;  %v2370_v21 = vmul.f32 %v5539_v10, %v2322_v52  ;;  %v2386_v34 = vmul.f32 %v5540_v59, %v2338_v42  ;;  %v2652_v45 = vsel %vm2648_vm7, %v2322_v52, 0.0  ;;  %3682 = vrcp.f32 %v2278_v2 }
 0x342   :  { %v4991_v56 = vpop.eup %3668  ;;  %v2488_v13 = vmin.f32 %v4982_v61, 0.0  ;;  %v2431_v36 = vadd.f32 %v2415_v19, %v2399_v31  ;;  %v2418_v16 = vmul.f32 %v5541_v30, %v2354_v44  ;;  %v2669_v14 = vsel %vm2665_vm8, %v2338_v42, %v2652_v45  ;;  %v5543_v45 = vld [vmem:[#allocation47_spill] sm:$0xff] }
 0x343   :  { %v4997_v50 = vpop.eup %3670  ;;  %v2402_v46 = vadd.f32 %v2386_v34, %v2370_v21  ;;  %v2686_v22 = vsel %vm2682_vm9, %v2354_v44, %v2669_v14  ;;  %v2320_v39 = vmul.f32 %v3667_v26, %v4869_v18  ;;  %v2336_v2 = vmul.f32 %v3667_v26, %v4876_v9  ;;  %v5542_v21 = vld [vmem:[#allocation29_spill] sm:$0xff] }
 0x344   :  { %v3673_v52 = vpop.eup %3672  ;;  %v2506_v10 = vmul.f32 1.442695, %v2488_v13  ;;  %v5004_v59 = vadd.f32 %v4962_v7, %v2431_v36  ;;  %2702 = vst [vmem:[#allocation19 + $0x18] sm:$0xff] %v2686_v22  ;;  %v2352_v19 = vmul.f32 %v3667_v26, %v4882_v62  ;;  %v2260_v42 = vadd.f32 %v4972_v41, %v4957_v0  ;;  %v5544_v36 = vld [vmem:[#allocation63_spill] sm:$0xff] }
 0x345   :  { %v2434_v31 = vadd.f32 %v2418_v16, %v2402_v46  ;;  %v2368_v34 = vmul.f32 %v5542_v21, %v2320_v39  ;;  %v2384_v44 = vmul.f32 %v2336_v2, %v5543_v45  ;;  %v2650_v18 = vsel %vm2648_vm7, %v2320_v39, 0.0 }
 0x346   :  { %v5013_v9 = vpop.eup %3674  ;;  %v2486_v13 = vmin.f32 %v5004_v59, 0.0  ;;  %v2416_v30 = vmul.f32 %v2352_v19, %v5544_v36  ;;  %v2667_v62 = vsel %vm2665_vm8, %v2336_v2, %v2650_v18  ;;  %v5022_v26 = vmul.f32 1.442695, %v2122_v35 }
 0x347   :  { %v5024_v16 = vpop.eup %3676  ;;  %v5027_v14 = vadd.f32 %v4962_v7, %v2434_v31  ;;  %v2400_v46 = vadd.f32 %v2384_v44, %v2368_v34  ;;  %v2684_v22 = vsel %vm2682_vm9, %v2352_v19, %v2667_v62  ;;  %v2325_v39 = vmul.f32 %v3673_v52, %v4888_v32  ;;  %v5545_v32 = vld [vmem:[#allocation34_spill] sm:$0xff] }
 0x348   :  { %v3679_v21 = vpop.eup %3678  ;;  %3684 = vpow2.f32 %v2506_v10  ;;  %v2502_v45 = vmul.f32 1.442695, %v2486_v13  ;;  %2700 = vst [vmem:[#allocation19 + $0x8] sm:$0xff] %v2684_v22  ;;  %v2341_v2 = vmul.f32 %v3673_v52, %v4892_v6  ;;  %v2276_v40 = vadd.f32 %v4979_v54, %v2260_v42  ;;  %v5546_v10 = vld [vmem:[#allocation48_spill] sm:$0xff]  ;;  %v5547_v62 = vld [vmem:[#allocation78_spill] sm:$0xff] }
 0x349   :  { %v2489_v35 = vmin.f32 %v5027_v14, 0.0  ;;  %v2432_v18 = vadd.f32 %v2416_v30, %v2400_v46  ;;  %v2357_v31 = vmul.f32 %v3673_v52, %v4901_v4  ;;  %v2655_v34 = vsel %vm2648_vm7, %v2325_v39, 0.0  ;;  %v1962_v30 = vpop.xlane.xlu1 %1961  ;;  %v5548_v46 = vld [vmem:[#allocation77_spill] sm:$0xff] }
 0x34a   :  { %v5038_v44 = vpop.eup %3680  ;;  %3686 = vpow2.f32 %v2502_v45  ;;  %v2373_v19 = vmul.f32 %v5545_v32, %v2325_v39  ;;  %v2389_v13 = vmul.f32 %v5546_v10, %v2341_v2  ;;  %v2672_v6 = vsel %vm2665_vm8, %v2341_v2, %v2655_v34  ;;  %v5550_v10 = vld [vmem:[#allocation49_spill] sm:$0xff] }
 0x34b   :  { %v2508_v36 = vmul.f32 1.442695, %v2489_v35  ;;  %v5045_v42 = vadd.f32 %v4962_v7, %v2432_v18  ;;  %v2689_v4 = vsel %vm2682_vm9, %v2357_v31, %v2672_v6  ;;  %v2323_v52 = vmul.f32 %v3679_v21, %v4909_v33  ;;  %v5549_v35 = vld [vmem:[#allocation32_spill] sm:$0xff] }
 0x34c   :  { %vm1678_vm10 = vcmp.gt.f32.partialorder %v5547_v62, 0.0  ;;  %vm1677_vm11 = vcmp.gt.f32.partialorder %v5548_v46, 0.0  ;;  %2705 = vst [vmem:[#allocation19 + $0x30] sm:$0xff] %v2689_v4  ;;  %v2339_v22 = vmul.f32 %v3679_v21, %v4916_v51  ;;  %v2355_v39 = vmul.f32 %v3679_v21, %v4920_v29  ;;  %v5551_v4 = vld [vmem:[#allocation65_spill] sm:$0xff] }
 0x34d   :  { %3688 = vrcp.f32 %v2276_v40  ;;  %v2197_v45 = vmul.f32 1.442695, %v2170_v11  ;;  %v2487_v2 = vmin.f32 %v5045_v42, 0.0  ;;  %v2371_v33 = vmul.f32 %v5549_v35, %v2323_v52 }
 0x34e   :  { %3690 = vpow2.f32 %v2508_v36  ;;  %v2653_v18 = vsel %vm2648_vm7, %v2323_v52, 0.0  ;;  %v3683_v34 = vpop.eup %3682  ;;  %v2405_v32 = vadd.f32 %v2389_v13, %v2373_v19  ;;  %v2387_v6 = vmul.f32 %v2339_v22, %v5550_v10 }
 0x34f   :  { %v2670_v51 = vsel %vm2665_vm8, %v2339_v22, %v2653_v18  ;;  %v5065_v29 = vadd.f32 %v1962_v30, %v4386_v17  ;;  %v2504_v20 = vmul.f32 1.442695, %v2487_v2  ;;  %v2326_v21 = vmul.f32 %v3683_v34, %v4929_v60  ;;  %v5552_v17 = vld [vmem:[#allocation35_spill] sm:$0xff]  ;;  %v5553_v22 = vld [vmem:[#allocation50_spill] sm:$0xff]  ;;  %v5554_v60 = vld [vmem:[#allocation64_spill] sm:$0xff] }
 0x350   :  { %v2687_v11 = vsel %vm2682_vm9, %v2355_v39, %v2670_v51  ;;  %v2342_v40 = vmul.f32 %v3683_v34, %v4935_v23  ;;  %v2403_v36 = vadd.f32 %v2387_v6, %v2371_v33  ;;  %v2419_v52 = vmul.f32 %v2355_v39, %v5551_v4  ;;  %v5555_v33 = vld [vmem:[#allocation66_spill] sm:$0xff] }
 0x351   :  { %2703 = vst [vmem:[#allocation19 + $0x20] sm:$0xff] %v2687_v11  ;;  %v2358_v19 = vmul.f32 %v3683_v34, %v4951_v49  ;;  %v2265_v13 = vadd.f32 %v4997_v50, %v4991_v56  ;;  %3692 = vpow2.f32 %v2504_v20  ;;  %v2374_v30 = vmul.f32 %v5552_v17, %v2326_v21  ;;  %v1966_v49 = vpop.xlane.xlu1 %1965  ;;  %v5556_v17 = vld [vmem:[#allocation79_spill] sm:$0xff] }
 0x352   :  { %v2390_v2 = vmul.f32 %v5553_v22, %v2342_v40  ;;  %v2656_v35 = vsel %vm2648_vm7, %v2326_v21, 0.0  ;;  %v2421_v18 = vmul.f32 %v5554_v60, %v2357_v31  ;;  %v2435_v23 = vadd.f32 %v2419_v52, %v2403_v36 }
 0x353   :  { %v2422_v10 = vmul.f32 %v5555_v33, %v2358_v19  ;;  %v2673_v39 = vsel %vm2665_vm8, %v2342_v40, %v2656_v35  ;;  %v2281_v51 = vadd.f32 %v5013_v9, %v2265_v13  ;;  %3694 = vpow2.f32 %v4937_v3  ;;  %v5558_v33 = vld [vmem:[#allocation33_spill] sm:$0xff] }
 0x354   :  { %v2406_v34 = vadd.f32 %v2390_v2, %v2374_v30  ;;  %v2690_v6 = vsel %vm2682_vm9, %v2358_v19, %v2673_v39  ;;  %v5088_v20 = vadd.f32 %v4962_v7, %v2435_v23  ;;  %v2263_v31 = vadd.f32 %v5038_v44, %v5024_v16 }
 0x355   :  { %2706 = vst [vmem:[#allocation19 + $0x38] sm:$0xff] %v2690_v6  ;;  %v2013_v11 = vmin.f32 %v4940_v5, 0.0  ;;  %v2012_v21 = vmin.f32 %v5065_v29, 0.0  ;;  %v3685_v40 = vpop.eup %3684  ;;  %v2437_v36 = vadd.f32 %v2421_v18, %v2405_v32  ;;  %3696 = vrcp.f32 %v2281_v51  ;;  %v5557_v32 = vld [vmem:[#allocation80_spill] sm:$0xff]  ;;  %v5560_v51 = vld [vmem:[#allocation67_spill] sm:$0xff] }
 0x356   :  { %v2438_v4 = vadd.f32 %v2422_v10, %v2406_v34  ;;  %v5095_v52 = vadd.f32 %v1966_v49, %v4428_v8  ;;  %v2490_v3 = vmin.f32 %v5088_v20, 0.0  ;;  %3698 = vpow2.f32 %v5022_v26  ;;  %v5559_v10 = vld [vmem:[#allocation51_spill] sm:$0xff] }
 0x357   :  { %v2245_v19 = vmul.f32 1.442695, %v2218_v12  ;;  %v3687_v13 = vpop.eup %3686  ;;  %v5106_v30 = vsel %vm1678_vm10, %v5547_v62, %v5556_v17  ;;  %v5112_v8 = vsel %vm1677_vm11, %v5548_v46, %v5557_v32  ;;  %3700 = vpow2.f32 %v2197_v45  ;;  %v5561_v17 = vld [vmem:[#allocation81_spill] sm:$0xff] }
 0x358   :  { %v2039_v26 = vmul.f32 1.442695, %v2011_v24  ;;  %v2912_v38 = vadd.f32 -1.0, %v4763_v15  ;;  %v5118_v37 = vadd.f32 %v4962_v7, %v2438_v4  ;;  %v2043_v12 = vmul.f32 1.442695, %v2013_v11 }
 0x359   :  { %v2041_v22 = vmul.f32 1.442695, %v2012_v21  ;;  %v5121_v62 = vadd.f32 %v4962_v7, %v2437_v36  ;;  %v2510_v35 = vmul.f32 1.442695, %v2490_v3  ;;  %3702 = vpow2.f32 %v4926_v28 }
 0x35a   :  { %v3689_v2 = vpop.eup %3688  ;;  %v2014_v46 = vmin.f32 %v5095_v52, 0.0  ;;  %3704 = vpow2.f32 %v2245_v19  ;;  %vm2472_vm12 = vcmp.gt.f32.partialorder %v4982_v61, 0.0  ;;  %vm2473_vm13 = vcmp.gt.f32.partialorder %v5027_v14, 0.0 }
 0x35b   :  { %v3691_v45 = vpop.eup %3690  ;;  %v2324_v60 = vmul.f32 %v3689_v2, %v4957_v0  ;;  %v2340_v24 = vmul.f32 %v3689_v2, %v4972_v41  ;;  %v2356_v15 = vmul.f32 %v3689_v2, %v4979_v54  ;;  %3706 = vpow2.f32 %v2039_v26 }
 0x35c   :  { %v2933_v18 = vadd.f32 -1.0, %v3685_v40  ;;  %v2493_v23 = vmin.f32 %v5118_v37, 0.0  ;;  %3708 = vpow2.f32 %v2510_v35  ;;  %v2931_v54 = vadd.f32 -1.0, %v3687_v13 }
 0x35d   :  { %v2372_v28 = vmul.f32 %v5558_v33, %v2324_v60  ;;  %v2388_v39 = vmul.f32 %v2340_v24, %v5559_v10  ;;  %v2654_v0 = vsel %vm2648_vm7, %v2324_v60, 0.0  ;;  %v2934_v49 = vadd.f32 -1.0, %v3691_v45  ;;  %v5563_v33 = vld [vmem:[#allocation52_spill] sm:$0xff] }
 0x35e   :  { %v2671_v41 = vsel %vm2665_vm8, %v2340_v24, %v2654_v0  ;;  %v3693_v34 = vpop.eup %3692  ;;  %v2420_v11 = vmul.f32 %v2356_v15, %v5560_v51  ;;  %3710 = vpow2.f32 %v2043_v12  ;;  %v2552_v36 = vsel %vm2472_vm12, %v4982_v61, %v2933_v18 }
 0x35f   :  { %v2404_v6 = vadd.f32 %v2388_v39, %v2372_v28  ;;  %v2688_v21 = vsel %vm2682_vm9, %v2356_v15, %v2671_v41  ;;  %3712 = vpow2.f32 %v2041_v22  ;;  %v2932_v40 = vadd.f32 -1.0, %v3693_v34 }
 0x360   :  { %2704 = vst [vmem:[#allocation19 + $0x28] sm:$0xff] %v2688_v21  ;;  %v2553_v4 = vsel %vm2473_vm13, %v5027_v14, %v2934_v49  ;;  %v5146_v3 = vpop.eup %3694  ;;  %vm2470_vm14 = vcmp.gt.f32.partialorder %v5004_v59, 0.0  ;;  %vm2471_vm15 = vcmp.gt.f32.partialorder %v5045_v42, 0.0  ;;  %vm1837_vm0 = vcmp.gt.f32.partialorder %v5561_v17, 0.0 }
 0x361   :  { %v2436_v19 = vadd.f32 %v2420_v11, %v2404_v6  ;;  %v3099_v13 = vpack.c.bf16 %v2553_v4, %v2552_v36  ;;  %v2279_v32 = vadd.f32 %v5146_v3, %v2263_v31  ;;  %v2550_v26 = vsel %vm2470_vm14, %v5004_v59, %v2931_v54  ;;  %v5564_v11 = vld [vmem:[#allocation68_spill] sm:$0xff] }
 0x362   :  { %v2551_v61 = vsel %vm2471_vm15, %v5045_v42, %v2932_v40  ;;  %v3697_v12 = vpop.eup %3696  ;;  %v2516_v14 = vmul.f32 1.442695, %v2493_v23  ;;  %v2913_v45 = vadd.f32 -1.0, %v4788_v58  ;;  %v5168_v42 = vsel %vm1837_vm0, %v5561_v17, %v2912_v38  ;;  %v5562_v23 = vld [vmem:[#allocation38_spill] sm:$0xff] }
 0x363   :  { %v5156_v22 = vadd.f32 %v4962_v7, %v2436_v19  ;;  %v3094_v2 = vpack.c.bf16 %v2551_v61, %v2550_v26  ;;  %3145 = vst [vmem:[#allocation18 + $0x8] sm:$0xff] %v3099_v13   ;;  %v5158_v35 = vpop.eup %3698  ;;  %v2329_v60 = vmul.f32 %v3697_v12, %v4991_v56  ;;  %v2345_v31 = vmul.f32 %v3697_v12, %v4997_v50 }
 0x364   :  { %3714 = vrcp.f32 %v2279_v32  ;;  %v5163_v59 = vpop.eup %3700  ;;  %v2492_v24 = vmin.f32 %v5121_v62, 0.0  ;;  %v2045_v18 = vmul.f32 1.442695, %v2014_v46  ;;  %v2361_v58 = vmul.f32 %v3697_v12, %v5013_v9 }
 0x365   :  { %v2491_v15 = vmin.f32 %v5156_v22, 0.0  ;;  %3095 = vst [vmem:[#allocation18] sm:$0xff] %v3094_v2   ;;  %v2377_v56 = vmul.f32 %v5562_v23, %v2329_v60  ;;  %v2393_v50 = vmul.f32 %v5563_v33, %v2345_v31  ;;  %v2659_v28 = vsel %vm2648_vm7, %v2329_v60, 0.0 }
 0x366   :  { %v3703_v10 = vpop.eup %3702  ;;  %3716 = vpow2.f32 %v2516_v14  ;;  %v2676_v38 = vsel %vm2665_vm8, %v2345_v31, %v2659_v28  ;;  %v2266_v0 = vadd.f32 %v5163_v59, %v5158_v35  ;;  %v5186_v9 = vsel %vm1838_vm1, %v4641_v53, %v2913_v45 }
 0x367   :  { %v2512_v39 = vmul.f32 1.442695, %v2491_v15  ;;  %v5181_v46 = vpop.eup %3704  ;;  %v2409_v41 = vadd.f32 %v2393_v50, %v2377_v56  ;;  %v2693_v54 = vsel %vm2682_vm9, %v2361_v58, %v2676_v38  ;;  %v2923_v49 = vadd.f32 -1.0, %v3703_v10 }
 0x368   :  { %v3707_v34 = vpop.eup %3706  ;;  %v2514_v6 = vmul.f32 1.442695, %v2492_v24  ;;  %2709 = vst [vmem:[#allocation19 + $0x50] sm:$0xff] %v2693_v54  ;;  %v2282_v51 = vadd.f32 %v5181_v46, %v2266_v0  ;;  %3718 = vpow2.f32 %v2045_v18  ;;  %v2425_v21 = vmul.f32 %v5564_v11, %v2361_v58  ;;  %v5569_v11 = vld [vmem:[#allocation69_spill] sm:$0xff] }
 0x369   :  { %3720 = vpow2.f32 %v2512_v39  ;;  %v2072_v40 = vsel %vm1992_vm2, %v4867_v57, %v2923_v49  ;;  %v2926_v53 = vadd.f32 -1.0, %v3707_v34  ;;  %v3709_v36 = vpop.eup %3708  ;;  %v2093_v4 = vmax.f32 %v5112_v8, %v5168_v42  ;;  %v5567_v49 = vld [vmem:[#allocation36_spill] sm:$0xff] }
 0x36a   :  { %3722 = vrcp.f32 %v2282_v51  ;;  %v5565_v19 = vmax.f32 %v4558_v63, %v4688_v55  ;;  %vm1995_vm3 = vcmp.gt.f32.partialorder %v4907_v48, 0.0  ;;  %v2094_v32 = vmax.f32 %v5106_v30, %v5186_v9 }
 0x36b   :  { %v3711_v17 = vpop.eup %3710  ;;  %v2441_v26 = vadd.f32 %v2425_v21, %v2409_v41  ;;  %v2075_v61 = vsel %vm1995_vm3, %v4907_v48, %v2926_v53  ;;  %vm1997_vm4 = vcmp.gt.f32.partialorder %v4940_v5, 0.0  ;;  %v5566_v45 = vmax.f32 %v4583_v1, %v4714_v43 }
 0x36c   :  { %v2104_v13 = vmax.f32 %v5565_v19, %v2072_v40  ;;  %v3713_v57 = vpop.eup %3712  ;;  %3724 = vpow2.f32 %v2514_v6  ;;  %v2928_v31 = vadd.f32 -1.0, %v3711_v17  ;;  %vm1996_vm5 = vcmp.gt.f32.partialorder %v5065_v29, 0.0  ;;  %v5568_v6 = vld [vmem:[#allocation53_spill] sm:$0xff] }
 0x36d   :  { %v2107_v60 = vmax.f32 %v5566_v45, %v2075_v61  ;;  %v2927_v24 = vadd.f32 -1.0, %v3713_v57  ;;  %v5211_v58 = vadd.f32 -1.0, %v3709_v36  ;;  %vm1998_vm6 = vcmp.gt.f32.partialorder %v5095_v52, 0.0 }
 0x36e   :  { %v2120_v12 = vsub.f32 %v4558_v63, %v2104_v13  ;;  %v2168_v14 = vsub.f32 %v4688_v55, %v2104_v13  ;;  %v2216_v2 = vsub.f32 %v2072_v40, %v2104_v13  ;;  %v5214_v63 = vadd.f32 %v4962_v7, %v2441_v26 }
 0x36f   :  { %v2123_v48 = vsub.f32 %v4583_v1, %v2107_v60  ;;  %v2171_v55 = vsub.f32 %v4714_v43, %v2107_v60  ;;  %v2219_v23 = vsub.f32 %v2075_v61, %v2107_v60  ;;  %v2077_v56 = vsel %vm1997_vm4, %v4940_v5, %v2928_v31 }
 0x370   :  { %v2145_v15 = vmul.f32 1.442695, %v2120_v12  ;;  %v2193_v18 = vmul.f32 1.442695, %v2168_v14  ;;  %v2241_v50 = vmul.f32 1.442695, %v2216_v2  ;;  %v2109_v10 = vmax.f32 %v2093_v4, %v2077_v56 }
 0x371   :  { %v3715_v33 = vpop.eup %3714  ;;  %v2151_v28 = vmul.f32 1.442695, %v2123_v48  ;;  %v2076_v43 = vsel %vm1996_vm5, %v5065_v29, %v2927_v24  ;;  %v2199_v0 = vmul.f32 1.442695, %v2171_v55  ;;  %v2247_v41 = vmul.f32 1.442695, %v2219_v23 }
 0x372   :  { %3726 = vpow2.f32 %v2145_v15  ;;  %v2327_v39 = vmul.f32 %v3715_v33, %v5024_v16  ;;  %v2343_v1 = vmul.f32 %v3715_v33, %v5038_v44  ;;  %v2359_v38 = vmul.f32 %v3715_v33, %v5146_v3  ;;  %v5572_v55 = vld [vmem:[#allocation54_spill] sm:$0xff] }
 0x373   :  { %3728 = vpow2.f32 %v2193_v18  ;;  %v2125_v5 = vsub.f32 %v5112_v8, %v2109_v10  ;;  %v3717_v54 = vpop.eup %3716  ;;  %v2173_v21 = vsub.f32 %v5168_v42, %v2109_v10  ;;  %v2221_v36 = vsub.f32 %v2077_v56, %v2109_v10  ;;  %v5571_v18 = vld [vmem:[#allocation39_spill] sm:$0xff]  ;;  %v5573_v33 = vld [vmem:[#allocation70_spill] sm:$0xff] }
 0x374   :  { %v2375_v34 = vmul.f32 %v5567_v49, %v2327_v39  ;;  %v2391_v51 = vmul.f32 %v2343_v1, %v5568_v6  ;;  %v2423_v16 = vmul.f32 %v2359_v38, %v5569_v11  ;;  %v2657_v44 = vsel %vm2648_vm7, %v2327_v39, 0.0 }
 0x375   :  { %v2674_v3 = vsel %vm2665_vm8, %v2343_v1, %v2657_v44  ;;  %3730 = vpow2.f32 %v2241_v50  ;;  %v2155_v29 = vmul.f32 1.442695, %v2125_v5  ;;  %v3719_v8 = vpop.eup %3718  ;;  %v2203_v19 = vmul.f32 1.442695, %v2173_v21 }
 0x376   :  { %v2407_v40 = vadd.f32 %v2391_v51, %v2375_v34  ;;  %v2691_v53 = vsel %vm2682_vm9, %v2359_v38, %v2674_v3  ;;  %3732 = vpow2.f32 %v2151_v28  ;;  %v3721_v4 = vpop.eup %3720  ;;  %v5570_v13 = vmax.f32 %v4578_v25, %v4743_v27 }
 0x377   :  { %2707 = vst [vmem:[#allocation19 + $0x40] sm:$0xff] %v2691_v53  ;;  %3734 = vpow2.f32 %v2199_v0  ;;  %vm2474_vm10 = vcmp.gt.f32.partialorder %v5088_v20, 0.0  ;;  %vm2477_vm11 = vcmp.gt.f32.partialorder %v5118_v37, 0.0  ;;  %v2938_v42 = vadd.f32 -1.0, %v3717_v54  ;;  %v3723_v26 = vpop.eup %3722 }
 0x378   :  { %v2108_v17 = vmax.f32 %v5570_v13, %v2076_v43  ;;  %v2496_v61 = vmin.f32 %v5214_v63, 0.0  ;;  %v5244_v57 = vadd.f32 %v2423_v16, %v2407_v40  ;;  %3736 = vpow2.f32 %v2247_v41 }
 0x379   :  { %v2251_v12 = vmul.f32 1.442695, %v2221_v36  ;;  %v2330_v14 = vmul.f32 %v3723_v26, %v5158_v35  ;;  %v2346_v2 = vmul.f32 %v3723_v26, %v5163_v59  ;;  %v2362_v45 = vmul.f32 %v3723_v26, %v5181_v46  ;;  %v3725_v15 = vpop.eup %3724 }
 0x37a   :  { %3738 = vpow2.f32 %v2155_v29  ;;  %v2124_v60 = vsub.f32 %v4578_v25, %v2108_v17  ;;  %v2172_v31 = vsub.f32 %v4743_v27, %v2108_v17  ;;  %v2929_v24 = vadd.f32 -1.0, %v3719_v8 }
 0x37b   :  { %3740 = vpow2.f32 %v2203_v19  ;;  %v2378_v48 = vmul.f32 %v5571_v18, %v2330_v14  ;;  %v2394_v23 = vmul.f32 %v5572_v55, %v2346_v2  ;;  %v2660_v56 = vsel %vm2648_vm7, %v2330_v14, 0.0 }
 0x37c   :  { %v2936_v35 = vadd.f32 -1.0, %v3721_v4  ;;  %v2426_v59 = vmul.f32 %v5573_v33, %v2362_v45  ;;  %v2677_v46 = vsel %vm2665_vm8, %v2346_v2, %v2660_v56  ;;  %3742 = vpow2.f32 %v2251_v12 }
 0x37d   :  { %v2153_v50 = vmul.f32 1.442695, %v2124_v60  ;;  %v2410_v25 = vadd.f32 %v2394_v23, %v2378_v48  ;;  %v2694_v27 = vsel %vm2682_vm9, %v2362_v45, %v2677_v46  ;;  %v2201_v28 = vmul.f32 1.442695, %v2172_v31 }
 0x37e   :  { %v2220_v10 = vsub.f32 %v2076_v43, %v2108_v17  ;;  %2710 = vst [vmem:[#allocation19 + $0x58] sm:$0xff] %v2694_v27  ;;  %v2078_v1 = vsel %vm1998_vm6, %v5095_v52, %v2929_v24  ;;  %vm2475_vm12 = vcmp.gt.f32.partialorder %v5156_v22, 0.0  ;;  %v2937_v38 = vadd.f32 -1.0, %v3725_v15  ;;  %v5576_v27 = vld [vmem:[#allocation71_spill] sm:$0xff] }
 0x37f   :  { %v5260_v39 = vpop.eup %3726  ;;  %3744 = vpow2.f32 %v2153_v50  ;;  %v2442_v0 = vadd.f32 %v2426_v59, %v2410_v25  ;;  %v2110_v5 = vmax.f32 %v2094_v32, %v2078_v1  ;;  %v2522_v43 = vmul.f32 1.442695, %v2496_v61  ;;  %v5575_v59 = vld [vmem:[#allocation55_spill] sm:$0xff] }
 0x380   :  { %3746 = vpow2.f32 %v2201_v28  ;;  %v2249_v41 = vmul.f32 1.442695, %v2220_v10  ;;  %v3729_v54 = vpop.eup %3728  ;;  %v2554_v49 = vsel %vm2474_vm10, %v5088_v20, %v5211_v58  ;;  %v2555_v34 = vsel %vm2475_vm12, %v5156_v22, %v2936_v35  ;;  %v5574_v35 = vld [vmem:[#allocation37_spill] sm:$0xff] }
 0x381   :  { %v2557_v52 = vsel %vm2477_vm11, %v5118_v37, %v2938_v42  ;;  %v5278_v6 = vadd.f32 %v4962_v7, %v2442_v0  ;;  %v2264_v51 = vadd.f32 %v3729_v54, %v5260_v39  ;;  %v2126_v32 = vsub.f32 %v5106_v30, %v2110_v5 }
 0x382   :  { %3748 = vpow2.f32 %v2249_v41  ;;  %v3731_v11 = vpop.eup %3730  ;;  %v2174_v16 = vsub.f32 %v5186_v9, %v2110_v5  ;;  %v2222_v44 = vsub.f32 %v2078_v1, %v2110_v5  ;;  %vm2476_vm13 = vcmp.gt.f32.partialorder %v5121_v62, 0.0 }
 0x383   :  { %v3104_v20 = vpack.c.bf16 %v2555_v34, %v2554_v49  ;;  %v3733_v22 = vpop.eup %3732  ;;  %v2497_v58 = vmin.f32 %v5278_v6, 0.0  ;;  %v2280_v3 = vadd.f32 %v3731_v11, %v2264_v51  ;;  %v2157_v37 = vmul.f32 1.442695, %v2126_v32 }
 0x384   :  { %v2556_v29 = vsel %vm2476_vm13, %v5121_v62, %v2937_v38  ;;  %v3735_v21 = vpop.eup %3734  ;;  %3750 = vpow2.f32 %v2522_v43  ;;  %v2205_v8 = vmul.f32 1.442695, %v2174_v16  ;;  %v2253_v4 = vmul.f32 1.442695, %v2222_v44  ;;  %v5578_v44 = vld [vmem:[#allocation57_spill] sm:$0xff] }
 0x385   :  { %3146 = vst [vmem:[#allocation18 + $0x10] sm:$0xff] %v3104_v20   ;;  %v3109_v40 = vpack.c.bf16 %v2557_v52, %v2556_v29  ;;  %v3737_v30 = vpop.eup %3736  ;;  %v2524_v53 = vmul.f32 1.442695, %v2497_v58  ;;  %3752 = vrcp.f32 %v2280_v3  ;;  %v2267_v9 = vadd.f32 %v3735_v21, %v3733_v22  ;;  %v5579_v3 = vld [vmem:[#allocation73_spill] sm:$0xff] }
 0x386   :  { %3754 = vpow2.f32 %v2157_v37  ;;  %v5288_v17 = vadd.f32 %v4962_v7, %v5244_v57  ;;  %vm2480_vm14 = vcmp.gt.f32.partialorder %v5214_v63, 0.0  ;;  %vm2481_vm15 = vcmp.gt.f32.partialorder %v5278_v6, 0.0 }
 0x387   :  { %v3739_v36 = vpop.eup %3738  ;;  %3147 = vst [vmem:[#allocation18 + $0x18] sm:$0xff] %v3109_v40   ;;  %3756 = vpow2.f32 %v2524_v53  ;;  %v2283_v13 = vadd.f32 %v3737_v30, %v2267_v9  ;;  %v5580_v53 = vld [vmem:[#allocation42_spill] sm:$0xff] }
 0x388   :  { %v3741_v19 = vpop.eup %3740  ;;  %3758 = vpow2.f32 %v2205_v8  ;;  %v2494_v14 = vmin.f32 %v5288_v17, 0.0  ;;  %vm2478_vm0 = vcmp.gt.f32.partialorder %v5288_v17, 0.0 }
 0x389   :  { %v2269_v62 = vadd.f32 %v3741_v19, %v3739_v36  ;;  %v3743_v42 = vpop.eup %3742  ;;  %3760 = vrcp.f32 %v2283_v13 }
 0x38a   :  { %3762 = vpow2.f32 %v2253_v4  ;;  %v2518_v60 = vmul.f32 1.442695, %v2494_v14  ;;  %v5581_v4 = vld [vmem:[#allocation56_spill] sm:$0xff] }
 0x38b   :  { %v2285_v26 = vadd.f32 %v3743_v42, %v2269_v62 }
 0x38c   :  { %v5290_v61 = vpop.eup %3744 }
 0x38d   :  { %v5292_v12 = vpop.eup %3746  ;;  %3764 = vrcp.f32 %v2285_v26 }
 0x38e   :  { %v2268_v2 = vadd.f32 %v5292_v12, %v5290_v61 }
 0x38f   :  { %v5297_v45 = vpop.eup %3748 }
 0x390   :  { %v2284_v57 = vadd.f32 %v5297_v45, %v2268_v2 }
 0x391   :  { %v3751_v31 = vpop.eup %3750 }
 0x392   :  { %3766 = vrcp.f32 %v2284_v57  ;;  %v3753_v24 = vpop.eup %3752  ;;  %v2941_v34 = vadd.f32 -1.0, %v3751_v31 }
 0x393   :  { %v5300_v15 = vpop.eup %3754  ;;  %v2328_v18 = vmul.f32 %v3753_v24, %v5260_v39  ;;  %v2344_v48 = vmul.f32 %v3753_v24, %v3729_v54  ;;  %v2360_v55 = vmul.f32 %v3753_v24, %v3731_v11  ;;  %3768 = vpow2.f32 %v2518_v60  ;;  %v5577_v11 = vld [vmem:[#allocation40_spill] sm:$0xff] }
 0x394   :  { %v3757_v23 = vpop.eup %3756  ;;  %v2560_v14 = vsel %vm2480_vm14, %v5214_v63, %v2941_v34 }
 0x395   :  { %v5304_v56 = vpop.eup %3758  ;;  %v2376_v33 = vmul.f32 %v5574_v35, %v2328_v18  ;;  %v2392_v46 = vmul.f32 %v2344_v48, %v5575_v59  ;;  %v2658_v50 = vsel %vm2648_vm7, %v2328_v18, 0.0  ;;  %v2424_v28 = vmul.f32 %v2360_v55, %v5576_v27  ;;  %v5582_v35 = vld [vmem:[#allocation41_spill] sm:$0xff]  ;;  %v5583_v59 = vld [vmem:[#allocation59_spill] sm:$0xff] }
 0x396   :  { %v3761_v25 = vpop.eup %3760  ;;  %v2675_v10 = vsel %vm2665_vm8, %v2344_v48, %v2658_v50  ;;  %v2270_v39 = vadd.f32 %v5304_v56, %v5300_v15  ;;  %v2942_v1 = vadd.f32 -1.0, %v3757_v23  ;;  %v5584_v50 = vld [vmem:[#allocation72_spill] sm:$0xff] }
 0x397   :  { %v5316_v38 = vpop.eup %3762  ;;  %v2408_v0 = vadd.f32 %v2392_v46, %v2376_v33  ;;  %v2692_v41 = vsel %vm2682_vm9, %v2360_v55, %v2675_v10  ;;  %v2331_v5 = vmul.f32 %v3761_v25, %v3733_v22  ;;  %v2347_v54 = vmul.f32 %v3761_v25, %v3735_v21 }
 0x398   :  { %2708 = vst [vmem:[#allocation19 + $0x48] sm:$0xff] %v2692_v41  ;;  %v2363_v43 = vmul.f32 %v3761_v25, %v3737_v30  ;;  %v2286_v49 = vadd.f32 %v5316_v38, %v2270_v39  ;;  %v2561_v52 = vsel %vm2481_vm15, %v5278_v6, %v2942_v1 }
 0x399   :  { %v2440_v32 = vadd.f32 %v2424_v28, %v2408_v0  ;;  %v2379_v16 = vmul.f32 %v5577_v11, %v2331_v5  ;;  %v2395_v20 = vmul.f32 %v2347_v54, %v5578_v44  ;;  %v2661_v58 = vsel %vm2648_vm7, %v2331_v5, 0.0  ;;  %v5585_v28 = vld [vmem:[#allocation75_spill] sm:$0xff]  ;;  %v5587_v44 = vld [vmem:[#allocation58_spill] sm:$0xff] }
 0x39a   :  { %v3765_v51 = vpop.eup %3764  ;;  %v2427_v37 = vmul.f32 %v2363_v43, %v5579_v3  ;;  %v2678_v22 = vsel %vm2665_vm8, %v2347_v54, %v2661_v58  ;;  %3770 = vrcp.f32 %v2286_v49  ;;  %v3119_v57 = vpack.c.bf16 %v2561_v52, %v2560_v14  ;;  %v5586_v11 = vld [vmem:[#allocation43_spill] sm:$0xff] }
 0x39b   :  { %v2333_v29 = vmul.f32 %v3765_v51, %v3739_v36  ;;  %v2349_v21 = vmul.f32 %v3765_v51, %v3741_v19  ;;  %v5330_v8 = vadd.f32 %v4962_v7, %v2440_v32  ;;  %v2411_v6 = vadd.f32 %v2395_v20, %v2379_v16 }
 0x39c   :  { %v2695_v40 = vsel %vm2682_vm9, %v2363_v43, %v2678_v22  ;;  %v2365_v30 = vmul.f32 %v3765_v51, %v3743_v42  ;;  %3149 = vst [vmem:[#allocation18 + $0x28] sm:$0xff] %v3119_v57  }
 0x39d   :  { %2711 = vst [vmem:[#allocation19 + $0x60] sm:$0xff] %v2695_v40  ;;  %v2381_v9 = vmul.f32 %v5580_v53, %v2333_v29  ;;  %v2397_v13 = vmul.f32 %v5581_v4, %v2349_v21  ;;  %v2663_v62 = vsel %vm2648_vm7, %v2333_v29, 0.0  ;;  %v2495_v36 = vmin.f32 %v5330_v8, 0.0 }
 0x39e   :  { %v2443_v19 = vadd.f32 %v2427_v37, %v2411_v6  ;;  %v2680_v26 = vsel %vm2665_vm8, %v2349_v21, %v2663_v62  ;;  %v2429_v25 = vmul.f32 %v5584_v50, %v2365_v30  ;;  %v5588_v37 = vld [vmem:[#allocation74_spill] sm:$0xff] }
 0x39f   :  { %v3767_v42 = vpop.eup %3766  ;;  %v2697_v2 = vsel %vm2682_vm9, %v2365_v30, %v2680_v26  ;;  %v2520_v60 = vmul.f32 1.442695, %v2495_v36  ;;  %v2413_v48 = vadd.f32 %v2397_v13, %v2381_v9 }
 0x3a0   :  { %v5347_v31 = vadd.f32 %v4962_v7, %v2443_v19  ;;  %2713 = vst [vmem:[#allocation19 + $0x70] sm:$0xff] %v2697_v2  ;;  %v2332_v24 = vmul.f32 %v3767_v42, %v5290_v61  ;;  %v2348_v18 = vmul.f32 %v3767_v42, %v5292_v12  ;;  %v2364_v55 = vmul.f32 %v3767_v42, %v5297_v45  ;;  %v3769_v23 = vpop.eup %3768 }
 0x3a1   :  { %3772 = vpow2.f32 %v2520_v60  ;;  %v2445_v10 = vadd.f32 %v2429_v25, %v2413_v48  ;;  %v2939_v3 = vadd.f32 -1.0, %v3769_v23 }
 0x3a2   :  { %v2498_v63 = vmin.f32 %v5347_v31, 0.0  ;;  %v2380_v33 = vmul.f32 %v5582_v35, %v2332_v24  ;;  %v2396_v46 = vmul.f32 %v2348_v18, %v5583_v59  ;;  %v2662_v27 = vsel %vm2648_vm7, %v2332_v24, 0.0 }
 0x3a3   :  { %v2428_v12 = vmul.f32 %v2364_v55, %v5585_v28  ;;  %v2679_v45 = vsel %vm2665_vm8, %v2348_v18, %v2662_v27  ;;  %v5365_v5 = vadd.f32 %v4962_v7, %v2445_v10 }
 0x3a4   :  { %v2412_v61 = vadd.f32 %v2396_v46, %v2380_v33  ;;  %v2696_v39 = vsel %vm2682_vm9, %v2364_v55, %v2679_v45  ;;  %v2526_v1 = vmul.f32 1.442695, %v2498_v63 }
 0x3a5   :  { %2712 = vst [vmem:[#allocation19 + $0x68] sm:$0xff] %v2696_v39  ;;  %v2500_v32 = vmin.f32 %v5365_v5, 0.0 }
 0x3a6   :  { %v2444_v0 = vadd.f32 %v2428_v12, %v2412_v61  ;;  %3774 = vpow2.f32 %v2526_v1 }
 0x3a7   :  { %v3771_v54 = vpop.eup %3770  ;;  %v2530_v6 = vmul.f32 1.442695, %v2500_v32 }
 0x3a8   :  { %v2467_v41 = vadd.f32 %v4962_v7, %v2444_v0  ;;  %v2334_v49 = vmul.f32 %v3771_v54, %v5300_v15  ;;  %v2350_v34 = vmul.f32 %v3771_v54, %v5304_v56  ;;  %v2366_v52 = vmul.f32 %v3771_v54, %v5316_v38 }
 0x3aa   :  { %v2499_v43 = vmin.f32 %v2467_v41, 0.0  ;;  %v2382_v16 = vmul.f32 %v5586_v11, %v2334_v49  ;;  %v2398_v20 = vmul.f32 %v5587_v44, %v2350_v34  ;;  %v2664_v58 = vsel %vm2648_vm7, %v2334_v49, 0.0 }
 0x3ab   :  { %v2681_v15 = vsel %vm2665_vm8, %v2350_v34, %v2664_v58  ;;  %v2430_v22 = vmul.f32 %v5588_v37, %v2366_v52  ;;  %vm2479_vm7 = vcmp.gt.f32.partialorder %v5330_v8, 0.0 }
 0x3ac   :  { %v2528_v51 = vmul.f32 1.442695, %v2499_v43  ;;  %v2414_v38 = vadd.f32 %v2398_v20, %v2382_v16  ;;  %v2698_v29 = vsel %vm2682_vm9, %v2366_v52, %v2681_v15 }
 0x3ad   :  { %2714 = vst [vmem:[#allocation19 + $0x78] sm:$0xff] %v2698_v29 }
 0x3ae   :  { %3776 = vpow2.f32 %v2528_v51  ;;  %v3773_v56 = vpop.eup %3772  ;;  %v2446_v40 = vadd.f32 %v2430_v22, %v2414_v38 }
 0x3af   :  { %v2940_v21 = vadd.f32 -1.0, %v3773_v56 }
 0x3b0   :  { %3953 = shalt.err (!%p3950_p2)
}
 0x3b1   :  { %2738 = dma.vmem_to_hbm [thread:$0]  %s2733_s28, 2048, %s5413_s12, [#allocation20], %s4002_s3, %s4002_s3, %s4003_s22   ;;  %v2558_v47 = vsel %vm2478_vm0, %v5288_v17, %v2939_v3  ;;  %v2559_v30 = vsel %vm2479_vm7, %v5330_v8, %v2940_v21  ;;  %v2469_v53 = vadd.f32 %v4962_v7, %v2446_v40  ;;  %3778 = vpow2.f32 %v2530_v6 }
 0x3b2   :  { %v3114_v9 = vpack.c.bf16 %v2559_v30, %v2558_v47  ;;  %vm2482_vm8 = vcmp.gt.f32.partialorder %v5347_v31, 0.0  ;;  %vm2483_vm9 = vcmp.gt.f32.partialorder %v2467_v41, 0.0  ;;  %s4009_s12 = smov [#allocation18]   ;;  %vm2484_vm1 = vcmp.gt.f32.partialorder %v5365_v5, 0.0 }
 0x3b3   :  { %v2501_v4 = vmin.f32 %v2469_v53, 0.0  ;;  %v3775_v13 = vpop.eup %3774  ;;  %s2720_s3 = sshll.u32 %s4009_s12, 4  ;;  %vm2485_vm2 = vcmp.gt.f32.partialorder %v2469_v53, 0.0  ;;  %s2721_s3 = int_to_ptr.vmem [resolvable:$true] %s2720_s3 }
 0x3b4   :  { %3148 = vst [vmem:[#allocation18 + $0x20] sm:$0xff] %v3114_v9   ;;  %v2943_v36 = vadd.f32 -1.0, %v3775_v13  ;;  %s3962_s22 = scalar_lea.vmem %s2721_s3, 1024  ;;  %p3967_p4 = scmp.lt.s32.totalorder %s2721_s3, %s2721_s3 }
 0x3b5   :  { %v2532_v62 = vmul.f32 1.442695, %v2501_v4  ;;  %p3963_p3 = scmp.ne.s32.totalorder %s2721_s3, %s3962_s22  ;;  %p3968_p5 = scmp.lt.s32.totalorder %s3962_s22, %s3962_s22 }
 0x3b6   :  { %v2562_v14 = vsel %vm2482_vm8, %v5347_v31, %v2943_v36 }
 0x3b7   :  { %3780 = vpow2.f32 %v2532_v62  ;;  %p3969_p6 = por %p3968_p5, %p3967_p4 }
 0x3b9   :  { %p3970_p7 = pnand %p3969_p6, %p3963_p3 }
 0x3bb   :  { %v3777_v19 = vpop.eup %3776 }
 0x3bc   :  { %v2944_v26 = vadd.f32 -1.0, %v3777_v19 }
 0x3be   :  { %v2563_v17 = vsel %vm2483_vm9, %v2467_v41, %v2944_v26  ;;  %v3779_v8 = vpop.eup %3778 }
 0x3bf   :  { %v3124_v42 = vpack.c.bf16 %v2563_v17, %v2562_v14  ;;  %v2945_v7 = vadd.f32 -1.0, %v3779_v8 }
 0x3c1   :  { %3150 = vst [vmem:[#allocation18 + $0x30] sm:$0xff] %v3124_v42   ;;  %v2564_v60 = vsel %vm2484_vm1, %v5365_v5, %v2945_v7 }
 0x3c4   :  { %v3781_v2 = vpop.eup %3780 }
 0x3c5   :  { %v2946_v57 = vadd.f32 -1.0, %v3781_v2 }
 0x3c7   :  { %v2565_v24 = vsel %vm2485_vm2, %v2469_v53, %v2946_v57 }
 0x3c8   :  { %v3129_v18 = vpack.c.bf16 %v2565_v24, %v2564_v60 }
 0x3ca   :  { %3151 = vst [vmem:[#allocation18 + $0x38] sm:$0xff] %v3129_v18  }
 0x3cb   :  { %3973 = shalt.err (!%p3970_p7)
}
 0x3cc   :  { %2726 = dma.vmem_to_hbm [thread:$0]  %s2721_s3, 1024, %s5412_s11, [#allocation6], %s3997_s24, %s3997_s24, %s3998_s25  }
 0x3cd   :  { %3992 = dma.done.wait [#allocation6], 1024  }
 0x3ce   :  { %3993 = vsyncadd [#allocation6], 4294966272 }
 0x3cf   :  { %3994 = dma.done.wait [#allocation20], 2048  }
 0x3d0   :  { %3995 = vsyncadd [#allocation20], 4294965248 }
 0x3d1   :  { %2745 = vsyncpa [#allocation5], 1 }
 0x3d2   :  { %2746 = vsyncpa [#allocation8], 1 }
 0x3d3   :  { %2747 = vsyncpa [#allocation11], 1 }
 0x3d4   :  { %2748 = vsyncpa [#allocation14], 1 }
 0x3d5   :  { %2749 = vsyncpa [#allocation17], 1 }
 0x3d6   :  { %2750 = vsyncpa [#allocation6], 1 }
 0x3d7   :  { %2751 = vsyncpa [#allocation20], 1 }

</bundles_post_ra>
